<compile_context>
chip_gen: v5e
topology: v5e:2x2
jax: 0.10.0
libtpu: 0.0.40
codegen_flags: <defaults>
</compile_context>

<pallas_src>
import functools
from typing import NamedTuple

import jax
import jax.numpy as jnp
from jax import lax
from jax.experimental import pallas as pl
from jax.experimental.pallas import tpu as pltpu

BN_EPS = 1e-5
VMEM_LIMIT_BYTES = 32 * 1024 * 1024  # explicit scoped-VMEM cap (fits v5e/v6e/v7x)


def _round_up(x, m):
    return (x + m - 1) // m * m


# --------------------------- geometry (per spatial size) ---------------------

class ConvGeom(NamedTuple):
    H: int
    W: int
    Hp: int
    Wp: int
    P_out: int      # H * Wp flat output space (2 discarded cols per row)
    TM: int         # lanes (flat output positions) per grid tile
    num_tiles: int
    P_store: int    # num_tiles * TM
    halo: int       # max tap offset = 2*Wp + 2
    win: int        # DMA window length per tile (TM + halo, rounded to 128)
    P_alloc: int    # allocated padded-flat input length
    offsets: tuple  # 9 static tap offsets a*Wp + b, a,b in [0,3)


def make_geom(H, W, max_tile_lanes=1024):
    Hp, Wp = H + 2, W + 2
    P_out = H * Wp
    if P_out <= 128:
        TM = P_out
    else:
        TM = min((P_out // 128) * 128, max_tile_lanes)
    num_tiles = (P_out + TM - 1) // TM
    P_store = num_tiles * TM
    halo = 2 * Wp + 2
    win = _round_up(TM + halo, 128)
    P_alloc = max(Hp * Wp, (num_tiles - 1) * TM + win)
    offsets = tuple(a * Wp + b for a in range(3) for b in range(3))
    return ConvGeom(H, W, Hp, Wp, P_out, TM, num_tiles, P_store,
                    halo, win, P_alloc, offsets)


# ------------------------------ Pallas kernels -------------------------------

def _conv_taps_kernel(offsets, tm, win, act, has_bias, want_stats, *refs):
    """Fused conv: double-buffered window DMA + 9 tap matmuls
    (+bias/act or masked BN partial stats)."""
    refs = list(refs)
    x_hbm = refs.pop(0)                       # (N, Cin, P_alloc) bf16, HBM (ANY)
    w_ref = refs.pop(0)                       # (9, Cout_p, Cin) bf16, resident
    b_ref = refs.pop(0) if has_bias else None     # (Cout_p, 1) f32
    mask_ref = refs.pop(0) if want_stats else None  # (1, TM) f32 valid-pixel mask
    o_ref = refs.pop(0)                       # (1, Cout_p, TM)
    stats_ref = refs.pop(0) if want_stats else None  # (1, 1, Cout_p, 2)
    xwin_ref = refs.pop(0)                    # VMEM (2, Cin, win) bf16 double buffer
    sem_ref = refs.pop(0)                     # DMA semaphores (2,)

    n = pl.program_id(0)
    m = pl.program_id(1)
    num_tiles = pl.num_programs(1)
    total = pl.num_programs(0) * num_tiles
    step = n * num_tiles + m
    slot = lax.rem(step, 2)
    m0 = m * tm

    def start_dma(dst_slot, src_n, src_start):
        pltpu.make_async_copy(x_hbm.at[src_n, :, pl.ds(src_start, win)],
                              xwin_ref.at[dst_slot],
                              sem_ref.at[dst_slot]).start()

    # Prime the pipeline on the very first grid step.
    @pl.when(step == 0)
    def _():
        start_dma(slot, n, m0)

    # Prefetch the next step's window (other slot) BEFORE waiting on this one,
    # so the DMA overlaps this tile's matmuls.  Safe because both grid axes are
    # "arbitrary" (sequential row-major iteration).
    @pl.when(step + 1 < total)
    def _():
        last_m = m == num_tiles - 1
        nxt_n = jnp.where(last_m, n + 1, n)
        nxt_start = jnp.where(last_m, 0, m0 + tm)
        start_dma(1 - slot, nxt_n, nxt_start)

    pltpu.make_async_copy(x_hbm.at[n, :, pl.ds(m0, win)],
                          xwin_ref.at[slot], sem_ref.at[slot]).wait()

    acc = None
    for k, off in enumerate(offsets):
        xs = xwin_ref[slot, :, off:off + tm]                 # (Cin, TM) bf16
        part = jnp.dot(w_ref[k], xs, preferred_element_type=jnp.float32)  # (Cout_p, TM)
        acc = part if acc is None else acc + part

    if has_bias:
        acc = acc + b_ref[...]
    if act == "relu":
        acc = jnp.maximum(acc, 0.0)
    elif act == "tanh":
        acc = jnp.tanh(acc)

    o_ref[0] = acc.astype(o_ref.dtype)

    if want_stats:
        msk = mask_ref[...]                                  # (1, TM)
        am = acc * msk
        stats_ref[0, 0, :, 0:1] = jnp.sum(am, axis=1, keepdims=True)
        stats_ref[0, 0, :, 1:2] = jnp.sum(am * acc, axis=1, keepdims=True)


def _bn_act_kernel(has_res, *refs):
    """y * scale + shift (+ residual) -> ReLU, lane-dense elementwise."""
    refs = list(refs)
    y_ref = refs.pop(0)                      # (1, C, TM)
    scale_ref = refs.pop(0)                  # (C, 1)
    shift_ref = refs.pop(0)                  # (C, 1)
    res_ref = refs.pop(0) if has_res else None
    o_ref = refs.pop(0)

    out = y_ref[0].astype(jnp.float32) * scale_ref[...] + shift_ref[...]
    if has_res:
        out = out + res_ref[0].astype(jnp.float32)
    o_ref[0] = jnp.maximum(out, 0.0).astype(o_ref.dtype)


# ------------------------------ kernel wrappers -------------------------------

def conv_taps(x_pf, w_taps, geom, *, bias=None, act=None,
              want_stats=False, col_mask=None, out_dtype=jnp.bfloat16):
    """x_pf: (N, Cin, P_alloc) bf16 padded-flat input.  w_taps: (9, Cout, Cin).
    Returns y (N, Cout, P_store) [, per-tile stats (N, T, Cout, 2)]."""
    N, cin, _ = x_pf.shape
    ntaps, cout, cin_w = w_taps.shape
    assert ntaps == len(geom.offsets) and cin_w == cin
    if want_stats:
        assert col_mask is not None

    cout_p = _round_up(cout, 8)
    if cout_p != cout:
        w_taps = jnp.pad(w_taps, ((0, 0), (0, cout_p - cout), (0, 0)))
    w_taps = w_taps.astype(jnp.bfloat16)

    in_specs = [pl.BlockSpec(memory_space=pl.ANY),                           # raw HBM input
                pl.BlockSpec((ntaps, cout_p, cin), lambda n, m: (0, 0, 0))]  # resident weights
    args = [x_pf, w_taps]

    if bias is not None:
        b = bias.reshape(cout, 1).astype(jnp.float32)
        if cout_p != cout:
            b = jnp.pad(b, ((0, cout_p - cout), (0, 0)))
        in_specs.append(pl.BlockSpec((cout_p, 1), lambda n, m: (0, 0)))
        args.append(b)

    if want_stats:
        in_specs.append(pl.BlockSpec((1, geom.TM), lambda n, m: (0, m)))
        args.append(col_mask)

    out_shape = [jax.ShapeDtypeStruct((N, cout_p, geom.P_store), out_dtype)]
    out_specs = [pl.BlockSpec((1, cout_p, geom.TM), lambda n, m: (n, 0, m))]
    if want_stats:
        out_shape.append(
            jax.ShapeDtypeStruct((N, geom.num_tiles, cout_p, 2), jnp.float32))
        out_specs.append(pl.BlockSpec((1, 1, cout_p, 2), lambda n, m: (n, m, 0, 0)))

    kernel = functools.partial(_conv_taps_kernel, geom.offsets, geom.TM, geom.win,
                               act, bias is not None, want_stats)

    res = pl.pallas_call(
        kernel,
        grid=(N, geom.num_tiles),
        in_specs=in_specs,
        out_specs=tuple(out_specs) if want_stats else out_specs[0],
        out_shape=tuple(out_shape) if want_stats else out_shape[0],
        scratch_shapes=[pltpu.VMEM((2, cin, geom.win), jnp.bfloat16),
                        pltpu.SemaphoreType.DMA((2,))],
        compiler_params=pltpu.CompilerParams(
            # sequential iteration order required by the cross-step prefetch
            dimension_semantics=("arbitrary", "arbitrary"),
            vmem_limit_bytes=VMEM_LIMIT_BYTES),
    )(*args)

    if want_stats:
        y, stats = res
        if cout_p != cout:
            y = y[:, :cout, :]
            stats = stats[:, :, :cout, :]
        return y, stats
    y = res
    if cout_p != cout:
        y = y[:, :cout, :]
    return y


def bn_relu(y, scale, shift, geom, residual=None):
    """Apply per-channel scale/shift (+ residual) + ReLU over (N, C, P_store)."""
    N, C, P_store = y.shape
    specs = [pl.BlockSpec((1, C, geom.TM), lambda n, m: (n, 0, m)),
             pl.BlockSpec((C, 1), lambda n, m: (0, 0)),
             pl.BlockSpec((C, 1), lambda n, m: (0, 0))]
    args = [y, scale, shift]
    if residual is not None:
        specs.append(pl.BlockSpec((1, C, geom.TM), lambda n, m: (n, 0, m)))
        args.append(residual)
    return pl.pallas_call(
        functools.partial(_bn_act_kernel, residual is not None),
        grid=(N, geom.num_tiles),
        in_specs=specs,
        out_specs=pl.BlockSpec((1, C, geom.TM), lambda n, m: (n, 0, m)),
        out_shape=jax.ShapeDtypeStruct((N, C, P_store), jnp.bfloat16),
        compiler_params=pltpu.CompilerParams(
            dimension_semantics=("parallel", "parallel"),
            vmem_limit_bytes=VMEM_LIMIT_BYTES),
    )(*args)


# ------------------------------- JAX glue ------------------------------------
# TODO(synk): the output-flat -> padded-flat relayout between layers is a small
# XLA elementwise fusion (HBM round trip); it could be folded into the bn_relu
# store by shifting the output window by Wp+1, at the cost of manual output DMA.

def to_pf(x_sp, geom):
    """NCHW spatial (N,C,H,W) -> padded-flat (N, C, P_alloc) bf16."""
    n, c = x_sp.shape[0], x_sp.shape[1]
    xp = jnp.pad(x_sp, ((0, 0), (0, 0), (1, 1), (1, 1)))
    flat = xp.reshape(n, c, geom.Hp * geom.Wp)
    flat = jnp.pad(flat, ((0, 0), (0, 0), (0, geom.P_alloc - geom.Hp * geom.Wp)))
    return flat.astype(jnp.bfloat16)


def from_of(y, geom):
    """Output-flat (N, C, P_store) -> NCHW spatial (N, C, H, W) (drop garbage cols)."""
    n, c = y.shape[0], y.shape[1]
    ys = y[:, :, :geom.P_out].reshape(n, c, geom.H, geom.Wp)
    return ys[:, :, :, :geom.W]


def make_col_mask(geom):
    p = jnp.arange(geom.P_store, dtype=jnp.int32)
    valid = (p < geom.P_out) & ((p % geom.Wp) < geom.W)
    return valid.astype(jnp.float32).reshape(1, geom.P_store)


def bn_scale_shift(stats, count, gamma, beta):
    """Reduce per-tile (sum, sumsq) -> global per-channel (scale, shift). Tiny glue."""
    tot = jnp.sum(stats, axis=(0, 1))                    # (C, 2)
    mean = tot[:, 0] / count
    var = tot[:, 1] / count - mean * mean                # biased variance (training BN)
    rstd = lax.rsqrt(var + BN_EPS)
    scale = gamma * rstd
    shift = beta - mean * scale
    return (scale.reshape(-1, 1).astype(jnp.float32),
            shift.reshape(-1, 1).astype(jnp.float32))


# weight -> stacked per-tap (Cout, Cin) matrices -------------------------------

def conv3x3_taps(w):
    """Conv2d weight (Cout, Cin, 3, 3) -> (9, Cout, Cin), tap index A*3+B."""
    cout, cin = w.shape[0], w.shape[1]
    return jnp.transpose(w, (2, 3, 0, 1)).reshape(9, cout, cin)


def convtrans3x3_taps(w):
    """ConvTranspose2d(k3,s1,p1) weight (Cin, Cout, 3, 3) -> flipped taps (9, Cout, Cin)."""
    cin, cout = w.shape[0], w.shape[1]
    wf = w[:, :, ::-1, ::-1]
    return jnp.transpose(wf, (2, 3, 1, 0)).reshape(9, cout, cin)


def convtrans4x4_s2_taps(w, b):
    """ConvTranspose2d(k4,s2,p1) weight (Cin, 3, 4, 4) -> merged sub-pixel taps.
    Output channel pc = (dy*2+dx)*3 + co for output phase (dy, dx)."""
    cin, cout = w.shape[0], w.shape[1]
    taps = []
    for A in range(3):
        for B in range(3):
            rows = []
            for dy in range(2):
                for dx in range(2):
                    ky = 3 + dy - 2 * A
                    kx = 3 + dx - 2 * B
                    if 0 <= ky < 4 and 0 <= kx < 4:
                        rows.append(jnp.transpose(w[:, :, ky, kx], (1, 0)))  # (Cout, Cin)
                    else:
                        rows.append(jnp.zeros((cout, cin), w.dtype))
            taps.append(jnp.concatenate(rows, axis=0))        # (4*Cout, Cin)
    w9 = jnp.stack(taps, axis=0)                              # (9, 12, Cin)
    b12 = jnp.tile(b, 4)                                      # (12,)
    return w9, b12


# ------------------------------- full model ----------------------------------

def generator_forward(params, content, style):
    """content, style: NCHW (N, 64, H, W) f32 -> NCHW (N, 3, 2H, 2W) f32."""
    N, _, H, W = content.shape
    geom = make_geom(H, W)
    count = float(N * H * W)
    col_mask = make_col_mask(geom)

    # x = content + style : plain JAX, fused by XLA with the pad/flatten prep.
    x0_pf = to_pf(content + style, geom)

    # ConvTranspose2d(64, 32, 3, 1, 1) + bias + ReLU
    x1 = conv_taps(x0_pf, convtrans3x3_taps(params["ct1_w"]), geom,
                   bias=params["ct1_b"], act="relu")

    def res_block(x_of, p):
        # NOTE: conv1 and conv2 cannot be fused into one kernel because the
        # BatchNorm between them needs *global* batch statistics (two passes).
        y1, st1 = conv_taps(to_pf(from_of(x_of, geom), geom),
                            conv3x3_taps(p["conv1_w"]), geom,
                            want_stats=True, col_mask=col_mask)
        sc1, sh1 = bn_scale_shift(st1, count, p["bn1_g"], p["bn1_b"])
        a1 = bn_relu(y1, sc1, sh1, geom)
        y2, st2 = conv_taps(to_pf(from_of(a1, geom), geom),
                            conv3x3_taps(p["conv2_w"]), geom,
                            want_stats=True, col_mask=col_mask)
        sc2, sh2 = bn_scale_shift(st2, count, p["bn2_g"], p["bn2_b"])
        return bn_relu(y2, sc2, sh2, geom, residual=x_of)

    rb1 = {k[4:]: v for k, v in params.items() if k.startswith("rb1_")}
    rb2 = {k[4:]: v for k, v in params.items() if k.startswith("rb2_")}
    x2 = res_block(x1, rb1)
    x3 = res_block(x2, rb2)

    # ConvTranspose2d(32, 3, 4, 2, 1) + bias + Tanh, sub-pixel decomposed.
    w9, b12 = convtrans4x4_s2_taps(params["ct2_w"], params["ct2_b"])
    z = conv_taps(to_pf(from_of(x3, geom), geom), w9, geom,
                  bias=b12, act="tanh", out_dtype=jnp.float32)   # (N, 12, P_store)

    z_sp = from_of(z, geom).reshape(N, 2, 2, 3, H, W)            # [n, dy, dx, co, q, r]
    out = jnp.transpose(z_sp, (0, 3, 4, 1, 5, 2))                # [n, co, q, dy, r, dx]
    return out.reshape(N, 3, 2 * H, 2 * W)


# ------------------------- pure-JAX reference (lax) ---------------------------

def _conv2d_ref(x, w):
    return lax.conv_general_dilated(
        x, w, window_strides=(1, 1), padding=((1, 1), (1, 1)),
        dimension_numbers=("NCHW", "OIHW", "NCHW"))


def _convtrans2d_ref(x, w, b, stride, padding):
    kh = w.shape[2]
    wflip = jnp.transpose(w[:, :, ::-1, ::-1], (1, 0, 2, 3))
    pad = kh - 1 - padding
    out = lax.conv_general_dilated(
        x, wflip, window_strides=(1, 1), padding=((pad, pad), (pad, pad)),
        lhs_dilation=(stride, stride),
        dimension_numbers=("NCHW", "OIHW", "NCHW"))
    return out + b.reshape(1, -1, 1, 1)


def _bn_ref(x, gamma, beta):
    mean = jnp.mean(x, axis=(0, 2, 3), keepdims=True)
    var = jnp.mean((x - mean) ** 2, axis=(0, 2, 3), keepdims=True)
    xn = (x - mean) * lax.rsqrt(var + BN_EPS)
    return xn * gamma.reshape(1, -1, 1, 1) + beta.reshape(1, -1, 1, 1)


def _resblock_ref(x, p):
    idt = x
    out = jax.nn.relu(_bn_ref(_conv2d_ref(x, p["conv1_w"]), p["bn1_g"], p["bn1_b"]))
    out = _bn_ref(_conv2d_ref(out, p["conv2_w"]), p["bn2_g"], p["bn2_b"])
    return jax.nn.relu(out + idt)


def reference_forward(params, content, style):
    x = content + style
    x = jax.nn.relu(_convtrans2d_ref(x, params["ct1_w"], params["ct1_b"], 1, 1))
    rb1 = {k[4:]: v for k, v in params.items() if k.startswith("rb1_")}
    rb2 = {k[4:]: v for k, v in params.items() if k.startswith("rb2_")}
    x = _resblock_ref(x, rb1)
    x = _resblock_ref(x, rb2)
    return jnp.tanh(_convtrans2d_ref(x, params["ct2_w"], params["ct2_b"], 2, 1))


# --------------------------------- params ------------------------------------

def init_params(key):
    ks = jax.random.split(key, 8)

    def rnd(k, shape, scale=0.05):
        return scale * jax.random.normal(k, shape, jnp.float32)

    ones = lambda c: jnp.ones((c,), jnp.float32)
    zeros = lambda c: jnp.zeros((c,), jnp.float32)
    return {
        "ct1_w": rnd(ks[0], (64, 32, 3, 3)),   # ConvTranspose2d weight (Cin, Cout, kh, kw)
        "ct1_b": rnd(ks[1], (32,)),
        "rb1_conv1_w": rnd(ks[2], (32, 32, 3, 3)),
        "rb1_conv2_w": rnd(ks[3], (32, 32, 3, 3)),
        "rb1_bn1_g": ones(32), "rb1_bn1_b": zeros(32),
        "rb1_bn2_g": ones(32), "rb1_bn2_b": zeros(32),
        "rb2_conv1_w": rnd(ks[4], (32, 32, 3, 3)),
        "rb2_conv2_w": rnd(ks[5], (32, 32, 3, 3)),
        "rb2_bn1_g": ones(32), "rb2_bn1_b": zeros(32),
        "rb2_bn2_g": ones(32), "rb2_bn2_b": zeros(32),
        "ct2_w": rnd(ks[6], (32, 3, 4, 4)),
        "ct2_b": rnd(ks[7], (3,)),
    }


if __name__ == "__main__":
    key = jax.random.PRNGKey(0)
    kp, kc, kst = jax.random.split(key, 3)
    params = init_params(kp)

    N, C, H, W = 2, 64, 16, 16
    content = jax.random.normal(kc, (N, C, H, W), jnp.float32)
    style = jax.random.normal(kst, (N, C, H, W), jnp.float32)

    out = jax.block_until_ready(jax.jit(generator_forward)(params, content, style))
    ref = jax.block_until_ready(jax.jit(reference_forward)(params, content, style))

    assert out.shape == (N, 3, 2 * H, 2 * W), out.shape
    assert bool(jnp.all(jnp.isfinite(out)))
    assert bool(jnp.all(jnp.abs(out) <= 1.0 + 1e-6))  # tanh range

    max_err = float(jnp.max(jnp.abs(out - ref)))
    mean_err = float(jnp.mean(jnp.abs(out - ref)))
    assert max_err < 0.2 and mean_err < 0.03, (max_err, mean_err)

    print("KERNEL_OK")
</pallas_src>

<mosaic_0001>
module attributes {stable_mosaic.version = 11 : i64} {
  func.func @_conv_taps_kernel(%arg0: i32, %arg1: i32, %arg2: memref<2x64x640xbf16, #tpu.memory_space<any>>, %arg3: memref<9x32x64xbf16, #tpu.memory_space<vmem>>, %arg4: memref<32x1xf32, #tpu.memory_space<vmem>>, %arg5: memref<1x32x256xbf16, #tpu.memory_space<vmem>>, %arg6: memref<2x64x384xbf16, #tpu.memory_space<vmem>>, %arg7: memref<2x!tpu.dma_semaphore, #tpu.memory_space<semaphore_mem>>) attributes {dimension_semantics = [#tpu.dimension_semantics<arbitrary>, #tpu.dimension_semantics<arbitrary>], iteration_bounds = array<i64: 2, 2>, scalar_prefetch = 0 : i64, scratch_operands = 2 : i64, tpu.core_type = #tpu.core_type<tc>, window_params = [{}, {pipeline_mode = #tpu.pipeline_mode<synchronous>, transform_indices = @transform_1, window_bounds = array<i64: 9, 32, 64>}, {pipeline_mode = #tpu.pipeline_mode<synchronous>, transform_indices = @transform_2, window_bounds = array<i64: 32, 1>}, {transform_indices = @transform_3, window_bounds = array<i64: 1, 32, 256>}]} {
    %c2_i32 = arith.constant 2 : i32
    %0 = arith.muli %arg0, %c2_i32 : i32
    %1 = arith.addi %0, %arg1 : i32
    %c2_i32_0 = arith.constant 2 : i32
    %2 = arith.remsi %1, %c2_i32_0 : i32
    %c256_i32 = arith.constant 256 : i32
    %3 = arith.muli %arg1, %c256_i32 : i32
    %c0_i32 = arith.constant 0 : i32
    %4 = arith.cmpi eq, %1, %c0_i32 : i32
    %5 = arith.extui %4 : i1 to i32
    %c0_i32_1 = arith.constant 0 : i32
    %6 = arith.cmpi ne, %5, %c0_i32_1 : i32
    scf.if %6 {
      %c0_i32_50 = arith.constant 0 : i32
      %88 = tpu.memref_slice %arg2[%arg0, %c0_i32_50, %3] : memref<2x64x640xbf16, #tpu.memory_space<any>> -> memref<1x64x384xbf16, #tpu.memory_space<any>>
      %89 = tpu.memref_squeeze %88 : memref<1x64x384xbf16, #tpu.memory_space<any>> -> memref<64x384xbf16, #tpu.memory_space<any>>
      %c0_i32_51 = arith.constant 0 : i32
      %c0_i32_52 = arith.constant 0 : i32
      %90 = tpu.memref_slice %arg6[%2, %c0_i32_51, %c0_i32_52] : memref<2x64x384xbf16, #tpu.memory_space<vmem>> -> memref<1x64x384xbf16, #tpu.memory_space<vmem>>
      %91 = tpu.memref_squeeze %90 : memref<1x64x384xbf16, #tpu.memory_space<vmem>> -> memref<64x384xbf16, #tpu.memory_space<vmem>>
      %92 = tpu.memref_slice %arg7[%2] : memref<2x!tpu.dma_semaphore, #tpu.memory_space<semaphore_mem>> -> memref<1x!tpu.dma_semaphore, #tpu.memory_space<semaphore_mem>>
      %93 = tpu.memref_squeeze %92 : memref<1x!tpu.dma_semaphore, #tpu.memory_space<semaphore_mem>> -> memref<!tpu.dma_semaphore, #tpu.memory_space<semaphore_mem>>
      tpu.enqueue_dma source(%89 : memref<64x384xbf16, #tpu.memory_space<any>>) target(%91 : memref<64x384xbf16, #tpu.memory_space<vmem>>) target_semaphore(%93 : memref<!tpu.dma_semaphore, #tpu.memory_space<semaphore_mem>>)
    } else {
    }
    %c1_i32 = arith.constant 1 : i32
    %7 = arith.addi %1, %c1_i32 : i32
    %c4_i32 = arith.constant 4 : i32
    %8 = arith.cmpi slt, %7, %c4_i32 : i32
    %9 = arith.extui %8 : i1 to i32
    %c0_i32_2 = arith.constant 0 : i32
    %10 = arith.cmpi ne, %9, %c0_i32_2 : i32
    scf.if %10 {
      %c1_i32_50 = arith.constant 1 : i32
      %88 = arith.cmpi eq, %arg1, %c1_i32_50 : i32
      %c1_i32_51 = arith.constant 1 : i32
      %89 = arith.addi %arg0, %c1_i32_51 : i32
      %90 = arith.select %88, %89, %arg0 : i32
      %c256_i32_52 = arith.constant 256 : i32
      %91 = arith.addi %3, %c256_i32_52 : i32
      %c0_i32_53 = arith.constant 0 : i32
      %92 = arith.select %88, %c0_i32_53, %91 : i32
      %c1_i32_54 = arith.constant 1 : i32
      %93 = arith.subi %c1_i32_54, %2 : i32
      %c0_i32_55 = arith.constant 0 : i32
      %94 = tpu.memref_slice %arg2[%90, %c0_i32_55, %92] : memref<2x64x640xbf16, #tpu.memory_space<any>> -> memref<1x64x384xbf16, #tpu.memory_space<any>>
      %95 = tpu.memref_squeeze %94 : memref<1x64x384xbf16, #tpu.memory_space<any>> -> memref<64x384xbf16, #tpu.memory_space<any>>
      %c0_i32_56 = arith.constant 0 : i32
      %c0_i32_57 = arith.constant 0 : i32
      %96 = tpu.memref_slice %arg6[%93, %c0_i32_56, %c0_i32_57] : memref<2x64x384xbf16, #tpu.memory_space<vmem>> -> memref<1x64x384xbf16, #tpu.memory_space<vmem>>
      %97 = tpu.memref_squeeze %96 : memref<1x64x384xbf16, #tpu.memory_space<vmem>> -> memref<64x384xbf16, #tpu.memory_space<vmem>>
      %98 = tpu.memref_slice %arg7[%93] : memref<2x!tpu.dma_semaphore, #tpu.memory_space<semaphore_mem>> -> memref<1x!tpu.dma_semaphore, #tpu.memory_space<semaphore_mem>>
      %99 = tpu.memref_squeeze %98 : memref<1x!tpu.dma_semaphore, #tpu.memory_space<semaphore_mem>> -> memref<!tpu.dma_semaphore, #tpu.memory_space<semaphore_mem>>
      tpu.enqueue_dma source(%95 : memref<64x384xbf16, #tpu.memory_space<any>>) target(%97 : memref<64x384xbf16, #tpu.memory_space<vmem>>) target_semaphore(%99 : memref<!tpu.dma_semaphore, #tpu.memory_space<semaphore_mem>>)
    } else {
    }
    %c0_i32_3 = arith.constant 0 : i32
    %11 = tpu.memref_slice %arg2[%arg0, %c0_i32_3, %3] : memref<2x64x640xbf16, #tpu.memory_space<any>> -> memref<1x64x384xbf16, #tpu.memory_space<any>>
    %12 = tpu.memref_squeeze %11 : memref<1x64x384xbf16, #tpu.memory_space<any>> -> memref<64x384xbf16, #tpu.memory_space<any>>
    %c0_i32_4 = arith.constant 0 : i32
    %c0_i32_5 = arith.constant 0 : i32
    %13 = tpu.memref_slice %arg6[%2, %c0_i32_4, %c0_i32_5] : memref<2x64x384xbf16, #tpu.memory_space<vmem>> -> memref<1x64x384xbf16, #tpu.memory_space<vmem>>
    %14 = tpu.memref_squeeze %13 : memref<1x64x384xbf16, #tpu.memory_space<vmem>> -> memref<64x384xbf16, #tpu.memory_space<vmem>>
    %15 = tpu.memref_slice %arg7[%2] : memref<2x!tpu.dma_semaphore, #tpu.memory_space<semaphore_mem>> -> memref<1x!tpu.dma_semaphore, #tpu.memory_space<semaphore_mem>>
    %16 = tpu.memref_squeeze %15 : memref<1x!tpu.dma_semaphore, #tpu.memory_space<semaphore_mem>> -> memref<!tpu.dma_semaphore, #tpu.memory_space<semaphore_mem>>
    tpu.wait_dma2 semaphore(%16 : memref<!tpu.dma_semaphore, #tpu.memory_space<semaphore_mem>>) src(%12 : memref<64x384xbf16, #tpu.memory_space<any>>) dst(%14 : memref<64x384xbf16, #tpu.memory_space<vmem>>)
    %17 = arith.index_cast %2 : i32 to index
    %c0 = arith.constant 0 : index
    %c0_6 = arith.constant 0 : index
    %18 = vector.load %arg6[%17, %c0, %c0_6] : memref<2x64x384xbf16, #tpu.memory_space<vmem>>, vector<1x64x256xbf16>
    %19 = vector.shape_cast %18 : vector<1x64x256xbf16> to vector<64x256xbf16>
    %c0_7 = arith.constant 0 : index
    %c0_8 = arith.constant 0 : index
    %c0_9 = arith.constant 0 : index
    %20 = vector.load %arg3[%c0_7, %c0_8, %c0_9] : memref<9x32x64xbf16, #tpu.memory_space<vmem>>, vector<1x32x64xbf16>
    %21 = vector.shape_cast %20 : vector<1x32x64xbf16> to vector<32x64xbf16>
    %cst = arith.constant dense<0.000000e+00> : vector<32x256xf32>
    %22 = tpu.matmul %21, %19, %cst {dimension_numbers = #tpu.dot_dimension_numbers<[1], [0], [0], [1], [0, 0, 1, 1], [], []>} : vector<32x64xbf16>, vector<64x256xbf16>, vector<32x256xf32> -> vector<32x256xf32>
    %23 = arith.index_cast %2 : i32 to index
    %c0_10 = arith.constant 0 : index
    %c1 = arith.constant 1 : index
    %24 = vector.load %arg6[%23, %c0_10, %c1] : memref<2x64x384xbf16, #tpu.memory_space<vmem>>, vector<1x64x256xbf16>
    %25 = vector.shape_cast %24 : vector<1x64x256xbf16> to vector<64x256xbf16>
    %c1_11 = arith.constant 1 : index
    %c0_12 = arith.constant 0 : index
    %c0_13 = arith.constant 0 : index
    %26 = vector.load %arg3[%c1_11, %c0_12, %c0_13] : memref<9x32x64xbf16, #tpu.memory_space<vmem>>, vector<1x32x64xbf16>
    %27 = vector.shape_cast %26 : vector<1x32x64xbf16> to vector<32x64xbf16>
    %cst_14 = arith.constant dense<0.000000e+00> : vector<32x256xf32>
    %28 = tpu.matmul %27, %25, %cst_14 {dimension_numbers = #tpu.dot_dimension_numbers<[1], [0], [0], [1], [0, 0, 1, 1], [], []>} : vector<32x64xbf16>, vector<64x256xbf16>, vector<32x256xf32> -> vector<32x256xf32>
    %29 = arith.addf %22, %28 : vector<32x256xf32>
    %30 = arith.index_cast %2 : i32 to index
    %c0_15 = arith.constant 0 : index
    %c2 = arith.constant 2 : index
    %31 = vector.load %arg6[%30, %c0_15, %c2] : memref<2x64x384xbf16, #tpu.memory_space<vmem>>, vector<1x64x256xbf16>
    %32 = vector.shape_cast %31 : vector<1x64x256xbf16> to vector<64x256xbf16>
    %c2_16 = arith.constant 2 : index
    %c0_17 = arith.constant 0 : index
    %c0_18 = arith.constant 0 : index
    %33 = vector.load %arg3[%c2_16, %c0_17, %c0_18] : memref<9x32x64xbf16, #tpu.memory_space<vmem>>, vector<1x32x64xbf16>
    %34 = vector.shape_cast %33 : vector<1x32x64xbf16> to vector<32x64xbf16>
    %cst_19 = arith.constant dense<0.000000e+00> : vector<32x256xf32>
    %35 = tpu.matmul %34, %32, %cst_19 {dimension_numbers = #tpu.dot_dimension_numbers<[1], [0], [0], [1], [0, 0, 1, 1], [], []>} : vector<32x64xbf16>, vector<64x256xbf16>, vector<32x256xf32> -> vector<32x256xf32>
    %36 = arith.addf %29, %35 : vector<32x256xf32>
    %37 = arith.index_cast %2 : i32 to index
    %c0_20 = arith.constant 0 : index
    %c18 = arith.constant 18 : index
    %38 = vector.load %arg6[%37, %c0_20, %c18] : memref<2x64x384xbf16, #tpu.memory_space<vmem>>, vector<1x64x256xbf16>
    %39 = vector.shape_cast %38 : vector<1x64x256xbf16> to vector<64x256xbf16>
    %c3 = arith.constant 3 : index
    %c0_21 = arith.constant 0 : index
    %c0_22 = arith.constant 0 : index
    %40 = vector.load %arg3[%c3, %c0_21, %c0_22] : memref<9x32x64xbf16, #tpu.memory_space<vmem>>, vector<1x32x64xbf16>
    %41 = vector.shape_cast %40 : vector<1x32x64xbf16> to vector<32x64xbf16>
    %cst_23 = arith.constant dense<0.000000e+00> : vector<32x256xf32>
    %42 = tpu.matmul %41, %39, %cst_23 {dimension_numbers = #tpu.dot_dimension_numbers<[1], [0], [0], [1], [0, 0, 1, 1], [], []>} : vector<32x64xbf16>, vector<64x256xbf16>, vector<32x256xf32> -> vector<32x256xf32>
    %43 = arith.addf %36, %42 : vector<32x256xf32>
    %44 = arith.index_cast %2 : i32 to index
    %c0_24 = arith.constant 0 : index
    %c19 = arith.constant 19 : index
    %45 = vector.load %arg6[%44, %c0_24, %c19] : memref<2x64x384xbf16, #tpu.memory_space<vmem>>, vector<1x64x256xbf16>
    %46 = vector.shape_cast %45 : vector<1x64x256xbf16> to vector<64x256xbf16>
    %c4 = arith.constant 4 : index
    %c0_25 = arith.constant 0 : index
    %c0_26 = arith.constant 0 : index
    %47 = vector.load %arg3[%c4, %c0_25, %c0_26] : memref<9x32x64xbf16, #tpu.memory_space<vmem>>, vector<1x32x64xbf16>
    %48 = vector.shape_cast %47 : vector<1x32x64xbf16> to vector<32x64xbf16>
    %cst_27 = arith.constant dense<0.000000e+00> : vector<32x256xf32>
    %49 = tpu.matmul %48, %46, %cst_27 {dimension_numbers = #tpu.dot_dimension_numbers<[1], [0], [0], [1], [0, 0, 1, 1], [], []>} : vector<32x64xbf16>, vector<64x256xbf16>, vector<32x256xf32> -> vector<32x256xf32>
    %50 = arith.addf %43, %49 : vector<32x256xf32>
    %51 = arith.index_cast %2 : i32 to index
    %c0_28 = arith.constant 0 : index
    %c20 = arith.constant 20 : index
    %52 = vector.load %arg6[%51, %c0_28, %c20] : memref<2x64x384xbf16, #tpu.memory_space<vmem>>, vector<1x64x256xbf16>
    %53 = vector.shape_cast %52 : vector<1x64x256xbf16> to vector<64x256xbf16>
    %c5 = arith.constant 5 : index
    %c0_29 = arith.constant 0 : index
    %c0_30 = arith.constant 0 : index
    %54 = vector.load %arg3[%c5, %c0_29, %c0_30] : memref<9x32x64xbf16, #tpu.memory_space<vmem>>, vector<1x32x64xbf16>
    %55 = vector.shape_cast %54 : vector<1x32x64xbf16> to vector<32x64xbf16>
    %cst_31 = arith.constant dense<0.000000e+00> : vector<32x256xf32>
    %56 = tpu.matmul %55, %53, %cst_31 {dimension_numbers = #tpu.dot_dimension_numbers<[1], [0], [0], [1], [0, 0, 1, 1], [], []>} : vector<32x64xbf16>, vector<64x256xbf16>, vector<32x256xf32> -> vector<32x256xf32>
    %57 = arith.addf %50, %56 : vector<32x256xf32>
    %58 = arith.index_cast %2 : i32 to index
    %c0_32 = arith.constant 0 : index
    %c36 = arith.constant 36 : index
    %59 = vector.load %arg6[%58, %c0_32, %c36] : memref<2x64x384xbf16, #tpu.memory_space<vmem>>, vector<1x64x256xbf16>
    %60 = vector.shape_cast %59 : vector<1x64x256xbf16> to vector<64x256xbf16>
    %c6 = arith.constant 6 : index
    %c0_33 = arith.constant 0 : index
    %c0_34 = arith.constant 0 : index
    %61 = vector.load %arg3[%c6, %c0_33, %c0_34] : memref<9x32x64xbf16, #tpu.memory_space<vmem>>, vector<1x32x64xbf16>
    %62 = vector.shape_cast %61 : vector<1x32x64xbf16> to vector<32x64xbf16>
    %cst_35 = arith.constant dense<0.000000e+00> : vector<32x256xf32>
    %63 = tpu.matmul %62, %60, %cst_35 {dimension_numbers = #tpu.dot_dimension_numbers<[1], [0], [0], [1], [0, 0, 1, 1], [], []>} : vector<32x64xbf16>, vector<64x256xbf16>, vector<32x256xf32> -> vector<32x256xf32>
    %64 = arith.addf %57, %63 : vector<32x256xf32>
    %65 = arith.index_cast %2 : i32 to index
    %c0_36 = arith.constant 0 : index
    %c37 = arith.constant 37 : index
    %66 = vector.load %arg6[%65, %c0_36, %c37] : memref<2x64x384xbf16, #tpu.memory_space<vmem>>, vector<1x64x256xbf16>
    %67 = vector.shape_cast %66 : vector<1x64x256xbf16> to vector<64x256xbf16>
    %c7 = arith.constant 7 : index
    %c0_37 = arith.constant 0 : index
    %c0_38 = arith.constant 0 : index
    %68 = vector.load %arg3[%c7, %c0_37, %c0_38] : memref<9x32x64xbf16, #tpu.memory_space<vmem>>, vector<1x32x64xbf16>
    %69 = vector.shape_cast %68 : vector<1x32x64xbf16> to vector<32x64xbf16>
    %cst_39 = arith.constant dense<0.000000e+00> : vector<32x256xf32>
    %70 = tpu.matmul %69, %67, %cst_39 {dimension_numbers = #tpu.dot_dimension_numbers<[1], [0], [0], [1], [0, 0, 1, 1], [], []>} : vector<32x64xbf16>, vector<64x256xbf16>, vector<32x256xf32> -> vector<32x256xf32>
    %71 = arith.addf %64, %70 : vector<32x256xf32>
    %72 = arith.index_cast %2 : i32 to index
    %c0_40 = arith.constant 0 : index
    %c38 = arith.constant 38 : index
    %73 = vector.load %arg6[%72, %c0_40, %c38] : memref<2x64x384xbf16, #tpu.memory_space<vmem>>, vector<1x64x256xbf16>
    %74 = vector.shape_cast %73 : vector<1x64x256xbf16> to vector<64x256xbf16>
    %c8 = arith.constant 8 : index
    %c0_41 = arith.constant 0 : index
    %c0_42 = arith.constant 0 : index
    %75 = vector.load %arg3[%c8, %c0_41, %c0_42] : memref<9x32x64xbf16, #tpu.memory_space<vmem>>, vector<1x32x64xbf16>
    %76 = vector.shape_cast %75 : vector<1x32x64xbf16> to vector<32x64xbf16>
    %cst_43 = arith.constant dense<0.000000e+00> : vector<32x256xf32>
    %77 = tpu.matmul %76, %74, %cst_43 {dimension_numbers = #tpu.dot_dimension_numbers<[1], [0], [0], [1], [0, 0, 1, 1], [], []>} : vector<32x64xbf16>, vector<64x256xbf16>, vector<32x256xf32> -> vector<32x256xf32>
    %78 = arith.addf %71, %77 : vector<32x256xf32>
    %c0_44 = arith.constant 0 : index
    %c0_45 = arith.constant 0 : index
    %79 = vector.load %arg4[%c0_44, %c0_45] : memref<32x1xf32, #tpu.memory_space<vmem>>, vector<32x1xf32>
    %80 = vector.broadcast %79 : vector<32x1xf32> to vector<32x256xf32>
    %81 = arith.addf %78, %80 : vector<32x256xf32>
    %cst_46 = arith.constant 0.000000e+00 : f32
    %82 = vector.broadcast %cst_46 : f32 to vector<32x256xf32>
    %83 = arith.maximumf %81, %82 : vector<32x256xf32>
    %84 = arith.truncf %83 : vector<32x256xf32> to vector<32x256xbf16>
    %c0_47 = arith.constant 0 : index
    %c0_48 = arith.constant 0 : index
    %c0_49 = arith.constant 0 : index
    %85 = vector.load %arg5[%c0_47, %c0_48, %c0_49] : memref<1x32x256xbf16, #tpu.memory_space<vmem>>, vector<1x32x256xbf16>
    %86 = vector.shape_cast %85 : vector<1x32x256xbf16> to vector<32x256xbf16>
    %87 = vector.shape_cast %84 : vector<32x256xbf16> to vector<1x32x256xbf16>
    tpu.vector_store %arg5[%c0_47, %c0_48, %c0_49], %87 {strides = array<i32>} : memref<1x32x256xbf16, #tpu.memory_space<vmem>>, vector<1x32x256xbf16>,
    return
  }
  func.func @transform_1(%arg0: i32, %arg1: i32) -> (i32, i32, i32) {
    %c0_i32 = arith.constant 0 : i32
    %c0_i32_0 = arith.constant 0 : i32
    %c0_i32_1 = arith.constant 0 : i32
    %c0_i32_2 = arith.constant 0 : i32
    return %c0_i32, %c0_i32_0, %c0_i32_1 : i32, i32, i32
  }
  func.func @transform_2(%arg0: i32, %arg1: i32) -> (i32, i32) {
    %c0_i32 = arith.constant 0 : i32
    %c0_i32_0 = arith.constant 0 : i32
    %c0_i32_1 = arith.constant 0 : i32
    return %c0_i32, %c0_i32_0 : i32, i32
  }
  func.func @transform_3(%arg0: i32, %arg1: i32) -> (i32, i32, i32) {
    %c0_i32 = arith.constant 0 : i32
    %c0_i32_0 = arith.constant 0 : i32
    return %arg0, %c0_i32, %arg1 : i32, i32, i32
  }
}

module attributes {stable_mosaic.version = 11 : i64} {
  func.func @_conv_taps_kernel(%arg0: i32, %arg1: i32, %arg2: memref<2x32x640xbf16, #tpu.memory_space<any>>, %arg3: memref<9x32x32xbf16, #tpu.memory_space<vmem>>, %arg4: memref<1x256xf32, #tpu.memory_space<vmem>>, %arg5: memref<1x32x256xbf16, #tpu.memory_space<vmem>>, %arg6: memref<1x1x32x2xf32, #tpu.memory_space<vmem>>, %arg7: memref<2x32x384xbf16, #tpu.memory_space<vmem>>, %arg8: memref<2x!tpu.dma_semaphore, #tpu.memory_space<semaphore_mem>>) attributes {dimension_semantics = [#tpu.dimension_semantics<arbitrary>, #tpu.dimension_semantics<arbitrary>], iteration_bounds = array<i64: 2, 2>, scalar_prefetch = 0 : i64, scratch_operands = 2 : i64, tpu.core_type = #tpu.core_type<tc>, window_params = [{}, {pipeline_mode = #tpu.pipeline_mode<synchronous>, transform_indices = @transform_1, window_bounds = array<i64: 9, 32, 32>}, {transform_indices = @transform_2, window_bounds = array<i64: 1, 256>}, {transform_indices = @transform_3, window_bounds = array<i64: 1, 32, 256>}, {transform_indices = @transform_4, window_bounds = array<i64: 1, 1, 32, 2>}]} {
    %c2_i32 = arith.constant 2 : i32
    %0 = arith.muli %arg0, %c2_i32 : i32
    %1 = arith.addi %0, %arg1 : i32
    %c2_i32_0 = arith.constant 2 : i32
    %2 = arith.remsi %1, %c2_i32_0 : i32
    %c256_i32 = arith.constant 256 : i32
    %3 = arith.muli %arg1, %c256_i32 : i32
    %c0_i32 = arith.constant 0 : i32
    %4 = arith.cmpi eq, %1, %c0_i32 : i32
    %5 = arith.extui %4 : i1 to i32
    %c0_i32_1 = arith.constant 0 : i32
    %6 = arith.cmpi ne, %5, %c0_i32_1 : i32
    scf.if %6 {
      %c0_i32_59 = arith.constant 0 : i32
      %97 = tpu.memref_slice %arg2[%arg0, %c0_i32_59, %3] : memref<2x32x640xbf16, #tpu.memory_space<any>> -> memref<1x32x384xbf16, #tpu.memory_space<any>>
      %98 = tpu.memref_squeeze %97 : memref<1x32x384xbf16, #tpu.memory_space<any>> -> memref<32x384xbf16, #tpu.memory_space<any>>
      %c0_i32_60 = arith.constant 0 : i32
      %c0_i32_61 = arith.constant 0 : i32
      %99 = tpu.memref_slice %arg7[%2, %c0_i32_60, %c0_i32_61] : memref<2x32x384xbf16, #tpu.memory_space<vmem>> -> memref<1x32x384xbf16, #tpu.memory_space<vmem>>
      %100 = tpu.memref_squeeze %99 : memref<1x32x384xbf16, #tpu.memory_space<vmem>> -> memref<32x384xbf16, #tpu.memory_space<vmem>>
      %101 = tpu.memref_slice %arg8[%2] : memref<2x!tpu.dma_semaphore, #tpu.memory_space<semaphore_mem>> -> memref<1x!tpu.dma_semaphore, #tpu.memory_space<semaphore_mem>>
      %102 = tpu.memref_squeeze %101 : memref<1x!tpu.dma_semaphore, #tpu.memory_space<semaphore_mem>> -> memref<!tpu.dma_semaphore, #tpu.memory_space<semaphore_mem>>
      tpu.enqueue_dma source(%98 : memref<32x384xbf16, #tpu.memory_space<any>>) target(%100 : memref<32x384xbf16, #tpu.memory_space<vmem>>) target_semaphore(%102 : memref<!tpu.dma_semaphore, #tpu.memory_space<semaphore_mem>>)
    } else {
    }
    %c1_i32 = arith.constant 1 : i32
    %7 = arith.addi %1, %c1_i32 : i32
    %c4_i32 = arith.constant 4 : i32
    %8 = arith.cmpi slt, %7, %c4_i32 : i32
    %9 = arith.extui %8 : i1 to i32
    %c0_i32_2 = arith.constant 0 : i32
    %10 = arith.cmpi ne, %9, %c0_i32_2 : i32
    scf.if %10 {
      %c1_i32_59 = arith.constant 1 : i32
      %97 = arith.cmpi eq, %arg1, %c1_i32_59 : i32
      %c1_i32_60 = arith.constant 1 : i32
      %98 = arith.addi %arg0, %c1_i32_60 : i32
      %99 = arith.select %97, %98, %arg0 : i32
      %c256_i32_61 = arith.constant 256 : i32
      %100 = arith.addi %3, %c256_i32_61 : i32
      %c0_i32_62 = arith.constant 0 : i32
      %101 = arith.select %97, %c0_i32_62, %100 : i32
      %c1_i32_63 = arith.constant 1 : i32
      %102 = arith.subi %c1_i32_63, %2 : i32
      %c0_i32_64 = arith.constant 0 : i32
      %103 = tpu.memref_slice %arg2[%99, %c0_i32_64, %101] : memref<2x32x640xbf16, #tpu.memory_space<any>> -> memref<1x32x384xbf16, #tpu.memory_space<any>>
      %104 = tpu.memref_squeeze %103 : memref<1x32x384xbf16, #tpu.memory_space<any>> -> memref<32x384xbf16, #tpu.memory_space<any>>
      %c0_i32_65 = arith.constant 0 : i32
      %c0_i32_66 = arith.constant 0 : i32
      %105 = tpu.memref_slice %arg7[%102, %c0_i32_65, %c0_i32_66] : memref<2x32x384xbf16, #tpu.memory_space<vmem>> -> memref<1x32x384xbf16, #tpu.memory_space<vmem>>
      %106 = tpu.memref_squeeze %105 : memref<1x32x384xbf16, #tpu.memory_space<vmem>> -> memref<32x384xbf16, #tpu.memory_space<vmem>>
      %107 = tpu.memref_slice %arg8[%102] : memref<2x!tpu.dma_semaphore, #tpu.memory_space<semaphore_mem>> -> memref<1x!tpu.dma_semaphore, #tpu.memory_space<semaphore_mem>>
      %108 = tpu.memref_squeeze %107 : memref<1x!tpu.dma_semaphore, #tpu.memory_space<semaphore_mem>> -> memref<!tpu.dma_semaphore, #tpu.memory_space<semaphore_mem>>
      tpu.enqueue_dma source(%104 : memref<32x384xbf16, #tpu.memory_space<any>>) target(%106 : memref<32x384xbf16, #tpu.memory_space<vmem>>) target_semaphore(%108 : memref<!tpu.dma_semaphore, #tpu.memory_space<semaphore_mem>>)
    } else {
    }
    %c0_i32_3 = arith.constant 0 : i32
    %11 = tpu.memref_slice %arg2[%arg0, %c0_i32_3, %3] : memref<2x32x640xbf16, #tpu.memory_space<any>> -> memref<1x32x384xbf16, #tpu.memory_space<any>>
    %12 = tpu.memref_squeeze %11 : memref<1x32x384xbf16, #tpu.memory_space<any>> -> memref<32x384xbf16, #tpu.memory_space<any>>
    %c0_i32_4 = arith.constant 0 : i32
    %c0_i32_5 = arith.constant 0 : i32
    %13 = tpu.memref_slice %arg7[%2, %c0_i32_4, %c0_i32_5] : memref<2x32x384xbf16, #tpu.memory_space<vmem>> -> memref<1x32x384xbf16, #tpu.memory_space<vmem>>
    %14 = tpu.memref_squeeze %13 : memref<1x32x384xbf16, #tpu.memory_space<vmem>> -> memref<32x384xbf16, #tpu.memory_space<vmem>>
    %15 = tpu.memref_slice %arg8[%2] : memref<2x!tpu.dma_semaphore, #tpu.memory_space<semaphore_mem>> -> memref<1x!tpu.dma_semaphore, #tpu.memory_space<semaphore_mem>>
    %16 = tpu.memref_squeeze %15 : memref<1x!tpu.dma_semaphore, #tpu.memory_space<semaphore_mem>> -> memref<!tpu.dma_semaphore, #tpu.memory_space<semaphore_mem>>
    tpu.wait_dma2 semaphore(%16 : memref<!tpu.dma_semaphore, #tpu.memory_space<semaphore_mem>>) src(%12 : memref<32x384xbf16, #tpu.memory_space<any>>) dst(%14 : memref<32x384xbf16, #tpu.memory_space<vmem>>)
    %17 = arith.index_cast %2 : i32 to index
    %c0 = arith.constant 0 : index
    %c0_6 = arith.constant 0 : index
    %18 = vector.load %arg7[%17, %c0, %c0_6] : memref<2x32x384xbf16, #tpu.memory_space<vmem>>, vector<1x32x256xbf16>
    %19 = vector.shape_cast %18 : vector<1x32x256xbf16> to vector<32x256xbf16>
    %c0_7 = arith.constant 0 : index
    %c0_8 = arith.constant 0 : index
    %c0_9 = arith.constant 0 : index
    %20 = vector.load %arg3[%c0_7, %c0_8, %c0_9] : memref<9x32x32xbf16, #tpu.memory_space<vmem>>, vector<1x32x32xbf16>
    %21 = vector.shape_cast %20 : vector<1x32x32xbf16> to vector<32x32xbf16>
    %cst = arith.constant dense<0.000000e+00> : vector<32x256xf32>
    %22 = tpu.matmul %21, %19, %cst {dimension_numbers = #tpu.dot_dimension_numbers<[1], [0], [0], [1], [0, 0, 1, 1], [], []>} : vector<32x32xbf16>, vector<32x256xbf16>, vector<32x256xf32> -> vector<32x256xf32>
    %23 = arith.index_cast %2 : i32 to index
    %c0_10 = arith.constant 0 : index
    %c1 = arith.constant 1 : index
    %24 = vector.load %arg7[%23, %c0_10, %c1] : memref<2x32x384xbf16, #tpu.memory_space<vmem>>, vector<1x32x256xbf16>
    %25 = vector.shape_cast %24 : vector<1x32x256xbf16> to vector<32x256xbf16>
    %c1_11 = arith.constant 1 : index
    %c0_12 = arith.constant 0 : index
    %c0_13 = arith.constant 0 : index
    %26 = vector.load %arg3[%c1_11, %c0_12, %c0_13] : memref<9x32x32xbf16, #tpu.memory_space<vmem>>, vector<1x32x32xbf16>
    %27 = vector.shape_cast %26 : vector<1x32x32xbf16> to vector<32x32xbf16>
    %cst_14 = arith.constant dense<0.000000e+00> : vector<32x256xf32>
    %28 = tpu.matmul %27, %25, %cst_14 {dimension_numbers = #tpu.dot_dimension_numbers<[1], [0], [0], [1], [0, 0, 1, 1], [], []>} : vector<32x32xbf16>, vector<32x256xbf16>, vector<32x256xf32> -> vector<32x256xf32>
    %29 = arith.addf %22, %28 : vector<32x256xf32>
    %30 = arith.index_cast %2 : i32 to index
    %c0_15 = arith.constant 0 : index
    %c2 = arith.constant 2 : index
    %31 = vector.load %arg7[%30, %c0_15, %c2] : memref<2x32x384xbf16, #tpu.memory_space<vmem>>, vector<1x32x256xbf16>
    %32 = vector.shape_cast %31 : vector<1x32x256xbf16> to vector<32x256xbf16>
    %c2_16 = arith.constant 2 : index
    %c0_17 = arith.constant 0 : index
    %c0_18 = arith.constant 0 : index
    %33 = vector.load %arg3[%c2_16, %c0_17, %c0_18] : memref<9x32x32xbf16, #tpu.memory_space<vmem>>, vector<1x32x32xbf16>
    %34 = vector.shape_cast %33 : vector<1x32x32xbf16> to vector<32x32xbf16>
    %cst_19 = arith.constant dense<0.000000e+00> : vector<32x256xf32>
    %35 = tpu.matmul %34, %32, %cst_19 {dimension_numbers = #tpu.dot_dimension_numbers<[1], [0], [0], [1], [0, 0, 1, 1], [], []>} : vector<32x32xbf16>, vector<32x256xbf16>, vector<32x256xf32> -> vector<32x256xf32>
    %36 = arith.addf %29, %35 : vector<32x256xf32>
    %37 = arith.index_cast %2 : i32 to index
    %c0_20 = arith.constant 0 : index
    %c18 = arith.constant 18 : index
    %38 = vector.load %arg7[%37, %c0_20, %c18] : memref<2x32x384xbf16, #tpu.memory_space<vmem>>, vector<1x32x256xbf16>
    %39 = vector.shape_cast %38 : vector<1x32x256xbf16> to vector<32x256xbf16>
    %c3 = arith.constant 3 : index
    %c0_21 = arith.constant 0 : index
    %c0_22 = arith.constant 0 : index
    %40 = vector.load %arg3[%c3, %c0_21, %c0_22] : memref<9x32x32xbf16, #tpu.memory_space<vmem>>, vector<1x32x32xbf16>
    %41 = vector.shape_cast %40 : vector<1x32x32xbf16> to vector<32x32xbf16>
    %cst_23 = arith.constant dense<0.000000e+00> : vector<32x256xf32>
    %42 = tpu.matmul %41, %39, %cst_23 {dimension_numbers = #tpu.dot_dimension_numbers<[1], [0], [0], [1], [0, 0, 1, 1], [], []>} : vector<32x32xbf16>, vector<32x256xbf16>, vector<32x256xf32> -> vector<32x256xf32>
    %43 = arith.addf %36, %42 : vector<32x256xf32>
    %44 = arith.index_cast %2 : i32 to index
    %c0_24 = arith.constant 0 : index
    %c19 = arith.constant 19 : index
    %45 = vector.load %arg7[%44, %c0_24, %c19] : memref<2x32x384xbf16, #tpu.memory_space<vmem>>, vector<1x32x256xbf16>
    %46 = vector.shape_cast %45 : vector<1x32x256xbf16> to vector<32x256xbf16>
    %c4 = arith.constant 4 : index
    %c0_25 = arith.constant 0 : index
    %c0_26 = arith.constant 0 : index
    %47 = vector.load %arg3[%c4, %c0_25, %c0_26] : memref<9x32x32xbf16, #tpu.memory_space<vmem>>, vector<1x32x32xbf16>
    %48 = vector.shape_cast %47 : vector<1x32x32xbf16> to vector<32x32xbf16>
    %cst_27 = arith.constant dense<0.000000e+00> : vector<32x256xf32>
    %49 = tpu.matmul %48, %46, %cst_27 {dimension_numbers = #tpu.dot_dimension_numbers<[1], [0], [0], [1], [0, 0, 1, 1], [], []>} : vector<32x32xbf16>, vector<32x256xbf16>, vector<32x256xf32> -> vector<32x256xf32>
    %50 = arith.addf %43, %49 : vector<32x256xf32>
    %51 = arith.index_cast %2 : i32 to index
    %c0_28 = arith.constant 0 : index
    %c20 = arith.constant 20 : index
    %52 = vector.load %arg7[%51, %c0_28, %c20] : memref<2x32x384xbf16, #tpu.memory_space<vmem>>, vector<1x32x256xbf16>
    %53 = vector.shape_cast %52 : vector<1x32x256xbf16> to vector<32x256xbf16>
    %c5 = arith.constant 5 : index
    %c0_29 = arith.constant 0 : index
    %c0_30 = arith.constant 0 : index
    %54 = vector.load %arg3[%c5, %c0_29, %c0_30] : memref<9x32x32xbf16, #tpu.memory_space<vmem>>, vector<1x32x32xbf16>
    %55 = vector.shape_cast %54 : vector<1x32x32xbf16> to vector<32x32xbf16>
    %cst_31 = arith.constant dense<0.000000e+00> : vector<32x256xf32>
    %56 = tpu.matmul %55, %53, %cst_31 {dimension_numbers = #tpu.dot_dimension_numbers<[1], [0], [0], [1], [0, 0, 1, 1], [], []>} : vector<32x32xbf16>, vector<32x256xbf16>, vector<32x256xf32> -> vector<32x256xf32>
    %57 = arith.addf %50, %56 : vector<32x256xf32>
    %58 = arith.index_cast %2 : i32 to index
    %c0_32 = arith.constant 0 : index
    %c36 = arith.constant 36 : index
    %59 = vector.load %arg7[%58, %c0_32, %c36] : memref<2x32x384xbf16, #tpu.memory_space<vmem>>, vector<1x32x256xbf16>
    %60 = vector.shape_cast %59 : vector<1x32x256xbf16> to vector<32x256xbf16>
    %c6 = arith.constant 6 : index
    %c0_33 = arith.constant 0 : index
    %c0_34 = arith.constant 0 : index
    %61 = vector.load %arg3[%c6, %c0_33, %c0_34] : memref<9x32x32xbf16, #tpu.memory_space<vmem>>, vector<1x32x32xbf16>
    %62 = vector.shape_cast %61 : vector<1x32x32xbf16> to vector<32x32xbf16>
    %cst_35 = arith.constant dense<0.000000e+00> : vector<32x256xf32>
    %63 = tpu.matmul %62, %60, %cst_35 {dimension_numbers = #tpu.dot_dimension_numbers<[1], [0], [0], [1], [0, 0, 1, 1], [], []>} : vector<32x32xbf16>, vector<32x256xbf16>, vector<32x256xf32> -> vector<32x256xf32>
    %64 = arith.addf %57, %63 : vector<32x256xf32>
    %65 = arith.index_cast %2 : i32 to index
    %c0_36 = arith.constant 0 : index
    %c37 = arith.constant 37 : index
    %66 = vector.load %arg7[%65, %c0_36, %c37] : memref<2x32x384xbf16, #tpu.memory_space<vmem>>, vector<1x32x256xbf16>
    %67 = vector.shape_cast %66 : vector<1x32x256xbf16> to vector<32x256xbf16>
    %c7 = arith.constant 7 : index
    %c0_37 = arith.constant 0 : index
    %c0_38 = arith.constant 0 : index
    %68 = vector.load %arg3[%c7, %c0_37, %c0_38] : memref<9x32x32xbf16, #tpu.memory_space<vmem>>, vector<1x32x32xbf16>
    %69 = vector.shape_cast %68 : vector<1x32x32xbf16> to vector<32x32xbf16>
    %cst_39 = arith.constant dense<0.000000e+00> : vector<32x256xf32>
    %70 = tpu.matmul %69, %67, %cst_39 {dimension_numbers = #tpu.dot_dimension_numbers<[1], [0], [0], [1], [0, 0, 1, 1], [], []>} : vector<32x32xbf16>, vector<32x256xbf16>, vector<32x256xf32> -> vector<32x256xf32>
    %71 = arith.addf %64, %70 : vector<32x256xf32>
    %72 = arith.index_cast %2 : i32 to index
    %c0_40 = arith.constant 0 : index
    %c38 = arith.constant 38 : index
    %73 = vector.load %arg7[%72, %c0_40, %c38] : memref<2x32x384xbf16, #tpu.memory_space<vmem>>, vector<1x32x256xbf16>
    %74 = vector.shape_cast %73 : vector<1x32x256xbf16> to vector<32x256xbf16>
    %c8 = arith.constant 8 : index
    %c0_41 = arith.constant 0 : index
    %c0_42 = arith.constant 0 : index
    %75 = vector.load %arg3[%c8, %c0_41, %c0_42] : memref<9x32x32xbf16, #tpu.memory_space<vmem>>, vector<1x32x32xbf16>
    %76 = vector.shape_cast %75 : vector<1x32x32xbf16> to vector<32x32xbf16>
    %cst_43 = arith.constant dense<0.000000e+00> : vector<32x256xf32>
    %77 = tpu.matmul %76, %74, %cst_43 {dimension_numbers = #tpu.dot_dimension_numbers<[1], [0], [0], [1], [0, 0, 1, 1], [], []>} : vector<32x32xbf16>, vector<32x256xbf16>, vector<32x256xf32> -> vector<32x256xf32>
    %78 = arith.addf %71, %77 : vector<32x256xf32>
    %79 = arith.truncf %78 : vector<32x256xf32> to vector<32x256xbf16>
    %c0_44 = arith.constant 0 : index
    %c0_45 = arith.constant 0 : index
    %c0_46 = arith.constant 0 : index
    %80 = vector.load %arg5[%c0_44, %c0_45, %c0_46] : memref<1x32x256xbf16, #tpu.memory_space<vmem>>, vector<1x32x256xbf16>
    %81 = vector.shape_cast %80 : vector<1x32x256xbf16> to vector<32x256xbf16>
    %82 = vector.shape_cast %79 : vector<32x256xbf16> to vector<1x32x256xbf16>
    tpu.vector_store %arg5[%c0_44, %c0_45, %c0_46], %82 {strides = array<i32>} : memref<1x32x256xbf16, #tpu.memory_space<vmem>>, vector<1x32x256xbf16>,
    %c0_47 = arith.constant 0 : index
    %c0_48 = arith.constant 0 : index
    %83 = vector.load %arg4[%c0_47, %c0_48] : memref<1x256xf32, #tpu.memory_space<vmem>>, vector<1x256xf32>
    %84 = vector.broadcast %83 : vector<1x256xf32> to vector<32x256xf32>
    %85 = arith.mulf %78, %84 : vector<32x256xf32>
    %cst_49 = arith.constant dense<0.000000e+00> : vector<32xf32>
    %86 = vector.multi_reduction <add>, %85, %cst_49 [1] : vector<32x256xf32> to vector<32xf32>
    %87 = vector.shape_cast %86 : vector<32xf32> to vector<32x1xf32>
    %c0_50 = arith.constant 0 : index
    %c0_51 = arith.constant 0 : index
    %c0_52 = arith.constant 0 : index
    %c0_53 = arith.constant 0 : index
    %88 = vector.load %arg6[%c0_50, %c0_51, %c0_52, %c0_53] : memref<1x1x32x2xf32, #tpu.memory_space<vmem>>, vector<1x1x32x1xf32>
    %89 = vector.shape_cast %88 : vector<1x1x32x1xf32> to vector<32x1xf32>
    %90 = vector.shape_cast %87 : vector<32x1xf32> to vector<1x1x32x1xf32>
    tpu.vector_store %arg6[%c0_50, %c0_51, %c0_52, %c0_53], %90 {strides = array<i32>} : memref<1x1x32x2xf32, #tpu.memory_space<vmem>>, vector<1x1x32x1xf32>,
    %91 = arith.mulf %85, %78 : vector<32x256xf32>
    %cst_54 = arith.constant dense<0.000000e+00> : vector<32xf32>
    %92 = vector.multi_reduction <add>, %91, %cst_54 [1] : vector<32x256xf32> to vector<32xf32>
    %93 = vector.shape_cast %92 : vector<32xf32> to vector<32x1xf32>
    %c0_55 = arith.constant 0 : index
    %c0_56 = arith.constant 0 : index
    %c0_57 = arith.constant 0 : index
    %c1_58 = arith.constant 1 : index
    %94 = vector.load %arg6[%c0_55, %c0_56, %c0_57, %c1_58] : memref<1x1x32x2xf32, #tpu.memory_space<vmem>>, vector<1x1x32x1xf32>
    %95 = vector.shape_cast %94 : vector<1x1x32x1xf32> to vector<32x1xf32>
    %96 = vector.shape_cast %93 : vector<32x1xf32> to vector<1x1x32x1xf32>
    tpu.vector_store %arg6[%c0_55, %c0_56, %c0_57, %c1_58], %96 {strides = array<i32>} : memref<1x1x32x2xf32, #tpu.memory_space<vmem>>, vector<1x1x32x1xf32>,
    return
  }
  func.func @transform_1(%arg0: i32, %arg1: i32) -> (i32, i32, i32) {
    %c0_i32 = arith.constant 0 : i32
    %c0_i32_0 = arith.constant 0 : i32
    %c0_i32_1 = arith.constant 0 : i32
    %c0_i32_2 = arith.constant 0 : i32
    return %c0_i32, %c0_i32_0, %c0_i32_1 : i32, i32, i32
  }
  func.func @transform_2(%arg0: i32, %arg1: i32) -> (i32, i32) {
    %c0_i32 = arith.constant 0 : i32
    %c0_i32_0 = arith.constant 0 : i32
    return %c0_i32, %arg1 : i32, i32
  }
  func.func @transform_3(%arg0: i32, %arg1: i32) -> (i32, i32, i32) {
    %c0_i32 = arith.constant 0 : i32
    %c0_i32_0 = arith.constant 0 : i32
    return %arg0, %c0_i32, %arg1 : i32, i32, i32
  }
  func.func @transform_4(%arg0: i32, %arg1: i32) -> (i32, i32, i32, i32) {
    %c0_i32 = arith.constant 0 : i32
    %c0_i32_0 = arith.constant 0 : i32
    %c0_i32_1 = arith.constant 0 : i32
    return %arg0, %arg1, %c0_i32, %c0_i32_0 : i32, i32, i32, i32
  }
}

module attributes {stable_mosaic.version = 11 : i64} {
  func.func @_bn_act_kernel(%arg0: i32, %arg1: i32, %arg2: memref<1x32x256xbf16, #tpu.memory_space<vmem>>, %arg3: memref<32x1xf32, #tpu.memory_space<vmem>>, %arg4: memref<32x1xf32, #tpu.memory_space<vmem>>, %arg5: memref<1x32x256xbf16, #tpu.memory_space<vmem>>) attributes {dimension_semantics = [#tpu.dimension_semantics<parallel>, #tpu.dimension_semantics<parallel>], iteration_bounds = array<i64: 2, 2>, scalar_prefetch = 0 : i64, scratch_operands = 0 : i64, tpu.core_type = #tpu.core_type<tc>, window_params = [{transform_indices = @transform_0, window_bounds = array<i64: 1, 32, 256>}, {pipeline_mode = #tpu.pipeline_mode<synchronous>, transform_indices = @transform_1, window_bounds = array<i64: 32, 1>}, {pipeline_mode = #tpu.pipeline_mode<synchronous>, transform_indices = @transform_2, window_bounds = array<i64: 32, 1>}, {transform_indices = @transform_3, window_bounds = array<i64: 1, 32, 256>}]} {
    %c0 = arith.constant 0 : index
    %c0_0 = arith.constant 0 : index
    %c0_1 = arith.constant 0 : index
    %0 = vector.load %arg2[%c0, %c0_0, %c0_1] : memref<1x32x256xbf16, #tpu.memory_space<vmem>>, vector<1x32x256xbf16>
    %1 = vector.shape_cast %0 : vector<1x32x256xbf16> to vector<32x256xbf16>
    %2 = arith.extf %1 : vector<32x256xbf16> to vector<32x256xf32>
    %c0_2 = arith.constant 0 : index
    %c0_3 = arith.constant 0 : index
    %3 = vector.load %arg3[%c0_2, %c0_3] : memref<32x1xf32, #tpu.memory_space<vmem>>, vector<32x1xf32>
    %4 = vector.broadcast %3 : vector<32x1xf32> to vector<32x256xf32>
    %5 = arith.mulf %2, %4 : vector<32x256xf32>
    %c0_4 = arith.constant 0 : index
    %c0_5 = arith.constant 0 : index
    %6 = vector.load %arg4[%c0_4, %c0_5] : memref<32x1xf32, #tpu.memory_space<vmem>>, vector<32x1xf32>
    %7 = vector.broadcast %6 : vector<32x1xf32> to vector<32x256xf32>
    %8 = arith.addf %5, %7 : vector<32x256xf32>
    %cst = arith.constant 0.000000e+00 : f32
    %9 = vector.broadcast %cst : f32 to vector<32x256xf32>
    %10 = arith.maximumf %8, %9 : vector<32x256xf32>
    %11 = arith.truncf %10 : vector<32x256xf32> to vector<32x256xbf16>
    %c0_6 = arith.constant 0 : index
    %c0_7 = arith.constant 0 : index
    %c0_8 = arith.constant 0 : index
    %12 = vector.load %arg5[%c0_6, %c0_7, %c0_8] : memref<1x32x256xbf16, #tpu.memory_space<vmem>>, vector<1x32x256xbf16>
    %13 = vector.shape_cast %12 : vector<1x32x256xbf16> to vector<32x256xbf16>
    %14 = vector.shape_cast %11 : vector<32x256xbf16> to vector<1x32x256xbf16>
    tpu.vector_store %arg5[%c0_6, %c0_7, %c0_8], %14 {strides = array<i32>} : memref<1x32x256xbf16, #tpu.memory_space<vmem>>, vector<1x32x256xbf16>,
    return
  }
  func.func @transform_0(%arg0: i32, %arg1: i32) -> (i32, i32, i32) {
    %c0_i32 = arith.constant 0 : i32
    %c0_i32_0 = arith.constant 0 : i32
    return %arg0, %c0_i32, %arg1 : i32, i32, i32
  }
  func.func @transform_1(%arg0: i32, %arg1: i32) -> (i32, i32) {
    %c0_i32 = arith.constant 0 : i32
    %c0_i32_0 = arith.constant 0 : i32
    %c0_i32_1 = arith.constant 0 : i32
    return %c0_i32, %c0_i32_0 : i32, i32
  }
  func.func @transform_2(%arg0: i32, %arg1: i32) -> (i32, i32) {
    %c0_i32 = arith.constant 0 : i32
    %c0_i32_0 = arith.constant 0 : i32
    %c0_i32_1 = arith.constant 0 : i32
    return %c0_i32, %c0_i32_0 : i32, i32
  }
  func.func @transform_3(%arg0: i32, %arg1: i32) -> (i32, i32, i32) {
    %c0_i32 = arith.constant 0 : i32
    %c0_i32_0 = arith.constant 0 : i32
    return %arg0, %c0_i32, %arg1 : i32, i32, i32
  }
}

module attributes {stable_mosaic.version = 11 : i64} {
  func.func @_bn_act_kernel(%arg0: i32, %arg1: i32, %arg2: memref<1x32x256xbf16, #tpu.memory_space<vmem>>, %arg3: memref<32x1xf32, #tpu.memory_space<vmem>>, %arg4: memref<32x1xf32, #tpu.memory_space<vmem>>, %arg5: memref<1x32x256xbf16, #tpu.memory_space<vmem>>, %arg6: memref<1x32x256xbf16, #tpu.memory_space<vmem>>) attributes {dimension_semantics = [#tpu.dimension_semantics<parallel>, #tpu.dimension_semantics<parallel>], iteration_bounds = array<i64: 2, 2>, scalar_prefetch = 0 : i64, scratch_operands = 0 : i64, tpu.core_type = #tpu.core_type<tc>, window_params = [{transform_indices = @transform_0, window_bounds = array<i64: 1, 32, 256>}, {pipeline_mode = #tpu.pipeline_mode<synchronous>, transform_indices = @transform_1, window_bounds = array<i64: 32, 1>}, {pipeline_mode = #tpu.pipeline_mode<synchronous>, transform_indices = @transform_2, window_bounds = array<i64: 32, 1>}, {transform_indices = @transform_3, window_bounds = array<i64: 1, 32, 256>}, {transform_indices = @transform_4, window_bounds = array<i64: 1, 32, 256>}]} {
    %c0 = arith.constant 0 : index
    %c0_0 = arith.constant 0 : index
    %c0_1 = arith.constant 0 : index
    %0 = vector.load %arg2[%c0, %c0_0, %c0_1] : memref<1x32x256xbf16, #tpu.memory_space<vmem>>, vector<1x32x256xbf16>
    %1 = vector.shape_cast %0 : vector<1x32x256xbf16> to vector<32x256xbf16>
    %2 = arith.extf %1 : vector<32x256xbf16> to vector<32x256xf32>
    %c0_2 = arith.constant 0 : index
    %c0_3 = arith.constant 0 : index
    %3 = vector.load %arg3[%c0_2, %c0_3] : memref<32x1xf32, #tpu.memory_space<vmem>>, vector<32x1xf32>
    %4 = vector.broadcast %3 : vector<32x1xf32> to vector<32x256xf32>
    %5 = arith.mulf %2, %4 : vector<32x256xf32>
    %c0_4 = arith.constant 0 : index
    %c0_5 = arith.constant 0 : index
    %6 = vector.load %arg4[%c0_4, %c0_5] : memref<32x1xf32, #tpu.memory_space<vmem>>, vector<32x1xf32>
    %7 = vector.broadcast %6 : vector<32x1xf32> to vector<32x256xf32>
    %8 = arith.addf %5, %7 : vector<32x256xf32>
    %c0_6 = arith.constant 0 : index
    %c0_7 = arith.constant 0 : index
    %c0_8 = arith.constant 0 : index
    %9 = vector.load %arg5[%c0_6, %c0_7, %c0_8] : memref<1x32x256xbf16, #tpu.memory_space<vmem>>, vector<1x32x256xbf16>
    %10 = vector.shape_cast %9 : vector<1x32x256xbf16> to vector<32x256xbf16>
    %11 = arith.extf %10 : vector<32x256xbf16> to vector<32x256xf32>
    %12 = arith.addf %8, %11 : vector<32x256xf32>
    %cst = arith.constant 0.000000e+00 : f32
    %13 = vector.broadcast %cst : f32 to vector<32x256xf32>
    %14 = arith.maximumf %12, %13 : vector<32x256xf32>
    %15 = arith.truncf %14 : vector<32x256xf32> to vector<32x256xbf16>
    %c0_9 = arith.constant 0 : index
    %c0_10 = arith.constant 0 : index
    %c0_11 = arith.constant 0 : index
    %16 = vector.load %arg6[%c0_9, %c0_10, %c0_11] : memref<1x32x256xbf16, #tpu.memory_space<vmem>>, vector<1x32x256xbf16>
    %17 = vector.shape_cast %16 : vector<1x32x256xbf16> to vector<32x256xbf16>
    %18 = vector.shape_cast %15 : vector<32x256xbf16> to vector<1x32x256xbf16>
    tpu.vector_store %arg6[%c0_9, %c0_10, %c0_11], %18 {strides = array<i32>} : memref<1x32x256xbf16, #tpu.memory_space<vmem>>, vector<1x32x256xbf16>,
    return
  }
  func.func @transform_0(%arg0: i32, %arg1: i32) -> (i32, i32, i32) {
    %c0_i32 = arith.constant 0 : i32
    %c0_i32_0 = arith.constant 0 : i32
    return %arg0, %c0_i32, %arg1 : i32, i32, i32
  }
  func.func @transform_1(%arg0: i32, %arg1: i32) -> (i32, i32) {
    %c0_i32 = arith.constant 0 : i32
    %c0_i32_0 = arith.constant 0 : i32
    %c0_i32_1 = arith.constant 0 : i32
    return %c0_i32, %c0_i32_0 : i32, i32
  }
  func.func @transform_2(%arg0: i32, %arg1: i32) -> (i32, i32) {
    %c0_i32 = arith.constant 0 : i32
    %c0_i32_0 = arith.constant 0 : i32
    %c0_i32_1 = arith.constant 0 : i32
    return %c0_i32, %c0_i32_0 : i32, i32
  }
  func.func @transform_3(%arg0: i32, %arg1: i32) -> (i32, i32, i32) {
    %c0_i32 = arith.constant 0 : i32
    %c0_i32_0 = arith.constant 0 : i32
    return %arg0, %c0_i32, %arg1 : i32, i32, i32
  }
  func.func @transform_4(%arg0: i32, %arg1: i32) -> (i32, i32, i32) {
    %c0_i32 = arith.constant 0 : i32
    %c0_i32_0 = arith.constant 0 : i32
    return %arg0, %c0_i32, %arg1 : i32, i32, i32
  }
}

module attributes {stable_mosaic.version = 11 : i64} {
  func.func @_conv_taps_kernel(%arg0: i32, %arg1: i32, %arg2: memref<2x32x640xbf16, #tpu.memory_space<any>>, %arg3: memref<9x16x32xbf16, #tpu.memory_space<vmem>>, %arg4: memref<16x1xf32, #tpu.memory_space<vmem>>, %arg5: memref<1x16x256xf32, #tpu.memory_space<vmem>>, %arg6: memref<2x32x384xbf16, #tpu.memory_space<vmem>>, %arg7: memref<2x!tpu.dma_semaphore, #tpu.memory_space<semaphore_mem>>) attributes {dimension_semantics = [#tpu.dimension_semantics<arbitrary>, #tpu.dimension_semantics<arbitrary>], iteration_bounds = array<i64: 2, 2>, scalar_prefetch = 0 : i64, scratch_operands = 2 : i64, tpu.core_type = #tpu.core_type<tc>, window_params = [{}, {pipeline_mode = #tpu.pipeline_mode<synchronous>, transform_indices = @transform_1, window_bounds = array<i64: 9, 16, 32>}, {pipeline_mode = #tpu.pipeline_mode<synchronous>, transform_indices = @transform_2, window_bounds = array<i64: 16, 1>}, {transform_indices = @transform_3, window_bounds = array<i64: 1, 16, 256>}]} {
    %c2_i32 = arith.constant 2 : i32
    %0 = arith.muli %arg0, %c2_i32 : i32
    %1 = arith.addi %0, %arg1 : i32
    %c2_i32_0 = arith.constant 2 : i32
    %2 = arith.remsi %1, %c2_i32_0 : i32
    %c256_i32 = arith.constant 256 : i32
    %3 = arith.muli %arg1, %c256_i32 : i32
    %c0_i32 = arith.constant 0 : i32
    %4 = arith.cmpi eq, %1, %c0_i32 : i32
    %5 = arith.extui %4 : i1 to i32
    %c0_i32_1 = arith.constant 0 : i32
    %6 = arith.cmpi ne, %5, %c0_i32_1 : i32
    scf.if %6 {
      %c0_i32_49 = arith.constant 0 : i32
      %86 = tpu.memref_slice %arg2[%arg0, %c0_i32_49, %3] : memref<2x32x640xbf16, #tpu.memory_space<any>> -> memref<1x32x384xbf16, #tpu.memory_space<any>>
      %87 = tpu.memref_squeeze %86 : memref<1x32x384xbf16, #tpu.memory_space<any>> -> memref<32x384xbf16, #tpu.memory_space<any>>
      %c0_i32_50 = arith.constant 0 : i32
      %c0_i32_51 = arith.constant 0 : i32
      %88 = tpu.memref_slice %arg6[%2, %c0_i32_50, %c0_i32_51] : memref<2x32x384xbf16, #tpu.memory_space<vmem>> -> memref<1x32x384xbf16, #tpu.memory_space<vmem>>
      %89 = tpu.memref_squeeze %88 : memref<1x32x384xbf16, #tpu.memory_space<vmem>> -> memref<32x384xbf16, #tpu.memory_space<vmem>>
      %90 = tpu.memref_slice %arg7[%2] : memref<2x!tpu.dma_semaphore, #tpu.memory_space<semaphore_mem>> -> memref<1x!tpu.dma_semaphore, #tpu.memory_space<semaphore_mem>>
      %91 = tpu.memref_squeeze %90 : memref<1x!tpu.dma_semaphore, #tpu.memory_space<semaphore_mem>> -> memref<!tpu.dma_semaphore, #tpu.memory_space<semaphore_mem>>
      tpu.enqueue_dma source(%87 : memref<32x384xbf16, #tpu.memory_space<any>>) target(%89 : memref<32x384xbf16, #tpu.memory_space<vmem>>) target_semaphore(%91 : memref<!tpu.dma_semaphore, #tpu.memory_space<semaphore_mem>>)
    } else {
    }
    %c1_i32 = arith.constant 1 : i32
    %7 = arith.addi %1, %c1_i32 : i32
    %c4_i32 = arith.constant 4 : i32
    %8 = arith.cmpi slt, %7, %c4_i32 : i32
    %9 = arith.extui %8 : i1 to i32
    %c0_i32_2 = arith.constant 0 : i32
    %10 = arith.cmpi ne, %9, %c0_i32_2 : i32
    scf.if %10 {
      %c1_i32_49 = arith.constant 1 : i32
      %86 = arith.cmpi eq, %arg1, %c1_i32_49 : i32
      %c1_i32_50 = arith.constant 1 : i32
      %87 = arith.addi %arg0, %c1_i32_50 : i32
      %88 = arith.select %86, %87, %arg0 : i32
      %c256_i32_51 = arith.constant 256 : i32
      %89 = arith.addi %3, %c256_i32_51 : i32
      %c0_i32_52 = arith.constant 0 : i32
      %90 = arith.select %86, %c0_i32_52, %89 : i32
      %c1_i32_53 = arith.constant 1 : i32
      %91 = arith.subi %c1_i32_53, %2 : i32
      %c0_i32_54 = arith.constant 0 : i32
      %92 = tpu.memref_slice %arg2[%88, %c0_i32_54, %90] : memref<2x32x640xbf16, #tpu.memory_space<any>> -> memref<1x32x384xbf16, #tpu.memory_space<any>>
      %93 = tpu.memref_squeeze %92 : memref<1x32x384xbf16, #tpu.memory_space<any>> -> memref<32x384xbf16, #tpu.memory_space<any>>
      %c0_i32_55 = arith.constant 0 : i32
      %c0_i32_56 = arith.constant 0 : i32
      %94 = tpu.memref_slice %arg6[%91, %c0_i32_55, %c0_i32_56] : memref<2x32x384xbf16, #tpu.memory_space<vmem>> -> memref<1x32x384xbf16, #tpu.memory_space<vmem>>
      %95 = tpu.memref_squeeze %94 : memref<1x32x384xbf16, #tpu.memory_space<vmem>> -> memref<32x384xbf16, #tpu.memory_space<vmem>>
      %96 = tpu.memref_slice %arg7[%91] : memref<2x!tpu.dma_semaphore, #tpu.memory_space<semaphore_mem>> -> memref<1x!tpu.dma_semaphore, #tpu.memory_space<semaphore_mem>>
      %97 = tpu.memref_squeeze %96 : memref<1x!tpu.dma_semaphore, #tpu.memory_space<semaphore_mem>> -> memref<!tpu.dma_semaphore, #tpu.memory_space<semaphore_mem>>
      tpu.enqueue_dma source(%93 : memref<32x384xbf16, #tpu.memory_space<any>>) target(%95 : memref<32x384xbf16, #tpu.memory_space<vmem>>) target_semaphore(%97 : memref<!tpu.dma_semaphore, #tpu.memory_space<semaphore_mem>>)
    } else {
    }
    %c0_i32_3 = arith.constant 0 : i32
    %11 = tpu.memref_slice %arg2[%arg0, %c0_i32_3, %3] : memref<2x32x640xbf16, #tpu.memory_space<any>> -> memref<1x32x384xbf16, #tpu.memory_space<any>>
    %12 = tpu.memref_squeeze %11 : memref<1x32x384xbf16, #tpu.memory_space<any>> -> memref<32x384xbf16, #tpu.memory_space<any>>
    %c0_i32_4 = arith.constant 0 : i32
    %c0_i32_5 = arith.constant 0 : i32
    %13 = tpu.memref_slice %arg6[%2, %c0_i32_4, %c0_i32_5] : memref<2x32x384xbf16, #tpu.memory_space<vmem>> -> memref<1x32x384xbf16, #tpu.memory_space<vmem>>
    %14 = tpu.memref_squeeze %13 : memref<1x32x384xbf16, #tpu.memory_space<vmem>> -> memref<32x384xbf16, #tpu.memory_space<vmem>>
    %15 = tpu.memref_slice %arg7[%2] : memref<2x!tpu.dma_semaphore, #tpu.memory_space<semaphore_mem>> -> memref<1x!tpu.dma_semaphore, #tpu.memory_space<semaphore_mem>>
    %16 = tpu.memref_squeeze %15 : memref<1x!tpu.dma_semaphore, #tpu.memory_space<semaphore_mem>> -> memref<!tpu.dma_semaphore, #tpu.memory_space<semaphore_mem>>
    tpu.wait_dma2 semaphore(%16 : memref<!tpu.dma_semaphore, #tpu.memory_space<semaphore_mem>>) src(%12 : memref<32x384xbf16, #tpu.memory_space<any>>) dst(%14 : memref<32x384xbf16, #tpu.memory_space<vmem>>)
    %17 = arith.index_cast %2 : i32 to index
    %c0 = arith.constant 0 : index
    %c0_6 = arith.constant 0 : index
    %18 = vector.load %arg6[%17, %c0, %c0_6] : memref<2x32x384xbf16, #tpu.memory_space<vmem>>, vector<1x32x256xbf16>
    %19 = vector.shape_cast %18 : vector<1x32x256xbf16> to vector<32x256xbf16>
    %c0_7 = arith.constant 0 : index
    %c0_8 = arith.constant 0 : index
    %c0_9 = arith.constant 0 : index
    %20 = vector.load %arg3[%c0_7, %c0_8, %c0_9] : memref<9x16x32xbf16, #tpu.memory_space<vmem>>, vector<1x16x32xbf16>
    %21 = vector.shape_cast %20 : vector<1x16x32xbf16> to vector<16x32xbf16>
    %cst = arith.constant dense<0.000000e+00> : vector<16x256xf32>
    %22 = tpu.matmul %21, %19, %cst {dimension_numbers = #tpu.dot_dimension_numbers<[1], [0], [0], [1], [0, 0, 1, 1], [], []>} : vector<16x32xbf16>, vector<32x256xbf16>, vector<16x256xf32> -> vector<16x256xf32>
    %23 = arith.index_cast %2 : i32 to index
    %c0_10 = arith.constant 0 : index
    %c1 = arith.constant 1 : index
    %24 = vector.load %arg6[%23, %c0_10, %c1] : memref<2x32x384xbf16, #tpu.memory_space<vmem>>, vector<1x32x256xbf16>
    %25 = vector.shape_cast %24 : vector<1x32x256xbf16> to vector<32x256xbf16>
    %c1_11 = arith.constant 1 : index
    %c0_12 = arith.constant 0 : index
    %c0_13 = arith.constant 0 : index
    %26 = vector.load %arg3[%c1_11, %c0_12, %c0_13] : memref<9x16x32xbf16, #tpu.memory_space<vmem>>, vector<1x16x32xbf16>
    %27 = vector.shape_cast %26 : vector<1x16x32xbf16> to vector<16x32xbf16>
    %cst_14 = arith.constant dense<0.000000e+00> : vector<16x256xf32>
    %28 = tpu.matmul %27, %25, %cst_14 {dimension_numbers = #tpu.dot_dimension_numbers<[1], [0], [0], [1], [0, 0, 1, 1], [], []>} : vector<16x32xbf16>, vector<32x256xbf16>, vector<16x256xf32> -> vector<16x256xf32>
    %29 = arith.addf %22, %28 : vector<16x256xf32>
    %30 = arith.index_cast %2 : i32 to index
    %c0_15 = arith.constant 0 : index
    %c2 = arith.constant 2 : index
    %31 = vector.load %arg6[%30, %c0_15, %c2] : memref<2x32x384xbf16, #tpu.memory_space<vmem>>, vector<1x32x256xbf16>
    %32 = vector.shape_cast %31 : vector<1x32x256xbf16> to vector<32x256xbf16>
    %c2_16 = arith.constant 2 : index
    %c0_17 = arith.constant 0 : index
    %c0_18 = arith.constant 0 : index
    %33 = vector.load %arg3[%c2_16, %c0_17, %c0_18] : memref<9x16x32xbf16, #tpu.memory_space<vmem>>, vector<1x16x32xbf16>
    %34 = vector.shape_cast %33 : vector<1x16x32xbf16> to vector<16x32xbf16>
    %cst_19 = arith.constant dense<0.000000e+00> : vector<16x256xf32>
    %35 = tpu.matmul %34, %32, %cst_19 {dimension_numbers = #tpu.dot_dimension_numbers<[1], [0], [0], [1], [0, 0, 1, 1], [], []>} : vector<16x32xbf16>, vector<32x256xbf16>, vector<16x256xf32> -> vector<16x256xf32>
    %36 = arith.addf %29, %35 : vector<16x256xf32>
    %37 = arith.index_cast %2 : i32 to index
    %c0_20 = arith.constant 0 : index
    %c18 = arith.constant 18 : index
    %38 = vector.load %arg6[%37, %c0_20, %c18] : memref<2x32x384xbf16, #tpu.memory_space<vmem>>, vector<1x32x256xbf16>
    %39 = vector.shape_cast %38 : vector<1x32x256xbf16> to vector<32x256xbf16>
    %c3 = arith.constant 3 : index
    %c0_21 = arith.constant 0 : index
    %c0_22 = arith.constant 0 : index
    %40 = vector.load %arg3[%c3, %c0_21, %c0_22] : memref<9x16x32xbf16, #tpu.memory_space<vmem>>, vector<1x16x32xbf16>
    %41 = vector.shape_cast %40 : vector<1x16x32xbf16> to vector<16x32xbf16>
    %cst_23 = arith.constant dense<0.000000e+00> : vector<16x256xf32>
    %42 = tpu.matmul %41, %39, %cst_23 {dimension_numbers = #tpu.dot_dimension_numbers<[1], [0], [0], [1], [0, 0, 1, 1], [], []>} : vector<16x32xbf16>, vector<32x256xbf16>, vector<16x256xf32> -> vector<16x256xf32>
    %43 = arith.addf %36, %42 : vector<16x256xf32>
    %44 = arith.index_cast %2 : i32 to index
    %c0_24 = arith.constant 0 : index
    %c19 = arith.constant 19 : index
    %45 = vector.load %arg6[%44, %c0_24, %c19] : memref<2x32x384xbf16, #tpu.memory_space<vmem>>, vector<1x32x256xbf16>
    %46 = vector.shape_cast %45 : vector<1x32x256xbf16> to vector<32x256xbf16>
    %c4 = arith.constant 4 : index
    %c0_25 = arith.constant 0 : index
    %c0_26 = arith.constant 0 : index
    %47 = vector.load %arg3[%c4, %c0_25, %c0_26] : memref<9x16x32xbf16, #tpu.memory_space<vmem>>, vector<1x16x32xbf16>
    %48 = vector.shape_cast %47 : vector<1x16x32xbf16> to vector<16x32xbf16>
    %cst_27 = arith.constant dense<0.000000e+00> : vector<16x256xf32>
    %49 = tpu.matmul %48, %46, %cst_27 {dimension_numbers = #tpu.dot_dimension_numbers<[1], [0], [0], [1], [0, 0, 1, 1], [], []>} : vector<16x32xbf16>, vector<32x256xbf16>, vector<16x256xf32> -> vector<16x256xf32>
    %50 = arith.addf %43, %49 : vector<16x256xf32>
    %51 = arith.index_cast %2 : i32 to index
    %c0_28 = arith.constant 0 : index
    %c20 = arith.constant 20 : index
    %52 = vector.load %arg6[%51, %c0_28, %c20] : memref<2x32x384xbf16, #tpu.memory_space<vmem>>, vector<1x32x256xbf16>
    %53 = vector.shape_cast %52 : vector<1x32x256xbf16> to vector<32x256xbf16>
    %c5 = arith.constant 5 : index
    %c0_29 = arith.constant 0 : index
    %c0_30 = arith.constant 0 : index
    %54 = vector.load %arg3[%c5, %c0_29, %c0_30] : memref<9x16x32xbf16, #tpu.memory_space<vmem>>, vector<1x16x32xbf16>
    %55 = vector.shape_cast %54 : vector<1x16x32xbf16> to vector<16x32xbf16>
    %cst_31 = arith.constant dense<0.000000e+00> : vector<16x256xf32>
    %56 = tpu.matmul %55, %53, %cst_31 {dimension_numbers = #tpu.dot_dimension_numbers<[1], [0], [0], [1], [0, 0, 1, 1], [], []>} : vector<16x32xbf16>, vector<32x256xbf16>, vector<16x256xf32> -> vector<16x256xf32>
    %57 = arith.addf %50, %56 : vector<16x256xf32>
    %58 = arith.index_cast %2 : i32 to index
    %c0_32 = arith.constant 0 : index
    %c36 = arith.constant 36 : index
    %59 = vector.load %arg6[%58, %c0_32, %c36] : memref<2x32x384xbf16, #tpu.memory_space<vmem>>, vector<1x32x256xbf16>
    %60 = vector.shape_cast %59 : vector<1x32x256xbf16> to vector<32x256xbf16>
    %c6 = arith.constant 6 : index
    %c0_33 = arith.constant 0 : index
    %c0_34 = arith.constant 0 : index
    %61 = vector.load %arg3[%c6, %c0_33, %c0_34] : memref<9x16x32xbf16, #tpu.memory_space<vmem>>, vector<1x16x32xbf16>
    %62 = vector.shape_cast %61 : vector<1x16x32xbf16> to vector<16x32xbf16>
    %cst_35 = arith.constant dense<0.000000e+00> : vector<16x256xf32>
    %63 = tpu.matmul %62, %60, %cst_35 {dimension_numbers = #tpu.dot_dimension_numbers<[1], [0], [0], [1], [0, 0, 1, 1], [], []>} : vector<16x32xbf16>, vector<32x256xbf16>, vector<16x256xf32> -> vector<16x256xf32>
    %64 = arith.addf %57, %63 : vector<16x256xf32>
    %65 = arith.index_cast %2 : i32 to index
    %c0_36 = arith.constant 0 : index
    %c37 = arith.constant 37 : index
    %66 = vector.load %arg6[%65, %c0_36, %c37] : memref<2x32x384xbf16, #tpu.memory_space<vmem>>, vector<1x32x256xbf16>
    %67 = vector.shape_cast %66 : vector<1x32x256xbf16> to vector<32x256xbf16>
    %c7 = arith.constant 7 : index
    %c0_37 = arith.constant 0 : index
    %c0_38 = arith.constant 0 : index
    %68 = vector.load %arg3[%c7, %c0_37, %c0_38] : memref<9x16x32xbf16, #tpu.memory_space<vmem>>, vector<1x16x32xbf16>
    %69 = vector.shape_cast %68 : vector<1x16x32xbf16> to vector<16x32xbf16>
    %cst_39 = arith.constant dense<0.000000e+00> : vector<16x256xf32>
    %70 = tpu.matmul %69, %67, %cst_39 {dimension_numbers = #tpu.dot_dimension_numbers<[1], [0], [0], [1], [0, 0, 1, 1], [], []>} : vector<16x32xbf16>, vector<32x256xbf16>, vector<16x256xf32> -> vector<16x256xf32>
    %71 = arith.addf %64, %70 : vector<16x256xf32>
    %72 = arith.index_cast %2 : i32 to index
    %c0_40 = arith.constant 0 : index
    %c38 = arith.constant 38 : index
    %73 = vector.load %arg6[%72, %c0_40, %c38] : memref<2x32x384xbf16, #tpu.memory_space<vmem>>, vector<1x32x256xbf16>
    %74 = vector.shape_cast %73 : vector<1x32x256xbf16> to vector<32x256xbf16>
    %c8 = arith.constant 8 : index
    %c0_41 = arith.constant 0 : index
    %c0_42 = arith.constant 0 : index
    %75 = vector.load %arg3[%c8, %c0_41, %c0_42] : memref<9x16x32xbf16, #tpu.memory_space<vmem>>, vector<1x16x32xbf16>
    %76 = vector.shape_cast %75 : vector<1x16x32xbf16> to vector<16x32xbf16>
    %cst_43 = arith.constant dense<0.000000e+00> : vector<16x256xf32>
    %77 = tpu.matmul %76, %74, %cst_43 {dimension_numbers = #tpu.dot_dimension_numbers<[1], [0], [0], [1], [0, 0, 1, 1], [], []>} : vector<16x32xbf16>, vector<32x256xbf16>, vector<16x256xf32> -> vector<16x256xf32>
    %78 = arith.addf %71, %77 : vector<16x256xf32>
    %c0_44 = arith.constant 0 : index
    %c0_45 = arith.constant 0 : index
    %79 = vector.load %arg4[%c0_44, %c0_45] : memref<16x1xf32, #tpu.memory_space<vmem>>, vector<16x1xf32>
    %80 = vector.broadcast %79 : vector<16x1xf32> to vector<16x256xf32>
    %81 = arith.addf %78, %80 : vector<16x256xf32>
    %82 = math.tanh %81 : vector<16x256xf32>
    %c0_46 = arith.constant 0 : index
    %c0_47 = arith.constant 0 : index
    %c0_48 = arith.constant 0 : index
    %83 = vector.load %arg5[%c0_46, %c0_47, %c0_48] : memref<1x16x256xf32, #tpu.memory_space<vmem>>, vector<1x16x256xf32>
    %84 = vector.shape_cast %83 : vector<1x16x256xf32> to vector<16x256xf32>
    %85 = vector.shape_cast %82 : vector<16x256xf32> to vector<1x16x256xf32>
    tpu.vector_store %arg5[%c0_46, %c0_47, %c0_48], %85 {strides = array<i32>} : memref<1x16x256xf32, #tpu.memory_space<vmem>>, vector<1x16x256xf32>,
    return
  }
  func.func @transform_1(%arg0: i32, %arg1: i32) -> (i32, i32, i32) {
    %c0_i32 = arith.constant 0 : i32
    %c0_i32_0 = arith.constant 0 : i32
    %c0_i32_1 = arith.constant 0 : i32
    %c0_i32_2 = arith.constant 0 : i32
    return %c0_i32, %c0_i32_0, %c0_i32_1 : i32, i32, i32
  }
  func.func @transform_2(%arg0: i32, %arg1: i32) -> (i32, i32) {
    %c0_i32 = arith.constant 0 : i32
    %c0_i32_0 = arith.constant 0 : i32
    %c0_i32_1 = arith.constant 0 : i32
    return %c0_i32, %c0_i32_0 : i32, i32
  }
  func.func @transform_3(%arg0: i32, %arg1: i32) -> (i32, i32, i32) {
    %c0_i32 = arith.constant 0 : i32
    %c0_i32_0 = arith.constant 0 : i32
    return %arg0, %c0_i32, %arg1 : i32, i32, i32
  }
}

</mosaic_0001>

<bundles_post_ra>
// kernel: tile.0
= control target key start
LH: loop header
LB: loop body
LE: loop exit
PB: predicated region body
PF: predicated region fallthrough
CT: control target
= control target key end

     0   :  { %s26_s8 = smov 126   ;;  %vm7_vm0 = vcmask 7168   ;;  %s49_s0 = inlined_call_operand.vmem [shape: f32[4,3], index: 0, kind: input, shape index: {}]   ;;  %s50_s1 = inlined_call_operand.vmem [shape: f32[12,1], index: 1, kind: output, shape index: {}]  }
   0x1   :  { %v4_v0 = vld [vmem:[%s49_s0] sm:$0xf]  ;;  %s25_s0 = smov 127  }
   0x2   :  { %5 = vst [vmem:[#allocation0] sm:$0xf] %v4_v0 }
   0x9   :  { %v9_v1 = vld [vmem:[#allocation0] sm:$0xf]  }
   0xa   :  { %10 = vrot.lane.b32.xlu0 %v9_v1, %s25_s0  ;;  %v15_v2 = vld [vmem:[#allocation0] sm:$0xf]  }
   0xb   :  { %v6_v3 = vld [vmem:[#allocation0] sm:$0xf]  }
   0xc   :  { %8 = vst.msk [vmem:[%s50_s1] ss:$3 sm:$0xf] %vm7_vm0, %v6_v3  }
  0x12   :  { %16 = vrot.lane.b32.xlu0 %v15_v2, %s26_s8 }
  0x7c   :  { %v11_v4 = vpop.permute.xlu0 %10  }
  0x7d   :  { %21 = vst.msk [vmem:[%s50_s1 + $0x1] ss:$3 sm:$0xf] %vm7_vm0, %v11_v4  }
  0x84   :  { %v17_v5 = vpop.permute.xlu0 %16  }
  0x85   :  { %22 = vst.msk [vmem:[%s50_s1 + $0x2] ss:$3 sm:$0xf] %vm7_vm0, %v17_v5  }

// kernel: tile.8
= control target key start
LH: loop header
LB: loop body
LE: loop exit
PB: predicated region body
PF: predicated region fallthrough
CT: control target
= control target key end

     0   :  { %2 = vsyncpa [#allocation1], 0  ;;  %s48_s8 = smov [#allocation0]   ;;  %s65_s0 = inlined_call_operand.hbm [shape: f32[3], index: 0, kind: input, shape index: {}]   ;;  %s66_s1 = inlined_call_operand.vmem [shape: f32[4,3], index: 1, kind: output, shape index: {}]  }
   0x1   :  { %s8_s0 = sshll.u32 %s65_s0, 4  ;;  %s10_s9 = sshll.u32 %s48_s8, 4  ;;  %s9_s0 = int_to_ptr.hbm [resolvable:$true] %s8_s0  ;;  %s11_s9 = int_to_ptr.vmem [resolvable:$true] %s10_s9 }
   0x2   :  { %13 = dma.hbm_to_vmem [thread:$0]  %s9_s0, 16, %s11_s9, [#allocation1]  }
   0x3   :  { %46 = dma.done.wait [#allocation1], 16  }
   0x4   :  { %47 = vsyncadd [#allocation1], 4294967280  ;;  %v18_v0 = vld [vmem:[#allocation0] ss:$0 sm:$0xff] }
   0x5   :  { %19 = vst [vmem:[%s66_s1] sm:$0xf] %v18_v0 }
   0x6   :  { %20 = vsyncpa [#allocation1], 1 }

// kernel: generator_forward.10
= control target key start
LH: loop header
LB: loop body
LE: loop exit
PB: predicated region body
PF: predicated region fallthrough
CT: control target
= control target key end

     0   :  { %s1937_s12 = smov 0   ;;  %s1939_s13 = smov 0   ;;  %s2549_s0 = inlined_call_operand.vmem [shape: bf16[2,64,640], index: 0, kind: input, shape index: {}]   ;;  %s2550_s1 = inlined_call_operand.vmem [shape: bf16[9,32,64], index: 1, kind: input, shape index: {}]   ;;  %s2551_s2 = inlined_call_operand.vmem [shape: f32[32,1], index: 2, kind: input, shape index: {}]   ;;  %s2552_s3 = inlined_call_operand.vmem [shape: bf16[2,32,512], index: 3, kind: output, shape index: {}]  }
   0x1   :  { %s1941_s14 = smov 0   ;;  %s1943_s15 = smov 0  }
   0x2   :  { %s1945_s16 = smov 0   ;;  %s1947_s17 = smov 0  }
   0x3   :  { %s1949_s18 = smov 0  }
   0x4 LB: > { %s22_s19 = sadd.s32 1, %s1898_s16  ;;  %s25_s20 = sadd.s32 1, %s1902_s17  ;;  %s1906_s18 = sphi %s1949_s18, %s13_s18   ;;  %s1902_s17 = sphi %s1947_s17, %s2559_s17   ;;  %s1898_s16 = sphi %s1945_s16, %s2558_s16   ;;  %s1894_s15 = sphi %s1943_s15, %s2557_s15   ;;  %s1890_s14 = sphi %s1941_s14, %s2556_s14   ;;  %s1886_s13 = sphi %s1939_s13, %s2555_s13   ;;  %s1882_s12 = sphi %s1937_s12, %s2554_s12  }
   0x5   : > { %p23_p0 = scmp.ge.s32.totalorder %s22_s19, 2  ;;  %s1498_s21 = sadd.s32 4294967295, %s1906_s18  }
   0x6   : > { %p86_p1 = scmp.ne.s32.totalorder %s1886_s13, %s1882_s12  ;;  %p87_p2 = scmp.eq.s32.totalorder %s1498_s21, 3 }
   0x7   : > { %s2561_s19 = smov (%p23_p0, %s22_s19), 0  ;;  %s2563_s20 = smov (!%p23_p0, %s25_s20), %s1902_s17 }
   0x8   : > { %s72_s22 = ssub.s32 %s1898_s16, %s2561_s19  ;;  %p27_p3 = scmp.ge.s32.totalorder %s2563_s20, 2 }
   0x9   : > { %p1501_p4 = scmp.ge.s32.totalorder %s1906_s18, 1  ;;  %p1983_p5 = por %p87_p2, %p86_p1 }
   0xa   : > { %p117_p6 = scmp.lt.s32.totalorder %s1906_s18, 5  ;;  %s2565_s20 = smov (%p27_p3, %s2563_s20), 0 }
   0xb   : > { %s71_s24 = ssub.s32 %s1902_s17, %s2565_s20  ;;  %s76_s26 = sadd.s32 1, %s1886_s13 }
   0xc   : > { %p118_p7 = pnand %p1501_p4, %p117_p6  ;;  %s73_s25 = sor.u32 %s72_s22, %s71_s24 }
   0xd   : > { %p74_p8 = scmp.eq.s32.totalorder %s73_s25, 0  ;;  %s130_s28 = sand.u32 (!%p118_p7), 1, %s1882_s12  }
   0xe   : > { %121 = sbr.rel (%p118_p7) target bundleno = 623 (0x26f), region = 28  ;;  %s1503_s29 = sshll.u32 (!%p118_p7), %s1894_s15, 1 }
   0xf   : > { %s1994_s27 = scalar_select %p74_p8, %s1886_s13, %s76_s26  }
  0x10   : > { %s1502_s30 = sshll.u32 (!%p118_p7), %s130_s28, 5  ;;  %s1999_s4 = sadd.s32 (!%p118_p7), %s1890_s14, %s1503_s29 }
  0x11   : > { %p137_p9 = scmp.lt.s32.totalorder (!%p118_p7), %s1999_s4, 0  ;;  %s138_s5 = ssub.s32 (!%p118_p7), 0, %s1999_s4 }
  0x12   : > { %s1505_s6 = sshll.u32 (!%p118_p7), %s1890_s14, 8  ;;  %s1504_s7 = smin.u32 (!%p118_p7), %s138_s5, %s1999_s4 }
  0x13   : > { %s140_s8 = sand.u32 1, %s1504_s7   ;;  %s2007_s10 = scalar_lea.vmem [#allocation4], %s1502_s30 }
  0x14   : > { %s141_s9 = ssub.s32 0, %s140_s8  ;;  %p1506_p10 = scmp.ne.s32.totalorder %s1999_s4, 0 }
  0x15   : > { %s2567_s9 = smov (!%p137_p9, %s141_s9), %s140_s8  ;;  %s148_s11 = sshra.s32 (!%p1506_p10), %s1505_s6, 7 }
  0x16   : > { %147 = sbr.rel (%p1506_p10) target bundleno = 46 (0x2e), region = 32  ;;  %s157_s30 = scalar_lea.sflag (!%p1506_p10), [#allocation3], %s2567_s9 }
  0x17   : > { %s150_s12 = smul.u32 (!%p1506_p10), 40, %s1894_s15 }
  0x18   : > { %s1741_s21 = smul.u32 (!%p1506_p10), 96, %s2567_s9 }
  0x19   : > { %s151_s22 = sadd.s32 (!%p1506_p10), %s150_s12, %s148_s11 }
  0x1a   : > { %s1507_s24 = sshll.u32 (!%p1506_p10), %s151_s22, 2  ;;  %s156_s29 = scalar_lea.vmem (!%p1506_p10), [#allocation2], %s1741_s21 }
  0x1b   : > { %s2017_s28 = scalar_lea.vmem %s2549_s0, %s1507_s24 }
  0x1c   : > { %v170_v0 = vld [vmem:[%s2017_s28] sm:$0xff]  ;;  %v172_v1 = vld [vmem:[%s2017_s28 + $0x14] sm:$0xff]  ;;  %v174_v2 = vld [vmem:[%s2017_s28 + $0x28] sm:$0xff] }
  0x1d   : > { %171 = vst [vmem:[%s156_s29] sm:$0xff] %v170_v0  ;;  %v176_v3 = vld [vmem:[%s2017_s28 + $0x3c] sm:$0xff]  ;;  %v178_v4 = vld [vmem:[%s2017_s28 + $0x50] sm:$0xff]  ;;  %v180_v5 = vld [vmem:[%s2017_s28 + $0x64] sm:$0xff] }
  0x1e   : > { %173 = vst [vmem:[%s156_s29 + $0xc] sm:$0xff] %v172_v1  ;;  %v182_v6 = vld [vmem:[%s2017_s28 + $0x78] sm:$0xff]  ;;  %v184_v7 = vld [vmem:[%s2017_s28 + $0x8c] sm:$0xff]  ;;  %v1509_v8 = vld [vmem:[%s2017_s28 + $0x8] sm:$0xf] }
  0x1f   : > { %175 = vst [vmem:[%s156_s29 + $0x18] sm:$0xff] %v174_v2  ;;  %v1511_v9 = vld [vmem:[%s2017_s28 + $0x1c] sm:$0xf]  ;;  %v1513_v10 = vld [vmem:[%s2017_s28 + $0x30] sm:$0xf] }
  0x20   : > { %177 = vst [vmem:[%s156_s29 + $0x24] sm:$0xff] %v176_v3  ;;  %v1515_v11 = vld [vmem:[%s2017_s28 + $0x44] sm:$0xf]  ;;  %v1517_v12 = vld [vmem:[%s2017_s28 + $0x58] sm:$0xf] }
  0x21   : > { %179 = vst [vmem:[%s156_s29 + $0x30] sm:$0xff] %v178_v4  ;;  %v1519_v13 = vld [vmem:[%s2017_s28 + $0x6c] sm:$0xf]  ;;  %v1521_v14 = vld [vmem:[%s2017_s28 + $0x80] sm:$0xf] }
  0x22   : > { %181 = vst [vmem:[%s156_s29 + $0x3c] sm:$0xff] %v180_v5  ;;  %v1523_v15 = vld [vmem:[%s2017_s28 + $0x94] sm:$0xf] }
  0x23   : > { %183 = vst [vmem:[%s156_s29 + $0x48] sm:$0xff] %v182_v6 }
  0x24   : > { %185 = vst [vmem:[%s156_s29 + $0x54] sm:$0xff] %v184_v7 }
  0x25   : > { %1510 = vst [vmem:[%s156_s29 + $0x8] sm:$0xf] %v1509_v8 }
  0x26   : > { %1512 = vst [vmem:[%s156_s29 + $0x14] sm:$0xf] %v1511_v9 }
  0x27   : > { %1514 = vst [vmem:[%s156_s29 + $0x20] sm:$0xf] %v1513_v10 }
  0x28   : > { %1516 = vst [vmem:[%s156_s29 + $0x2c] sm:$0xf] %v1515_v11 }
  0x29   : > { %1518 = vst [vmem:[%s156_s29 + $0x38] sm:$0xf] %v1517_v12 }
  0x2a   : > { %1520 = vst [vmem:[%s156_s29 + $0x44] sm:$0xf] %v1519_v13 }
  0x2b   : > { %1522 = vst [vmem:[%s156_s29 + $0x50] sm:$0xf] %v1521_v14 }
  0x2c   : > { %1524 = vst [vmem:[%s156_s29 + $0x5c] sm:$0xf] %v1523_v15 }
  0x2d   : > { %215 = vsyncadd %s157_s30, 1536 }
  0x2e PF: > { %s216_s5 = sadd.s32 1, %s1999_s4 }
  0x2f   : > { %p1525_p11 = scmp.ge.s32.totalorder %s216_s5, 4 }
  0x30   : > { %p221_p12 = scmp.eq.s32.totalorder (!%p1525_p11), %s1890_s14, 1  ;;  %s222_s7 = sadd.s32 (!%p1525_p11), 1, %s1894_s15 }
  0x31   : > { %220 = sbr.rel (%p1525_p11) target bundleno = 78 (0x4e), region = 58  ;;  %s224_s8 = sadd.s32 (!%p1525_p11), 256, %s1505_s6 }
  0x32   : > { %s226_s11 = ssub.s32 (!%p1525_p11), 1, %s2567_s9 }
  0x33   : > { %s1742_s22 = smul.u32 (!%p1525_p11), 96, %s226_s11  ;;  %s236_s29 = scalar_lea.sflag (!%p1525_p11), [#allocation3], %s226_s11 }
  0x35   : > { %s235_s6 = scalar_lea.vmem (!%p1525_p11), [#allocation2], %s1742_s22 }
  0x36   : > { %s2569_s7 = smov (!%p221_p12, %s222_s7), %s1894_s15  ;;  %s2571_s8 = smov (%p221_p12, %s224_s8), 0 }
  0x37   : > { %s229_s12 = smul.u32 40, %s2569_s7  ;;  %s227_s21 = sshra.s32 %s2571_s8, 7 }
  0x39   : > { %s230_s4 = sadd.s32 %s229_s12, %s227_s21 }
  0x3a   : > { %s1526_s24 = sshll.u32 %s230_s4, 2 }
  0x3b   : > { %s2048_s28 = scalar_lea.vmem %s2549_s0, %s1526_s24 }
  0x3c   : > { %v249_v16 = vld [vmem:[%s2048_s28] sm:$0xff]  ;;  %v251_v17 = vld [vmem:[%s2048_s28 + $0x14] sm:$0xff]  ;;  %v253_v18 = vld [vmem:[%s2048_s28 + $0x28] sm:$0xff] }
  0x3d   : > { %250 = vst [vmem:[%s235_s6] sm:$0xff] %v249_v16  ;;  %v255_v19 = vld [vmem:[%s2048_s28 + $0x3c] sm:$0xff]  ;;  %v257_v20 = vld [vmem:[%s2048_s28 + $0x50] sm:$0xff]  ;;  %v259_v21 = vld [vmem:[%s2048_s28 + $0x64] sm:$0xff] }
  0x3e   : > { %252 = vst [vmem:[%s235_s6 + $0xc] sm:$0xff] %v251_v17  ;;  %v261_v22 = vld [vmem:[%s2048_s28 + $0x78] sm:$0xff]  ;;  %v263_v23 = vld [vmem:[%s2048_s28 + $0x8c] sm:$0xff]  ;;  %v1528_v24 = vld [vmem:[%s2048_s28 + $0x8] sm:$0xf] }
  0x3f   : > { %254 = vst [vmem:[%s235_s6 + $0x18] sm:$0xff] %v253_v18  ;;  %v1530_v25 = vld [vmem:[%s2048_s28 + $0x1c] sm:$0xf]  ;;  %v1532_v26 = vld [vmem:[%s2048_s28 + $0x30] sm:$0xf] }
  0x40   : > { %256 = vst [vmem:[%s235_s6 + $0x24] sm:$0xff] %v255_v19  ;;  %v1534_v27 = vld [vmem:[%s2048_s28 + $0x44] sm:$0xf]  ;;  %v1536_v28 = vld [vmem:[%s2048_s28 + $0x58] sm:$0xf] }
  0x41   : > { %258 = vst [vmem:[%s235_s6 + $0x30] sm:$0xff] %v257_v20  ;;  %v1538_v29 = vld [vmem:[%s2048_s28 + $0x6c] sm:$0xf]  ;;  %v1540_v30 = vld [vmem:[%s2048_s28 + $0x80] sm:$0xf] }
  0x42   : > { %260 = vst [vmem:[%s235_s6 + $0x3c] sm:$0xff] %v259_v21  ;;  %v1542_v31 = vld [vmem:[%s2048_s28 + $0x94] sm:$0xf] }
  0x43   : > { %262 = vst [vmem:[%s235_s6 + $0x48] sm:$0xff] %v261_v22 }
  0x44   : > { %264 = vst [vmem:[%s235_s6 + $0x54] sm:$0xff] %v263_v23 }
  0x45   : > { %1529 = vst [vmem:[%s235_s6 + $0x8] sm:$0xf] %v1528_v24 }
  0x46   : > { %1531 = vst [vmem:[%s235_s6 + $0x14] sm:$0xf] %v1530_v25 }
  0x47   : > { %1533 = vst [vmem:[%s235_s6 + $0x20] sm:$0xf] %v1532_v26 }
  0x48   : > { %1535 = vst [vmem:[%s235_s6 + $0x2c] sm:$0xf] %v1534_v27 }
  0x49   : > { %1537 = vst [vmem:[%s235_s6 + $0x38] sm:$0xf] %v1536_v28 }
  0x4a   : > { %1539 = vst [vmem:[%s235_s6 + $0x44] sm:$0xf] %v1538_v29 }
  0x4b   : > { %1541 = vst [vmem:[%s235_s6 + $0x50] sm:$0xf] %v1540_v30 }
  0x4c   : > { %1543 = vst [vmem:[%s235_s6 + $0x5c] sm:$0xf] %v1542_v31 }
  0x4d   : > { %294 = vsyncadd %s236_s29, 1536 }
  0x4e PF: > { %s1743_s30 = smul.u32 96, %s2567_s9  ;;  %s298_s7 = scalar_lea.sflag [#allocation3], %s2567_s9 }
  0x50   : > { %s2069_s5 = scalar_lea.vmem [#allocation2], %s1743_s30 }
  0x51   : > { %1878 = dma.done.wait %s298_s7, 1536 }
  0x52   : > { %1879 = vsyncadd %s298_s7, 4294965760  ;;  %s1908_s9 = smov 127   ;;  %s1909_s8 = smov 126   ;;  %vm414_vm0 = vcmask 1039360   ;;  %vm577_vm1 = vcmask 1031168   ;;  %v1759_v31 = vld [vmem:[%s2550_s1 + $0x18] sm:$0xff] }
  0x53   : > { %v1603_v32 = vld [vmem:[%s2069_s5 + $0x50] sm:$0xf]  ;;  %v1757_v33 = vld [vmem:[%s2069_s5 + $0x58] sm:$0xf0]  ;;  %v1595_v34 = vld [vmem:[%s2069_s5 + $0x48] sm:$0xf] }
  0x54   : > { %v2075_v35 = vor.u32 %v1757_v33, %v1603_v32  ;;  %v1751_v36 = vld [vmem:[%s2069_s5 + $0x50] sm:$0xf0]  ;;  %v1585_v39 = vld [vmem:[%s2069_s5 + $0x3c] sm:$0xf0]  ;;  %v1583_v40 = vld [vmem:[%s2069_s5 + $0x30] sm:$0xf] }
  0x55   : > { %v2078_v37 = vor.u32 %v1751_v36, %v1595_v34  ;;  %v1748_v38 = vld [vmem:[%s2069_s5 + $0x34] sm:$0xf]  ;;  %v1749_v41 = vld [vmem:[%s2069_s5 + $0x38] sm:$0xf0]  ;;  %v1750_v43 = vld [vmem:[%s2069_s5 + $0x4c] sm:$0xf] }
  0x56   : > { %412 = vrot.lane.b32.xlu1 %v2075_v35, %s1908_s9  ;;  %v2088_v42 = vor.u32 %v1748_v38, %v1585_v39  ;;  %v1597_v44 = vld [vmem:[%s2069_s5 + $0x54] sm:$0xf0]  ;;  %v2094_v45 = vor.u32 %v1749_v41, %v1583_v40  ;;  %v1756_v47 = vld [vmem:[%s2069_s5 + $0x40] sm:$0xf0]  ;;  %v1746_v50 = vld [vmem:[%s2069_s5 + $0x1c] sm:$0xf] }
  0x57   : > { %408 = vrot.lane.b32.xlu0 %v2078_v37, %s1908_s9  ;;  %v1591_v46 = vld [vmem:[%s2069_s5 + $0x38] sm:$0xf]  ;;  %v2098_v48 = vor.u32 %v1750_v43, %v1597_v44  ;;  %v1573_v51 = vld [vmem:[%s2069_s5 + $0x24] sm:$0xf0]  ;;  %v1747_v53 = vld [vmem:[%s2069_s5 + $0x20] sm:$0xf0] }
  0x58   : > { %404 = vrot.lane.b32.xlu2 %v2088_v42, %s1908_s9  ;;  %v2100_v49 = vor.u32 %v1756_v47, %v1591_v46  ;;  %v1571_v52 = vld [vmem:[%s2069_s5 + $0x18] sm:$0xf]  ;;  %v2112_v54 = vor.u32 %v1746_v50, %v1573_v51  ;;  %v1579_v55 = vld [vmem:[%s2069_s5 + $0x20] sm:$0xf]  ;;  %v1755_v56 = vld [vmem:[%s2069_s5 + $0x28] sm:$0xf0] }
  0x59   : > { %v2116_v57 = vor.u32 %v1747_v53, %v1571_v52  ;;  %v2118_v58 = vor.u32 %v1755_v56, %v1579_v55  ;;  %v1744_v59 = vld [vmem:[%s2069_s5 + $0x4] sm:$0xf]  ;;  %v1561_v60 = vld [vmem:[%s2069_s5 + $0xc] sm:$0xf0]  ;;  %v1559_v61 = vld [vmem:[%s2069_s5] sm:$0xf] }
  0x5a   : > { %v1745_v62 = vld [vmem:[%s2069_s5 + $0x8] sm:$0xf0]  ;;  %v2130_v63 = vor.u32 %v1744_v59, %v1561_v60  ;;  %v1567_v0 = vld [vmem:[%s2069_s5 + $0x8] sm:$0xf]  ;;  %v1754_v1 = vld [vmem:[%s2069_s5 + $0x10] sm:$0xf0] }
  0x5b   : > { %v2134_v2 = vor.u32 %v1745_v62, %v1559_v61  ;;  %v2136_v3 = vor.u32 %v1754_v1, %v1567_v0  ;;  %s1910_s11 = smov 110   ;;  %s1911_s12 = smov 109   ;;  %vm431_vm2 = vcmask 523264   ;;  %v1758_v40 = vld [vmem:[%s2550_s1 + $0x10] sm:$0xff]  ;;  %v1752_v47 = vld [vmem:[%s2550_s1] sm:$0xff]  ;;  %vm685_vm3 = vcmask 900096  }
  0x5c   : > { %s1912_s21 = smov 108   ;;  %s1913_s24 = smov 92   ;;  %v1760_v59 = vld [vmem:[%s2550_s1 + $0x20] sm:$0xff]  ;;  %v1753_v1 = vld [vmem:[%s2550_s1 + $0x8] sm:$0xff]  ;;  %vm793_vm4 = vcmask 891904   ;;  %vm901_vm5 = vcmask 883712  }
  0x5d   : > { %s1915_s22 = smov 90   ;;  %vm1009_vm6 = vcmask 752640   ;;  %vm1117_vm7 = vcmask 744448   ;;  %vm1225_vm8 = vcmask 736256  }
  0x5e   : > { %402 = vrot.lane.b32.xlu1 %v2094_v45, %s1908_s9 }
  0x5f   : > { %410 = vrot.lane.b32.xlu0 %v2098_v48, %s1908_s9 }
  0x60   : > { %406 = vrot.lane.b32.xlu2 %v2100_v49, %s1908_s9 }
  0x66   : > { %398 = vrot.lane.b32.xlu1 %v2112_v54, %s1908_s9 }
  0x67   : > { %396 = vrot.lane.b32.xlu0 %v2116_v57, %s1908_s9 }
  0x68   : > { %400 = vrot.lane.b32.xlu2 %v2118_v58, %s1908_s9 }
  0x6e   : > { %392 = vrot.lane.b32.xlu1 %v2130_v63, %s1908_s9 }
  0x6f   : > { %390 = vrot.lane.b32.xlu0 %v2134_v2, %s1908_s9 }
  0x70   : > { %394 = vrot.lane.b32.xlu2 %v2136_v3, %s1908_s9  ;;  %s1914_s9 = smov 91  }
  0x76   : > { %573 = vrot.lane.b32.xlu1 %v2098_v48, %s1909_s8 }
  0x77   : > { %571 = vrot.lane.b32.xlu0 %v2078_v37, %s1909_s8 }
  0x78   : > { %575 = vrot.lane.b32.xlu2 %v2075_v35, %s1909_s8 }
  0x7e   : > { %567 = vrot.lane.b32.xlu1 %v2088_v42, %s1909_s8 }
  0x7f   : > { %565 = vrot.lane.b32.xlu0 %v2094_v45, %s1909_s8 }
  0x80   : > { %569 = vrot.lane.b32.xlu2 %v2100_v49, %s1909_s8 }
  0x86   : > { %561 = vrot.lane.b32.xlu1 %v2112_v54, %s1909_s8 }
  0x87   : > { %559 = vrot.lane.b32.xlu0 %v2116_v57, %s1909_s8 }
  0x88   : > { %563 = vrot.lane.b32.xlu2 %v2118_v58, %s1909_s8 }
  0x8e   : > { %555 = vrot.lane.b32.xlu1 %v2130_v63, %s1909_s8 }
  0x8f   : > { %553 = vrot.lane.b32.xlu0 %v2134_v2, %s1909_s8 }
  0x90   : > { %557 = vrot.lane.b32.xlu2 %v2136_v3, %s1909_s8 }
  0x96   : > { %681 = vrot.lane.b32.xlu1 %v2098_v48, %s1910_s11 }
  0x97   : > { %679 = vrot.lane.b32.xlu0 %v2078_v37, %s1910_s11 }
  0x98   : > { %683 = vrot.lane.b32.xlu2 %v2075_v35, %s1910_s11 }
  0x9e   : > { %675 = vrot.lane.b32.xlu1 %v2088_v42, %s1910_s11 }
  0x9f   : > { %673 = vrot.lane.b32.xlu0 %v2094_v45, %s1910_s11 }
  0xa0   : > { %677 = vrot.lane.b32.xlu2 %v2100_v49, %s1910_s11 }
  0xa6   : > { %669 = vrot.lane.b32.xlu1 %v2112_v54, %s1910_s11 }
  0xa7   : > { %667 = vrot.lane.b32.xlu0 %v2116_v57, %s1910_s11 }
  0xa8   : > { %671 = vrot.lane.b32.xlu2 %v2118_v58, %s1910_s11 }
  0xae   : > { %789 = vrot.lane.b32.xlu1 %v2098_v48, %s1911_s12 }
  0xaf   : > { %787 = vrot.lane.b32.xlu0 %v2078_v37, %s1911_s12 }
  0xb0   : > { %791 = vrot.lane.b32.xlu2 %v2075_v35, %s1911_s12 }
  0xb2   : > { %v405_v4 = vpop.permute.xlu2 %404 }
  0xb6   : > { %663 = vrot.lane.b32.xlu1 %v2130_v63, %s1910_s11 }
  0xb7   : > { %661 = vrot.lane.b32.xlu0 %v2134_v2, %s1910_s11 }
  0xb8   : > { %665 = vrot.lane.b32.xlu2 %v2136_v3, %s1910_s11 }
  0xba   : > { %v407_v5 = vpop.permute.xlu2 %406 }
  0xbb   : > { %v420_v16 = vsel %vm414_vm0, %v405_v4, %v407_v5 }
  0xbe   : > { %783 = vrot.lane.b32.xlu1 %v2088_v42, %s1911_s12 }
  0xbf   : > { %781 = vrot.lane.b32.xlu0 %v2094_v45, %s1911_s12 }
  0xc0   : > { %785 = vrot.lane.b32.xlu2 %v2100_v49, %s1911_s12 }
  0xc2   : > { %v401_v6 = vpop.permute.xlu2 %400 }
  0xc6   : > { %777 = vrot.lane.b32.xlu1 %v2112_v54, %s1911_s12 }
  0xc7   : > { %775 = vrot.lane.b32.xlu0 %v2116_v57, %s1911_s12 }
  0xc8   : > { %v413_v7 = vpop.permute.xlu1 %412  ;;  %779 = vrot.lane.b32.xlu2 %v2118_v58, %s1911_s12 }
  0xc9   : > { %v409_v8 = vpop.permute.xlu0 %408 }
  0xca   : > { %v395_v9 = vpop.permute.xlu2 %394 }
  0xce   : > { %771 = vrot.lane.b32.xlu1 %v2130_v63, %s1911_s12 }
  0xcf   : > { %769 = vrot.lane.b32.xlu0 %v2134_v2, %s1911_s12 }
  0xd0   : > { %v403_v10 = vpop.permute.xlu1 %402  ;;  %773 = vrot.lane.b32.xlu2 %v2136_v3, %s1911_s12 }
  0xd1   : > { %v411_v11 = vpop.permute.xlu0 %410  ;;  %v419_v15 = vsel %vm414_vm0, %v403_v10, %v405_v4  ;;  %v1761_v10 = vld [vmem:[%s2550_s1 + $0x28] sm:$0xff] }
  0xd2   : > { %v421_v12 = vsel %vm414_vm0, %v409_v8, %v411_v11  ;;  %v422_v13 = vsel %vm414_vm0, %v411_v11, %v413_v7  ;;  %v576_v14 = vpop.permute.xlu2 %575 }
  0xd3   : > { %442 = vmatpush.bf16.msra.mxu0 %v421_v12  ;;  %1774 = vmatpush.bf16.msra.mxu2 %v421_v12 }
  0xd4   : > { %461 = vmatpush.bf16.msra.mxu1 %v422_v13  ;;  %1778 = vmatpush.bf16.msra.mxu3 %v422_v13 }
  0xd6   : > { %897 = vrot.lane.b32.xlu1 %v2098_v48, %s1912_s21 }
  0xd7   : > { %443 = vmatpush.bf16.msra.mxu0 %v419_v15  ;;  %1775 = vmatpush.bf16.msra.mxu2 %v419_v15 }
  0xd8   : > { %462 = vmatpush.bf16.msra.mxu1 %v420_v16  ;;  %1779 = vmatpush.bf16.msra.mxu3 %v420_v16  ;;  %v399_v17 = vpop.permute.xlu1 %398 }
  0xd9   : > { %895 = vrot.lane.b32.xlu0 %v2078_v37, %s1912_s21  ;;  %v397_v18 = vpop.permute.xlu0 %396  ;;  %v418_v19 = vsel %vm414_vm0, %v399_v17, %v401_v6  ;;  %899 = vrot.lane.b32.xlu2 %v2075_v35, %s1912_s21 }
  0xda   : > { %v417_v20 = vsel %vm414_vm0, %v397_v18, %v399_v17  ;;  %v570_v21 = vpop.permute.xlu2 %569 }
  0xdb   : > { %444 = vmatpush.bf16.msra.mxu0 %v417_v20  ;;  %1776 = vmatpush.bf16.msra.mxu2 %v417_v20 }
  0xdc   : > { %463 = vmatpush.bf16.msra.mxu1 %v418_v19  ;;  %1780 = vmatpush.bf16.msra.mxu3 %v418_v19 }
  0xde   : > { %891 = vrot.lane.b32.xlu1 %v2088_v42, %s1912_s21 }
  0xe0   : > { %v393_v22 = vpop.permute.xlu1 %392 }
  0xe1   : > { %889 = vrot.lane.b32.xlu0 %v2094_v45, %s1912_s21  ;;  %v391_v23 = vpop.permute.xlu0 %390  ;;  %v416_v24 = vsel %vm414_vm0, %v393_v22, %v395_v9  ;;  %893 = vrot.lane.b32.xlu2 %v2100_v49, %s1912_s21 }
  0xe2   : > { %v415_v25 = vsel %vm414_vm0, %v391_v23, %v393_v22  ;;  %464 = vmatpush.bf16.msra.mxu1 %v416_v24  ;;  %1781 = vmatpush.bf16.msra.mxu3 %v416_v24  ;;  %v564_v26 = vpop.permute.xlu2 %563  ;;  %v1762_v24 = vld [vmem:[%s2550_s1 + $0x30] sm:$0xff] }
  0xe3   : > { %445 = vmatpush.bf16.msra.mxu0 %v415_v25  ;;  %1777 = vmatpush.bf16.msra.mxu2 %v415_v25 }
  0xe5   : > { %1608 = vmatmul.msk.bf16.vlgmr.msra.gmra.mxu3 %vm431_vm2, %v1759_v31  ;;  %1607 = vmatmul.msk.bf16.vlgmr.msra.gmra.mxu1 %vm431_vm2, %v1758_v40 }
  0xe6   : > { %523 = vmatpush.bf16.msrb.mxu3 %v2098_v48  ;;  %885 = vrot.lane.b32.xlu1 %v2112_v54, %s1912_s21 }
  0xe7   : > { %504 = vmatpush.bf16.msrb.mxu2 %v2078_v37  ;;  %1605 = vmatmul.msk.bf16.vlgmr.msra.gmra.mxu0 %vm431_vm2, %v1758_v40  ;;  %v1764_v40 = vld [vmem:[%s2550_s1 + $0x40] sm:$0xff] }
  0xe8   : > { %v574_v27 = vpop.permute.xlu1 %573  ;;  %1606 = vmatmul.msk.bf16.vlgmr.msra.gmra.mxu2 %vm431_vm2, %v1759_v31 }
  0xe9   : > { %883 = vrot.lane.b32.xlu0 %v2116_v57, %s1912_s21  ;;  %v572_v28 = vpop.permute.xlu0 %571  ;;  %v585_v29 = vsel %vm577_vm1, %v574_v27, %v576_v14  ;;  %887 = vrot.lane.b32.xlu2 %v2118_v58, %s1912_s21 }
  0xea   : > { %524 = vmatpush.bf16.msrb.mxu3 %v2088_v42  ;;  %v584_v30 = vsel %vm577_vm1, %v572_v28, %v574_v27  ;;  %623 = vmatpush.bf16.msrb.mxu1 %v585_v29  ;;  %v558_v32 = vpop.permute.xlu2 %557 }
  0xeb   : > { %505 = vmatpush.bf16.msrb.mxu2 %v2094_v45  ;;  %604 = vmatpush.bf16.msrb.mxu0 %v584_v30 }
  0xee   : > { %525 = vmatpush.bf16.msrb.mxu3 %v2112_v54  ;;  %1005 = vrot.lane.b32.xlu1 %v2098_v48, %s1913_s24 }
  0xef   : > { %506 = vmatpush.bf16.msrb.mxu2 %v2116_v57 }
  0xf0   : > { %v568_v33 = vpop.permute.xlu1 %567 }
  0xf1   : > { %1003 = vrot.lane.b32.xlu0 %v2078_v37, %s1913_s24  ;;  %v566_v34 = vpop.permute.xlu0 %565  ;;  %v583_v36 = vsel %vm577_vm1, %v568_v33, %v570_v21  ;;  %1007 = vrot.lane.b32.xlu2 %v2075_v35, %s1913_s24 }
  0xf2   : > { %526 = vmatpush.bf16.msrb.mxu3 %v2130_v63  ;;  %v582_v38 = vsel %vm577_vm1, %v566_v34, %v568_v33  ;;  %624 = vmatpush.bf16.msrb.mxu1 %v583_v36  ;;  %v684_v39 = vpop.permute.xlu2 %683 }
  0xf3   : > { %507 = vmatpush.bf16.msrb.mxu2 %v2134_v2  ;;  %605 = vmatpush.bf16.msrb.mxu0 %v582_v38 }
  0xf5   : > { %1619 = vmatmul.msk.bf16.vlgmr.msrb.gmra.mxu3 %vm431_vm2, %v1752_v47 }
  0xf6   : > { %879 = vrot.lane.b32.xlu1 %v2130_v63, %s1912_s21 }
  0xf8   : > { %v562_v41 = vpop.permute.xlu1 %561  ;;  %1617 = vmatmul.msk.bf16.vlgmr.msrb.gmra.mxu2 %vm431_vm2, %v1752_v47  ;;  %v1765_v47 = vld [vmem:[%s2550_s1 + $0x48] sm:$0xff] }
  0xf9   : > { %877 = vrot.lane.b32.xlu0 %v2134_v2, %s1912_s21  ;;  %v560_v43 = vpop.permute.xlu0 %559  ;;  %v581_v44 = vsel %vm577_vm1, %v562_v41, %v564_v26  ;;  %881 = vrot.lane.b32.xlu2 %v2136_v3, %s1912_s21  ;;  %s1734_s21 = sshll.u32 (%p1983_p5), %s1890_s14, 1 }
  0xfa   : > { %v580_v46 = vsel %vm577_vm1, %v560_v43, %v562_v41  ;;  %625 = vmatpush.bf16.msrb.mxu1 %v581_v44  ;;  %v678_v50 = vpop.permute.xlu2 %677 }
  0xfb   : > { %606 = vmatpush.bf16.msrb.mxu0 %v580_v46 }
  0xfe   : > { %999 = vrot.lane.b32.xlu1 %v2088_v42, %s1913_s24 }
 0x100   : > { %v556_v51 = vpop.permute.xlu1 %555 }
 0x101   : > { %997 = vrot.lane.b32.xlu0 %v2094_v45, %s1913_s24  ;;  %v554_v52 = vpop.permute.xlu0 %553  ;;  %v579_v53 = vsel %vm577_vm1, %v556_v51, %v558_v32  ;;  %1001 = vrot.lane.b32.xlu2 %v2100_v49, %s1913_s24 }
 0x102   : > { %v578_v55 = vsel %vm577_vm1, %v554_v52, %v556_v51  ;;  %626 = vmatpush.bf16.msrb.mxu1 %v579_v53  ;;  %v672_v56 = vpop.permute.xlu2 %671 }
 0x103   : > { %607 = vmatpush.bf16.msrb.mxu0 %v578_v55 }
 0x105   : > { %1635 = vmatmul.msk.bf16.vlgmr.msrb.gmra.mxu1 %vm431_vm2, %v1760_v59  ;;  %1620 = vmatmul.msk.bf16.gmra.mxu3 %vm431_vm2, %v1753_v1 }
 0x106   : > { %993 = vrot.lane.b32.xlu1 %v2112_v54, %s1913_s24  ;;  %1633 = vmatmul.msk.bf16.vlgmr.msrb.gmra.mxu0 %vm431_vm2, %v1760_v59 }
 0x108   : > { %v682_v60 = vpop.permute.xlu1 %681  ;;  %1618 = vmatmul.msk.bf16.gmra.mxu2 %vm431_vm2, %v1753_v1  ;;  %v1766_v1 = vld [vmem:[%s2550_s1 + $0x50] sm:$0xff] }
 0x109   : > { %991 = vrot.lane.b32.xlu0 %v2116_v57, %s1913_s24  ;;  %v680_v61 = vpop.permute.xlu0 %679  ;;  %v693_v62 = vsel %vm685_vm3, %v682_v60, %v684_v39  ;;  %995 = vrot.lane.b32.xlu2 %v2118_v58, %s1913_s24 }
 0x10a   : > { %v692_v0 = vsel %vm685_vm3, %v680_v61, %v682_v60  ;;  %731 = vmatpush.bf16.msra.mxu3 %v693_v62  ;;  %v792_v4 = vpop.permute.xlu2 %791 }
 0x10b   : > { %712 = vmatpush.bf16.msra.mxu2 %v692_v0 }
 0x10e   : > { %987 = vrot.lane.b32.xlu1 %v2130_v63, %s1913_s24 }
 0x110   : > { %v676_v5 = vpop.permute.xlu1 %675 }
 0x111   : > { %985 = vrot.lane.b32.xlu0 %v2134_v2, %s1913_s24  ;;  %v674_v6 = vpop.permute.xlu0 %673  ;;  %v691_v7 = vsel %vm685_vm3, %v676_v5, %v678_v50  ;;  %989 = vrot.lane.b32.xlu2 %v2136_v3, %s1913_s24 }
 0x112   : > { %v690_v8 = vsel %vm685_vm3, %v674_v6, %v676_v5  ;;  %732 = vmatpush.bf16.msra.mxu3 %v691_v7  ;;  %v666_v9 = vpop.permute.xlu2 %665 }
 0x113   : > { %713 = vmatpush.bf16.msra.mxu2 %v690_v8 }
 0x115   : > { %1636 = vmatmul.msk.bf16.gmra.mxu1 %vm431_vm2, %v1761_v10 }
 0x116   : > { %1113 = vrot.lane.b32.xlu1 %v2098_v48, %s1914_s9  ;;  %1634 = vmatmul.msk.bf16.gmra.mxu0 %vm431_vm2, %v1761_v10 }
 0x118   : > { %v670_v11 = vpop.permute.xlu1 %669 }
 0x119   : > { %1111 = vrot.lane.b32.xlu0 %v2078_v37, %s1914_s9  ;;  %v668_v12 = vpop.permute.xlu0 %667  ;;  %v689_v13 = vsel %vm685_vm3, %v670_v11, %v672_v56  ;;  %1115 = vrot.lane.b32.xlu2 %v2075_v35, %s1914_s9 }
 0x11a   : > { %v688_v14 = vsel %vm685_vm3, %v668_v12, %v670_v11  ;;  %733 = vmatpush.bf16.msra.mxu3 %v689_v13  ;;  %v786_v15 = vpop.permute.xlu2 %785 }
 0x11b   : > { %714 = vmatpush.bf16.msra.mxu2 %v688_v14 }
 0x11e   : > { %1107 = vrot.lane.b32.xlu1 %v2088_v42, %s1914_s9 }
 0x120   : > { %v790_v16 = vpop.permute.xlu1 %789 }
 0x121   : > { %1105 = vrot.lane.b32.xlu0 %v2094_v45, %s1914_s9  ;;  %v788_v17 = vpop.permute.xlu0 %787  ;;  %v801_v18 = vsel %vm793_vm4, %v790_v16, %v792_v4  ;;  %1109 = vrot.lane.b32.xlu2 %v2100_v49, %s1914_s9 }
 0x122   : > { %v800_v19 = vsel %vm793_vm4, %v788_v17, %v790_v16  ;;  %839 = vmatpush.bf16.msra.mxu1 %v801_v18  ;;  %v780_v20 = vpop.permute.xlu2 %779 }
 0x123   : > { %820 = vmatpush.bf16.msra.mxu0 %v800_v19  ;;  %v1767_v19 = vld [vmem:[%s2550_s1 + $0x58] sm:$0xff] }
 0x126   : > { %1101 = vrot.lane.b32.xlu1 %v2112_v54, %s1914_s9 }
 0x128   : > { %v664_v21 = vpop.permute.xlu1 %663 }
 0x129   : > { %1099 = vrot.lane.b32.xlu0 %v2116_v57, %s1914_s9  ;;  %v662_v22 = vpop.permute.xlu0 %661  ;;  %v687_v23 = vsel %vm685_vm3, %v664_v21, %v666_v9  ;;  %1103 = vrot.lane.b32.xlu2 %v2118_v58, %s1914_s9 }
 0x12a   : > { %v686_v25 = vsel %vm685_vm3, %v662_v22, %v664_v21  ;;  %734 = vmatpush.bf16.msra.mxu3 %v687_v23  ;;  %v774_v26 = vpop.permute.xlu2 %773 }
 0x12b   : > { %715 = vmatpush.bf16.msra.mxu2 %v686_v25 }
 0x12d   : > { %1651 = vmatmul.msk.bf16.vlgmr.msra.gmra.mxu3 %vm431_vm2, %v1762_v24 }
 0x12e   : > { %1221 = vrot.lane.b32.xlu1 %v2098_v48, %s1915_s22  ;;  %1649 = vmatmul.msk.bf16.vlgmr.msra.gmra.mxu2 %vm431_vm2, %v1762_v24 }
 0x130   : > { %v784_v27 = vpop.permute.xlu1 %783 }
 0x131   : > { %1219 = vrot.lane.b32.xlu0 %v2078_v37, %s1915_s22  ;;  %v782_v28 = vpop.permute.xlu0 %781  ;;  %v799_v29 = vsel %vm793_vm4, %v784_v27, %v786_v15  ;;  %1223 = vrot.lane.b32.xlu2 %v2075_v35, %s1915_s22  ;;  %v1763_v35 = vld [vmem:[%s2550_s1 + $0x38] sm:$0xff] }
 0x132   : > { %v798_v30 = vsel %vm793_vm4, %v782_v28, %v784_v27  ;;  %840 = vmatpush.bf16.msra.mxu1 %v799_v29  ;;  %v1768_v28 = vld [vmem:[%s2550_s1 + $0x60] sm:$0xff] }
 0x133   : > { %821 = vmatpush.bf16.msra.mxu0 %v798_v30  ;;  %v900_v31 = vpop.permute.xlu2 %899 }
 0x136   : > { %1095 = vrot.lane.b32.xlu1 %v2130_v63, %s1914_s9 }
 0x138   : > { %v778_v48 = vpop.permute.xlu1 %777 }
 0x139   : > { %1093 = vrot.lane.b32.xlu0 %v2134_v2, %s1914_s9  ;;  %v776_v32 = vpop.permute.xlu0 %775  ;;  %v797_v37 = vsel %vm793_vm4, %v778_v48, %v780_v20  ;;  %1097 = vrot.lane.b32.xlu2 %v2136_v3, %s1914_s9 }
 0x13a   : > { %v796_v33 = vsel %vm793_vm4, %v776_v32, %v778_v48  ;;  %841 = vmatpush.bf16.msra.mxu1 %v797_v37 }
 0x13b   : > { %822 = vmatpush.bf16.msra.mxu0 %v796_v33  ;;  %v894_v34 = vpop.permute.xlu2 %893 }
 0x13d   : > { %1652 = vmatmul.msk.bf16.gmra.mxu3 %vm431_vm2, %v1763_v35 }
 0x13e   : > { %1215 = vrot.lane.b32.xlu1 %v2088_v42, %s1915_s22  ;;  %1650 = vmatmul.msk.bf16.gmra.mxu2 %vm431_vm2, %v1763_v35 }
 0x140   : > { %v772_v36 = vpop.permute.xlu1 %771 }
 0x141   : > { %1213 = vrot.lane.b32.xlu0 %v2094_v45, %s1915_s22  ;;  %v770_v38 = vpop.permute.xlu0 %769  ;;  %v795_v39 = vsel %vm793_vm4, %v772_v36, %v774_v26  ;;  %1217 = vrot.lane.b32.xlu2 %v2100_v49, %s1915_s22 }
 0x142   : > { %v794_v41 = vsel %vm793_vm4, %v770_v38, %v772_v36  ;;  %842 = vmatpush.bf16.msra.mxu1 %v795_v39 }
 0x143   : > { %823 = vmatpush.bf16.msra.mxu0 %v794_v41  ;;  %v888_v42 = vpop.permute.xlu2 %887 }
 0x145   : > { %1667 = vmatmul.msk.bf16.vlgmr.msra.gmra.mxu1 %vm431_vm2, %v1764_v40 }
 0x146   : > { %1209 = vrot.lane.b32.xlu1 %v2112_v54, %s1915_s22  ;;  %1665 = vmatmul.msk.bf16.vlgmr.msra.gmra.mxu0 %vm431_vm2, %v1764_v40 }
 0x148   : > { %v898_v45 = vpop.permute.xlu1 %897 }
 0x149   : > { %1207 = vrot.lane.b32.xlu0 %v2116_v57, %s1915_s22  ;;  %v909_v43 = vsel %vm901_vm5, %v898_v45, %v900_v31  ;;  %1211 = vrot.lane.b32.xlu2 %v2118_v58, %s1915_s22 }
 0x14a   : > { %947 = vmatpush.bf16.msrb.mxu3 %v909_v43 }
 0x14b   : > { %v896_v49 = vpop.permute.xlu0 %895  ;;  %v1008_v44 = vpop.permute.xlu2 %1007 }
 0x14c   : > { %v908_v46 = vsel %vm901_vm5, %v896_v49, %v898_v45 }
 0x14d   : > { %928 = vmatpush.bf16.msrb.mxu2 %v908_v46 }
 0x14e   : > { %1203 = vrot.lane.b32.xlu1 %v2130_v63, %s1915_s22 }
 0x150   : > { %v892_v54 = vpop.permute.xlu1 %891 }
 0x151   : > { %1201 = vrot.lane.b32.xlu0 %v2134_v2, %s1915_s22  ;;  %v907_v57 = vsel %vm901_vm5, %v892_v54, %v894_v34  ;;  %1205 = vrot.lane.b32.xlu2 %v2136_v3, %s1915_s22  ;;  %s1735_s22 = sshll.u32 (%p1983_p5), %s1894_s15, 4 }
 0x152   : > { %948 = vmatpush.bf16.msrb.mxu3 %v907_v57  ;;  %s1351_s4 = sadd.s32 (%p1983_p5), %s1735_s22, %s1734_s21 }
 0x153   : > { %v890_v58 = vpop.permute.xlu0 %889  ;;  %v882_v50 = vpop.permute.xlu2 %881  ;;  %s1736_s24 = sshll.u32 (%p1983_p5), %s1351_s4, 2 }
 0x154   : > { %v906_v51 = vsel %vm901_vm5, %v890_v58, %v892_v54  ;;  %s1353_s28 = scalar_lea.vmem (%p1983_p5), %s2552_s3, %s1736_s24 }
 0x155   : > { %929 = vmatpush.bf16.msrb.mxu2 %v906_v51  ;;  %1668 = vmatmul.msk.bf16.gmra.mxu1 %vm431_vm2, %v1765_v47 }
 0x156   : > { %1666 = vmatmul.msk.bf16.gmra.mxu0 %vm431_vm2, %v1765_v47 }
 0x158   : > { %v886_v63 = vpop.permute.xlu1 %885 }
 0x159   : > { %v905_v2 = vsel %vm901_vm5, %v886_v63, %v888_v42 }
 0x15a   : > { %949 = vmatpush.bf16.msrb.mxu3 %v905_v2 }
 0x15b   : > { %v884_v52 = vpop.permute.xlu0 %883  ;;  %v1002_v53 = vpop.permute.xlu2 %1001 }
 0x15c   : > { %v904_v55 = vsel %vm901_vm5, %v884_v52, %v886_v63  ;;  %v1769_v63 = vld [vmem:[%s2550_s1 + $0x68] sm:$0xff] }
 0x15d   : > { %930 = vmatpush.bf16.msrb.mxu2 %v904_v55 }
 0x160   : > { %v1006_v3 = vpop.permute.xlu1 %1005 }
 0x161   : > { %v1017_v56 = vsel %vm1009_vm6, %v1006_v3, %v1008_v44 }
 0x162   : > { %1055 = vmatpush.bf16.msrb.mxu1 %v1017_v56  ;;  %v466_v14 = vpop.f32.mrf.mxu1 }
 0x163   : > { %v1004_v59 = vpop.permute.xlu0 %1003  ;;  %v996_v60 = vpop.permute.xlu2 %995 }
 0x164   : > { %v1016_v61 = vsel %vm1009_vm6, %v1004_v59, %v1006_v3  ;;  %v447_v13 = vpop.f32.mrf.mxu0 }
 0x165   : > { %1036 = vmatpush.bf16.msrb.mxu0 %v1016_v61 }
 0x168   : > { %v880_v62 = vpop.permute.xlu1 %879  ;;  %v2384_v10 = vpop.f32.mrf.mxu3 }
 0x169   : > { %v903_v0 = vsel %vm901_vm5, %v880_v62, %v882_v50 }
 0x16a   : > { %950 = vmatpush.bf16.msrb.mxu3 %v903_v0  ;;  %v468_v24 = vpop.f32.mrf.mxu1 }
 0x16b   : > { %v878_v4 = vpop.permute.xlu0 %877  ;;  %v990_v6 = vpop.permute.xlu2 %989 }
 0x16c   : > { %v902_v5 = vsel %vm901_vm5, %v878_v4, %v880_v62  ;;  %v2381_v8 = vpop.f32.mrf.mxu2  ;;  %v449_v23 = vpop.f32.mrf.mxu0 }
 0x16d   : > { %931 = vmatpush.bf16.msrb.mxu2 %v902_v5  ;;  %1683 = vmatmul.msk.bf16.vlgmr.msrb.gmra.mxu3 %vm431_vm2, %v1766_v1 }
 0x170   : > { %1681 = vmatmul.msk.bf16.vlgmr.msrb.gmra.mxu2 %vm431_vm2, %v1766_v1  ;;  %v1000_v7 = vpop.permute.xlu1 %999  ;;  %v2393_v20 = vpop.f32.mrf.mxu3 }
 0x171   : > { %v1015_v9 = vsel %vm1009_vm6, %v1000_v7, %v1002_v53 }
 0x172   : > { %1056 = vmatpush.bf16.msrb.mxu1 %v1015_v9 }
 0x173   : > { %v998_v11 = vpop.permute.xlu0 %997  ;;  %v1116_v15 = vpop.permute.xlu2 %1115 }
 0x174   : > { %v1014_v12 = vsel %vm1009_vm6, %v998_v11, %v1000_v7  ;;  %v2387_v17 = vpop.f32.mrf.mxu2 }
 0x175   : > { %1037 = vmatpush.bf16.msrb.mxu0 %v1014_v12 }
 0x178   : > { %v994_v16 = vpop.permute.xlu1 %993  ;;  %v528_v29 = vpop.f32.mrf.mxu3 }
 0x179   : > { %v1013_v18 = vsel %vm1009_vm6, %v994_v16, %v996_v60  ;;  %v529_v37 = vadd.f32 %v528_v29, %v466_v14 }
 0x17a   : > { %1057 = vmatpush.bf16.msrb.mxu1 %v1013_v18 }
 0x17b   : > { %v992_v21 = vpop.permute.xlu0 %991  ;;  %v1110_v30 = vpop.permute.xlu2 %1109 }
 0x17c   : > { %v1012_v22 = vsel %vm1009_vm6, %v992_v21, %v994_v16  ;;  %v509_v26 = vpop.f32.mrf.mxu2  ;;  %v1770_v21 = vld [vmem:[%s2550_s1 + $0x70] sm:$0xff] }
 0x17d   : > { %1038 = vmatpush.bf16.msrb.mxu0 %v1012_v22  ;;  %1684 = vmatmul.msk.bf16.gmra.mxu3 %vm431_vm2, %v1767_v19  ;;  %v510_v32 = vadd.f32 %v509_v26, %v447_v13  ;;  %v1916_v26 = vmov 0  }
 0x17e   : > { %1847 = vset.pattern.permute.xlu0 %v1916_v26  ;;  %1848 = vset.pattern.permute.xlu1 %v1916_v26 }
 0x17f   : > { %1849 = vset.pattern.permute.xlu2 %v1916_v26 }
 0x180   : > { %1682 = vmatmul.msk.bf16.gmra.mxu2 %vm431_vm2, %v1767_v19  ;;  %v988_v25 = vpop.permute.xlu1 %987  ;;  %v530_v41 = vpop.f32.mrf.mxu3 }
 0x181   : > { %v1011_v27 = vsel %vm1009_vm6, %v988_v25, %v990_v6  ;;  %v531_v43 = vadd.f32 %v530_v41, %v468_v24 }
 0x182   : > { %1058 = vmatpush.bf16.msrb.mxu1 %v1011_v27  ;;  %v628_v33 = vpop.f32.mrf.mxu1 }
 0x183   : > { %v986_v31 = vpop.permute.xlu0 %985  ;;  %v609_v35 = vpop.f32.mrf.mxu0  ;;  %v2406_v36 = vadd.f32 %v628_v33, %v529_v37 }
 0x184   : > { %v1010_v48 = vsel %vm1009_vm6, %v986_v31, %v988_v25  ;;  %v2404_v34 = vadd.f32 %v609_v35, %v510_v32  ;;  %v511_v39 = vpop.f32.mrf.mxu2  ;;  %v1104_v44 = vpop.permute.xlu2 %1103  ;;  %v1294_v25 = vld [vmem:[%s2551_s2] sm:$0xff]  ;;  %v1295_v32 = vld [vmem:[%s2551_s2 + $0x8] sm:$0xff]  ;;  %v1771_v35 = vld [vmem:[%s2550_s1 + $0x78] sm:$0xff] }
 0x185   : > { %1039 = vmatpush.bf16.msrb.mxu0 %v1010_v48  ;;  %1699 = vmatmul.msk.bf16.vlgmr.msrb.gmra.mxu1 %vm431_vm2, %v1768_v28  ;;  %v512_v45 = vadd.f32 %v511_v39, %v449_v23 }
 0x186   : > { %1300 = vperm.xlu0 %1847, %v1294_v25   ;;  %1305 = vperm.xlu1 %1848, %v1295_v32  }
 0x188   : > { %1697 = vmatmul.msk.bf16.vlgmr.msrb.gmra.mxu0 %vm431_vm2, %v1768_v28  ;;  %v1114_v38 = vpop.permute.xlu1 %1113  ;;  %v533_v2 = vpop.f32.mrf.mxu3 }
 0x189   : > { %v1125_v40 = vsel %vm1117_vm7, %v1114_v38, %v1116_v15  ;;  %v534_v55 = vadd.f32 %v533_v2, %v2384_v10 }
 0x18a   : > { %1163 = vmatpush.bf16.msra.mxu3 %v1125_v40  ;;  %v630_v54 = vpop.f32.mrf.mxu1  ;;  %v1297_v40 = vld [vmem:[%s2551_s2 + $0x18] sm:$0xff] }
 0x18b   : > { %v1112_v42 = vpop.permute.xlu0 %1111  ;;  %v611_v46 = vpop.f32.mrf.mxu0  ;;  %v2413_v47 = vadd.f32 %v630_v54, %v531_v43 }
 0x18c   : > { %v1124_v49 = vsel %vm1117_vm7, %v1112_v42, %v1114_v38  ;;  %v2411_v57 = vadd.f32 %v611_v46, %v512_v45  ;;  %v514_v50 = vpop.f32.mrf.mxu2  ;;  %v1224_v60 = vpop.permute.xlu2 %1223  ;;  %v1772_v45 = vld [vmem:[%s2550_s1 + $0x80] sm:$0xff]  ;;  %v1296_v46 = vld [vmem:[%s2551_s2 + $0x10] sm:$0xff] }
 0x18d   : > { %1144 = vmatpush.bf16.msra.mxu2 %v1124_v49  ;;  %v515_v53 = vadd.f32 %v514_v50, %v2381_v8  ;;  %1310 = vperm.xlu2 %1849, %v1296_v46  }
 0x18e   : > { %1315 = vperm.xlu1 %1848, %v1297_v40  }
 0x190   : > { %v1108_v58 = vpop.permute.xlu1 %1107  ;;  %v535_v5 = vpop.f32.mrf.mxu3 }
 0x191   : > { %v1123_v51 = vsel %vm1117_vm7, %v1108_v58, %v1110_v30  ;;  %v536_v8 = vadd.f32 %v535_v5, %v2393_v20 }
 0x192   : > { %1164 = vmatpush.bf16.msra.mxu3 %v1123_v51  ;;  %v633_v59 = vpop.f32.mrf.mxu1 }
 0x193   : > { %v1106_v52 = vpop.permute.xlu0 %1105  ;;  %v614_v56 = vpop.f32.mrf.mxu0  ;;  %v2425_v62 = vadd.f32 %v633_v59, %v534_v55 }
 0x194   : > { %v1122_v3 = vsel %vm1117_vm7, %v1106_v52, %v1108_v58  ;;  %v2423_v61 = vadd.f32 %v614_v56, %v515_v53  ;;  %v516_v4 = vpop.f32.mrf.mxu2  ;;  %v1098_v15 = vpop.permute.xlu2 %1097 }
 0x195   : > { %1145 = vmatpush.bf16.msra.mxu2 %v1122_v3  ;;  %1700 = vmatmul.msk.bf16.gmra.mxu1 %vm431_vm2, %v1769_v63  ;;  %v517_v7 = vadd.f32 %v516_v4, %v2387_v17 }
 0x198   : > { %1698 = vmatmul.msk.bf16.gmra.mxu0 %vm431_vm2, %v1769_v63  ;;  %v1102_v0 = vpop.permute.xlu1 %1101 }
 0x199   : > { %v1121_v1 = vsel %vm1117_vm7, %v1102_v0, %v1104_v44  ;;  %v1773_v44 = vld [vmem:[%s2550_s1 + $0x88] sm:$0xff] }
 0x19a   : > { %1165 = vmatpush.bf16.msra.mxu3 %v1121_v1  ;;  %v635_v11 = vpop.f32.mrf.mxu1 }
 0x19b   : > { %v1100_v6 = vpop.permute.xlu0 %1099  ;;  %v616_v10 = vpop.f32.mrf.mxu0  ;;  %v2434_v13 = vadd.f32 %v635_v11, %v536_v8 }
 0x19c   : > { %v1120_v9 = vsel %vm1117_vm7, %v1100_v6, %v1102_v0  ;;  %v2432_v12 = vadd.f32 %v616_v10, %v517_v7  ;;  %v1218_v22 = vpop.permute.xlu2 %1217 }
 0x19d   : > { %1146 = vmatpush.bf16.msra.mxu2 %v1120_v9 }
 0x1a0   : > { %v1222_v14 = vpop.permute.xlu1 %1221 }
 0x1a1   : > { %v1233_v16 = vsel %vm1225_vm8, %v1222_v14, %v1224_v60 }
 0x1a2   : > { %1271 = vmatpush.bf16.msra.mxu1 %v1233_v16 }
 0x1a3   : > { %v1220_v18 = vpop.permute.xlu0 %1219 }
 0x1a4   : > { %v1232_v17 = vsel %vm1225_vm8, %v1220_v18, %v1222_v14  ;;  %v1212_v31 = vpop.permute.xlu2 %1211 }
 0x1a5   : > { %1252 = vmatpush.bf16.msra.mxu0 %v1232_v17 }
 0x1a8   : > { %v1096_v19 = vpop.permute.xlu1 %1095 }
 0x1a9   : > { %v1119_v20 = vsel %vm1117_vm7, %v1096_v19, %v1098_v15 }
 0x1aa   : > { %1166 = vmatpush.bf16.msra.mxu3 %v1119_v20 }
 0x1ab   : > { %v1094_v23 = vpop.permute.xlu0 %1093 }
 0x1ac   : > { %v1118_v24 = vsel %vm1117_vm7, %v1094_v23, %v1096_v19  ;;  %v1206_v39 = vpop.permute.xlu2 %1205 }
 0x1ad   : > { %1147 = vmatpush.bf16.msra.mxu2 %v1118_v24  ;;  %1715 = vmatmul.msk.bf16.vlgmr.msra.gmra.mxu3 %vm431_vm2, %v1770_v21 }
 0x1b0   : > { %1713 = vmatmul.msk.bf16.vlgmr.msra.gmra.mxu2 %vm431_vm2, %v1770_v21  ;;  %v1216_v27 = vpop.permute.xlu1 %1215  ;;  %v736_v54 = vpop.f32.mrf.mxu3 }
 0x1b1   : > { %v1231_v28 = vsel %vm1225_vm8, %v1216_v27, %v1218_v22  ;;  %v717_v58 = vpop.f32.mrf.mxu2  ;;  %v747_v21 = vadd.f32 %v736_v54, %v2406_v36 }
 0x1b2   : > { %1272 = vmatpush.bf16.msra.mxu1 %v1231_v28  ;;  %v746_v23 = vadd.f32 %v717_v58, %v2404_v34 }
 0x1b3   : > { %v1214_v29 = vpop.permute.xlu0 %1213 }
 0x1b4   : > { %v1230_v30 = vsel %vm1225_vm8, %v1214_v29, %v1216_v27 }
 0x1b5   : > { %1253 = vmatpush.bf16.msra.mxu0 %v1230_v30 }
 0x1b8   : > { %v1210_v48 = vpop.permute.xlu1 %1209  ;;  %v738_v51 = vpop.f32.mrf.mxu3 }
 0x1b9   : > { %v1229_v37 = vsel %vm1225_vm8, %v1210_v48, %v1212_v31  ;;  %v719_v2 = vpop.f32.mrf.mxu2  ;;  %v749_v30 = vadd.f32 %v738_v51, %v2413_v47 }
 0x1ba   : > { %1273 = vmatpush.bf16.msra.mxu1 %v1229_v37 }
 0x1bb   : > { %v1208_v33 = vpop.permute.xlu0 %1207 }
 0x1bc   : > { %v1228_v38 = vsel %vm1225_vm8, %v1208_v33, %v1210_v48 }
 0x1bd   : > { %1254 = vmatpush.bf16.msra.mxu0 %v1228_v38  ;;  %1716 = vmatmul.msk.bf16.gmra.mxu3 %vm431_vm2, %v1771_v35 }
 0x1c0   : > { %1714 = vmatmul.msk.bf16.gmra.mxu2 %vm431_vm2, %v1771_v35  ;;  %v1204_v41 = vpop.permute.xlu1 %1203  ;;  %v741_v53 = vpop.f32.mrf.mxu3  ;;  %v748_v35 = vadd.f32 %v719_v2, %v2411_v57 }
 0x1c1   : > { %v1227_v42 = vsel %vm1225_vm8, %v1204_v41, %v1206_v39  ;;  %v722_v3 = vpop.f32.mrf.mxu2  ;;  %v751_v47 = vadd.f32 %v741_v53, %v2425_v62 }
 0x1c2   : > { %1274 = vmatpush.bf16.msra.mxu1 %v1227_v42  ;;  %v844_v50 = vpop.f32.mrf.mxu1  ;;  %v750_v51 = vadd.f32 %v722_v3, %v2423_v61 }
 0x1c3   : > { %v1202_v43 = vpop.permute.xlu0 %1201  ;;  %v825_v63 = vpop.f32.mrf.mxu0  ;;  %v855_v25 = vadd.f32 %v844_v50, %v747_v21 }
 0x1c4   : > { %v1226_v49 = vsel %vm1225_vm8, %v1202_v43, %v1204_v41  ;;  %v854_v29 = vadd.f32 %v825_v63, %v746_v23 }
 0x1c5   : > { %1255 = vmatpush.bf16.msra.mxu0 %v1226_v49  ;;  %1731 = vmatmul.msk.bf16.vlgmr.msra.gmra.mxu1 %vm431_vm2, %v1772_v45 }
 0x1c8   : > { %1729 = vmatmul.msk.bf16.vlgmr.msra.gmra.mxu0 %vm431_vm2, %v1772_v45  ;;  %v2478_v59 = vpop.f32.mrf.mxu3 }
 0x1c9   : > { %v2482_v0 = vpop.f32.mrf.mxu2 }
 0x1ca   : > { %v846_v52 = vpop.f32.mrf.mxu1 }
 0x1cb   : > { %v827_v55 = vpop.f32.mrf.mxu0  ;;  %v857_v34 = vadd.f32 %v846_v52, %v749_v30 }
 0x1cc   : > { %v856_v49 = vadd.f32 %v827_v55, %v748_v35 }
 0x1d2   : > { %v849_v56 = vpop.f32.mrf.mxu1 }
 0x1d3   : > { %v2480_v60 = vpop.f32.mrf.mxu0 }
 0x1d4   : > { %v858_v53 = vadd.f32 %v2480_v60, %v750_v51  ;;  %v752_v60 = vadd.f32 %v2482_v0, %v2432_v12 }
 0x1d5   : > { %1732 = vmatmul.msk.bf16.gmra.mxu1 %vm431_vm2, %v1773_v44 }
 0x1d8   : > { %1730 = vmatmul.msk.bf16.gmra.mxu0 %vm431_vm2, %v1773_v44 }
 0x1da   : > { %v2484_v4 = vpop.f32.mrf.mxu1 }
 0x1db   : > { %v2486_v6 = vpop.f32.mrf.mxu0 }
 0x1f0   : > { %v952_v1 = vpop.f32.mrf.mxu3 }
 0x1f1   : > { %v963_v27 = vadd.f32 %v952_v1, %v855_v25 }
 0x1f3   : > { %v933_v5 = vpop.f32.mrf.mxu2 }
 0x1f4   : > { %v962_v48 = vadd.f32 %v933_v5, %v854_v29  ;;  %v859_v5 = vadd.f32 %v849_v56, %v751_v47 }
 0x1f8   : > { %v954_v7 = vpop.f32.mrf.mxu3  ;;  %v1301_v37 = vpop.permute.xlu0 %1300 }
 0x1f9   : > { %v965_v41 = vadd.f32 %v954_v7, %v857_v34  ;;  %v1306_v1 = vpop.permute.xlu1 %1305 }
 0x1fb   : > { %v935_v9 = vpop.f32.mrf.mxu2 }
 0x1fc   : > { %v964_v54 = vadd.f32 %v935_v9, %v856_v49 }
 0x200   : > { %v957_v11 = vpop.f32.mrf.mxu3 }
 0x201   : > { %v967_v21 = vadd.f32 %v957_v11, %v859_v5  ;;  %v1311_v11 = vpop.permute.xlu2 %1310 }
 0x202   : > { %v1060_v8 = vpop.f32.mrf.mxu1 }
 0x203   : > { %v938_v15 = vpop.f32.mrf.mxu2  ;;  %v1071_v31 = vadd.f32 %v1060_v8, %v963_v27 }
 0x204   : > { %v966_v25 = vadd.f32 %v938_v15, %v858_v53 }
 0x205   : > { %v1041_v10 = vpop.f32.mrf.mxu0 }
 0x206   : > { %v1070_v36 = vadd.f32 %v1041_v10, %v962_v48 }
 0x208   : > { %v2488_v18 = vpop.f32.mrf.mxu3 }
 0x20a   : > { %v1062_v14 = vpop.f32.mrf.mxu1 }
 0x20b   : > { %v2490_v19 = vpop.f32.mrf.mxu2  ;;  %v1073_v46 = vadd.f32 %v1062_v14, %v965_v41  ;;  %v1316_v41 = vpop.permute.xlu1 %1315 }
 0x20d   : > { %v1043_v16 = vpop.f32.mrf.mxu0 }
 0x20e   : > { %v1072_v63 = vadd.f32 %v1043_v16, %v964_v54  ;;  %v753_v16 = vadd.f32 %v2478_v59, %v2434_v13  ;;  %v860_v13 = vadd.f32 %v2486_v6, %v752_v60 }
 0x210   : > { %v861_v30 = vadd.f32 %v2484_v4, %v753_v16  ;;  %v968_v4 = vadd.f32 %v2490_v19, %v860_v13 }
 0x212   : > { %v1065_v17 = vpop.f32.mrf.mxu1  ;;  %v969_v15 = vadd.f32 %v2488_v18, %v861_v30 }
 0x213   : > { %v1075_v14 = vadd.f32 %v1065_v17, %v967_v21 }
 0x215   : > { %v1046_v20 = vpop.f32.mrf.mxu0 }
 0x21a   : > { %v2494_v24 = vpop.f32.mrf.mxu1 }
 0x21b   : > { %v1077_v35 = vadd.f32 %v2494_v24, %v969_v15 }
 0x21d   : > { %v2496_v28 = vpop.f32.mrf.mxu0 }
 0x21e   : > { %v1076_v0 = vadd.f32 %v2496_v28, %v968_v4 }
 0x230   : > { %v1168_v22 = vpop.f32.mrf.mxu3 }
 0x231   : > { %v1179_v32 = vadd.f32 %v1168_v22, %v1071_v31 }
 0x233   : > { %v1149_v26 = vpop.f32.mrf.mxu2 }
 0x234   : > { %v1178_v40 = vadd.f32 %v1149_v26, %v1070_v36  ;;  %v1074_v26 = vadd.f32 %v1046_v20, %v966_v25 }
 0x238   : > { %v1170_v33 = vpop.f32.mrf.mxu3 }
 0x239   : > { %v1181_v57 = vadd.f32 %v1170_v33, %v1073_v46 }
 0x23b   : > { %v1151_v42 = vpop.f32.mrf.mxu2 }
 0x23c   : > { %v1180_v8 = vadd.f32 %v1151_v42, %v1072_v63 }
 0x240   : > { %v1173_v10 = vpop.f32.mrf.mxu3 }
 0x241   : > { %v1183_v56 = vadd.f32 %v1173_v10, %v1075_v14 }
 0x242   : > { %v1276_v38 = vpop.f32.mrf.mxu1 }
 0x243   : > { %v1287_v39 = vadd.f32 %v1276_v38, %v1179_v32  ;;  %v1154_v23 = vpop.f32.mrf.mxu2 }
 0x244   : > { %v1182_v17 = vadd.f32 %v1154_v23, %v1074_v26 }
 0x245   : > { %v1257_v45 = vpop.f32.mrf.mxu0  ;;  %v1319_v43 = vadd.f32 %v1301_v37, %v1287_v39 }
 0x246   : > { %v1286_v44 = vadd.f32 %v1257_v45, %v1178_v40 }
 0x247   : > { %v1327_v50 = vmax.f32 %v1319_v43, 0.0 }
 0x248   : > { %v1318_v58 = vadd.f32 %v1301_v37, %v1286_v44  ;;  %v1175_v59 = vpop.f32.mrf.mxu3 }
 0x249   : > { %v1185_v12 = vadd.f32 %v1175_v59, %v1077_v35 }
 0x24a   : > { %v1326_v2 = vmax.f32 %v1318_v58, 0.0  ;;  %v1278_v52 = vpop.f32.mrf.mxu1 }
 0x24b   : > { %v1289_v7 = vadd.f32 %v1278_v52, %v1181_v57  ;;  %v1156_v38 = vpop.f32.mrf.mxu2 }
 0x24c   : > { %v1334_v55 = vpack.c.bf16 %v1327_v50, %v1326_v2  ;;  %v1184_v40 = vadd.f32 %v1156_v38, %v1076_v0 }
 0x24d   : > { %v1259_v22 = vpop.f32.mrf.mxu0  ;;  %v1321_v62 = vadd.f32 %v1306_v1, %v1289_v7 }
 0x24e   : > { %1338 = vst [vmem:[%s2007_s10] sm:$0xff] %v1334_v55  ;;  %v1288_v9 = vadd.f32 %v1259_v22, %v1180_v8 }
 0x24f   : > { %v1329_v3 = vmax.f32 %v1321_v62, 0.0 }
 0x250   : > { %v1320_v61 = vadd.f32 %v1306_v1, %v1288_v9 }
 0x252   : > { %v1328_v27 = vmax.f32 %v1320_v61, 0.0  ;;  %v1281_v29 = vpop.f32.mrf.mxu1 }
 0x253   : > { %v1291_v31 = vadd.f32 %v1281_v29, %v1183_v56 }
 0x254   : > { %v1335_v48 = vpack.c.bf16 %v1329_v3, %v1328_v27 }
 0x255   : > { %v1262_v32 = vpop.f32.mrf.mxu0  ;;  %v1323_v37 = vadd.f32 %v1311_v11, %v1291_v31  ;;  %v1388_v28 = vld [vmem:[%s2007_s10] sm:$0xff] (%p1983_p5) }
 0x256   : > { %1339 = vst [vmem:[%s2007_s10 + $0x8] sm:$0xff] %v1335_v48  ;;  %v1290_v20 = vadd.f32 %v1262_v32, %v1182_v17 }
 0x257   : > { %v1331_v33 = vmax.f32 %v1323_v37, 0.0  ;;  %1389 = vst [vmem:[%s1353_s28] sm:$0xff] (%p1983_p5), %v1388_v28 }
 0x258   : > { %v1322_v36 = vadd.f32 %v1311_v11, %v1290_v20 }
 0x25a   : > { %v1330_v18 = vmax.f32 %v1322_v36, 0.0  ;;  %v1283_v34 = vpop.f32.mrf.mxu1 }
 0x25b   : > { %v1293_v39 = vadd.f32 %v1283_v34, %v1185_v12 }
 0x25c   : > { %v1336_v6 = vpack.c.bf16 %v1331_v33, %v1330_v18 }
 0x25d   : > { %v1264_v42 = vpop.f32.mrf.mxu0  ;;  %v1325_v45 = vadd.f32 %v1316_v41, %v1293_v39  ;;  %v1390_v47 = vld [vmem:[%s2007_s10 + $0x8] sm:$0xff] (%p1983_p5) }
 0x25e   : > { %1340 = vst [vmem:[%s2007_s10 + $0x10] sm:$0xff] %v1336_v6  ;;  %v1292_v43 = vadd.f32 %v1264_v42, %v1184_v40 }
 0x25f   : > { %v1333_v49 = vmax.f32 %v1325_v45, 0.0  ;;  %1391 = vst [vmem:[%s1353_s28 + $0x10] sm:$0xff] (%p1983_p5), %v1390_v47 }
 0x260   : > { %v1324_v24 = vadd.f32 %v1316_v41, %v1292_v43 }
 0x262   : > { %v1332_v19 = vmax.f32 %v1324_v24, 0.0  ;;  %1348 = sbr.rel (!%p1983_p5) target bundleno = 623 (0x26f), region = 84 }
 0x264   : > { %v1337_v44 = vpack.c.bf16 %v1333_v49, %v1332_v19 }
 0x265   : > { %v1392_v46 = vld [vmem:[%s2007_s10 + $0x10] sm:$0xff] (%p1983_p5) }
 0x266   : > { %1341 = vst [vmem:[%s2007_s10 + $0x18] sm:$0xff] %v1337_v44 }
 0x267   : > { %1393 = vst [vmem:[%s1353_s28 + $0x20] sm:$0xff] %v1392_v46 }
 0x26d   : > { %v1394_v54 = vld [vmem:[%s2007_s10 + $0x18] sm:$0xff] }
 0x26e   : > { %1395 = vst [vmem:[%s1353_s28 + $0x30] sm:$0xff] %v1394_v54 }
 0x26f PF: > { %s13_s18 = sadd.s32 1, %s1906_s18   ;;  %s2554_s12 = smov %s1886_s13 }
 0x270   : > { %p10_p13 = scmp.ge.s32.totalorder %s13_s18, 6   ;;  %s2555_s13 = smov %s1994_s27 }
 0x271   : > { %s2556_s14 = smov %s1898_s16  ;;  %s2557_s15 = smov %s1902_s17 }
 0x272   : > { %s2558_s16 = smov %s2561_s19  ;;  %s2559_s17 = smov %s2565_s20 }
 0x273   :  { %12 = sbr.rel (!%p10_p13) target bundleno = 4 (0x4), region = 182 }
 0x278   :  { %1411 = vsyncmov [#allocation3] }
 0x27b   :  { %s1412_s23 = vpop.sfrf %1411 }
 0x27c   :  { %p1739_p0 = scmp.ne.s32.totalorder %s1412_s23, 0 }
 0x27e   :  { %1416 = shalt.err (%p1739_p0)  }
 0x27f   :  { %1418 = vsyncmov [#allocation3 + $0x1] }
 0x282   :  { %s1419_s10 = vpop.sfrf %1418 }
 0x283   :  { %p1740_p1 = scmp.ne.s32.totalorder %s1419_s10, 0 }
 0x285   :  { %1423 = shalt.err (%p1740_p1)  }

// kernel: generator_forward.11
= control target key start
LH: loop header
LB: loop body
LE: loop exit
PB: predicated region body
PF: predicated region fallthrough
CT: control target
= control target key end

     0   :  { %s1809_s15 = smov 0   ;;  %s1811_s16 = smov 0   ;;  %s2203_s0 = inlined_call_operand.vmem [shape: bf16[2,32,640], index: 0, kind: input, shape index: {}]   ;;  %s2204_s1 = inlined_call_operand.vmem [shape: bf16[9,32,32], index: 1, kind: input, shape index: {}]   ;;  %s2205_s2 = inlined_call_operand.vmem [shape: f32[1,512], index: 2, kind: input, shape index: {}]   ;;  %s2206_s3 = inlined_call_operand.vmem [shape: bf16[2,32,512], index: 3, kind: output, shape index: {0}]   ;;  %s2207_s4 = inlined_call_operand.vmem [shape: f32[2,2,32,2], index: 4, kind: output, shape index: {1}]  }
   0x1   :  { %s1813_s17 = smov 0   ;;  %s1815_s18 = smov 0  }
   0x2   :  { %s1817_s19 = smov 0   ;;  %s1819_s20 = smov 0  }
   0x3   :  { %s1821_s21 = smov 0  }
   0x4 LB: > { %2211 = sst [smem:[#allocation8_spill]] %s1770_s20  ;;  %s24_s22 = sadd.s32 1, %s1766_s19  ;;  %s1774_s21 = sphi %s1821_s21, %s15_s21   ;;  %s1770_s20 = sphi %s1819_s20, %s2217_s20   ;;  %s1766_s19 = sphi %s1817_s19, %s2221_s19   ;;  %s1762_s18 = sphi %s1815_s18, %s2215_s18   ;;  %s1758_s17 = sphi %s1813_s17, %s2220_s17   ;;  %s1754_s16 = sphi %s1811_s16, %s2219_s16   ;;  %s1750_s15 = sphi %s1809_s15, %s2218_s15  }
   0x5   : > { %p25_p0 = scmp.ge.s32.totalorder %s24_s22, 2  ;;  %s27_s23 = sadd.s32 1, %s1770_s20 }
   0x6   : > { %s1415_s24 = sadd.s32 4294967295, %s1774_s21   ;;  %p93_p1 = scmp.ne.s32.totalorder %s1754_s16, %s1750_s15 }
   0x7   : > { %s2223_s22 = smov (%p25_p0, %s24_s22), 0  ;;  %s2225_s23 = smov (!%p25_p0, %s27_s23), %s1770_s20 }
   0x8   : > { %2212 = sst [smem:[#allocation9_spill]] %s2223_s22  ;;  %s79_s25 = ssub.s32 %s1766_s19, %s2223_s22 }
   0x9   : > { %p94_p2 = scmp.eq.s32.totalorder %s1415_s24, 3  ;;  %p29_p3 = scmp.ge.s32.totalorder %s2225_s23, 2 }
   0xa   : > { %p1419_p4 = scmp.ge.s32.totalorder %s1774_s21, 1  ;;  %p157_p6 = scmp.lt.s32.totalorder %s1774_s21, 5 }
   0xb   : > { %p1855_p5 = por %p94_p2, %p93_p1  ;;  %s2227_s23 = smov (%p29_p3, %s2225_s23), 0 }
   0xc   : > { %2214 = sst [smem:[#allocation10_spill]] %s2227_s23  ;;  %p158_p7 = pnand %p1419_p4, %p157_p6 }
   0xd   : > { %s78_s27 = ssub.s32 %s1770_s20, %s2227_s23  ;;  %s83_s29 = sadd.s32 1, %s1754_s16 }
   0xe   : > { %s80_s28 = sor.u32 %s79_s25, %s78_s27  ;;  %161 = sbr.rel (%p158_p7) target bundleno = 613 (0x265), region = 28 }
   0xf   : > { %p81_p8 = scmp.eq.s32.totalorder %s80_s28, 0  ;;  %s174_s5 = sand.u32 (!%p158_p7), 1, %s1750_s15  }
  0x10   : > { %s1870_s6 = sshll.u32 (!%p158_p7), %s1758_s17, 1  ;;  %s1420_s7 = sshll.u32 (!%p158_p7), %s174_s5, 5 }
  0x11   : > { %s1866_s30 = scalar_select %p81_p8, %s1754_s16, %s83_s29  }
  0x12   : > { %p189_p9 = scmp.lt.s32.totalorder (!%p158_p7), %s1870_s6, 3  ;;  %p194_p10 = scmp.lt.s32.totalorder (!%p158_p7), %s1762_s18, 1 }
  0x13   : > { %p196_p11 = scmp.lt.s32.totalorder %s1758_s17, 1  ;;  %s1425_s14 = sshll.u32 %s1762_s18, 1 }
  0x14   : > { %s1875_s8 = scalar_select %p189_p9, %s1870_s6, 3 }
  0x15   : > { %s195_s9 = scalar_select %p194_p10, %s1762_s18, 1 }
  0x16   : > { %s191_s12 = scalar_lea.vmem %s2205_s2, %s1875_s8  ;;  %s1886_s15 = sadd.s32 %s1758_s17, %s1425_s14 }
  0x17   : > { %s1423_s13 = sshll.u32 %s195_s9, 3  ;;  %s1427_s25 = sshll.u32 %s1758_s17, 8 }
  0x18   : > { %s197_s24 = scalar_select %p196_p11, %s1758_s17, 1 }
  0x19   : > { %p206_p12 = scmp.lt.s32.totalorder %s1886_s15, 0  ;;  %s207_s29 = ssub.s32 0, %s1886_s15 }
  0x1a   : > { %s1422_s27 = sshll.u32 %s197_s24, 2  ;;  %s1426_s23 = smin.u32 %s207_s29, %s1886_s15 }
  0x1b   : > { %s200_s28 = sadd.s32 %s1423_s13, %s1422_s27  ;;  %s209_s9 = sand.u32 1, %s1426_s23  }
  0x1c   : > { %s1424_s5 = sshll.u32 %s200_s28, 3  ;;  %s210_s11 = ssub.s32 0, %s209_s9 }
  0x1d   : > { %s1895_s10 = scalar_lea.vmem %s2207_s4, %s1424_s5  ;;  %s2229_s11 = smov (!%p206_p12, %s210_s11), %s209_s9 }
  0x1e   : > { %s1899_s14 = scalar_lea.vmem [#allocation4], %s1420_s7  ;;  %p1428_p13 = scmp.ne.s32.totalorder %s1886_s15, 0 }
  0x1f   : > { %s217_s13 = sshra.s32 (!%p1428_p13), %s1427_s25, 7  ;;  %s219_s24 = smul.u32 (!%p1428_p13), 20, %s1762_s18 }
  0x20   : > { %216 = sbr.rel (%p1428_p13) target bundleno = 47 (0x2f), region = 32  ;;  %s226_s5 = scalar_lea.sflag (!%p1428_p13), [#allocation3], %s2229_s11 }
  0x21   : > { %s1623_s27 = smul.u32 (!%p1428_p13), 48, %s2229_s11  ;;  %s220_s28 = sadd.s32 (!%p1428_p13), %s219_s24, %s217_s13 }
  0x22   : > { %s1429_s20 = sshll.u32 (!%p1428_p13), %s220_s28, 2 }
  0x23   : > { %s222_s23 = scalar_lea.vmem (!%p1428_p13), %s2203_s0, %s1429_s20  ;;  %s225_s7 = scalar_lea.vmem (!%p1428_p13), [#allocation2], %s1623_s27 }
  0x25   : > { %v239_v0 = vld [vmem:[%s222_s23] sm:$0xff]  ;;  %v241_v1 = vld [vmem:[%s222_s23 + $0x14] sm:$0xff]  ;;  %v243_v2 = vld [vmem:[%s222_s23 + $0x28] sm:$0xff] }
  0x26   : > { %240 = vst [vmem:[%s225_s7] sm:$0xff] %v239_v0  ;;  %v245_v3 = vld [vmem:[%s222_s23 + $0x3c] sm:$0xff]  ;;  %v1431_v4 = vld [vmem:[%s222_s23 + $0x8] sm:$0xf]  ;;  %v1435_v6 = vld [vmem:[%s222_s23 + $0x30] sm:$0xf] }
  0x27   : > { %242 = vst [vmem:[%s225_s7 + $0xc] sm:$0xff] %v241_v1  ;;  %v1433_v5 = vld [vmem:[%s222_s23 + $0x1c] sm:$0xf]  ;;  %v1437_v7 = vld [vmem:[%s222_s23 + $0x44] sm:$0xf] }
  0x28   : > { %244 = vst [vmem:[%s225_s7 + $0x18] sm:$0xff] %v243_v2 }
  0x29   : > { %246 = vst [vmem:[%s225_s7 + $0x24] sm:$0xff] %v245_v3 }
  0x2a   : > { %1432 = vst [vmem:[%s225_s7 + $0x8] sm:$0xf] %v1431_v4 }
  0x2b   : > { %1434 = vst [vmem:[%s225_s7 + $0x14] sm:$0xf] %v1433_v5 }
  0x2c   : > { %1436 = vst [vmem:[%s225_s7 + $0x20] sm:$0xf] %v1435_v6 }
  0x2d   : > { %1438 = vst [vmem:[%s225_s7 + $0x2c] sm:$0xf] %v1437_v7 }
  0x2e   : > { %268 = vsyncadd %s226_s5, 768 }
  0x2f PF: > { %s269_s9 = sadd.s32 1, %s1886_s15 }
  0x30   : > { %p1439_p0 = scmp.ge.s32.totalorder %s269_s9, 4 }
  0x31   : > { %p274_p1 = scmp.eq.s32.totalorder (!%p1439_p0), %s1758_s17, 1  ;;  %s275_s13 = sadd.s32 (!%p1439_p0), 1, %s1762_s18 }
  0x32   : > { %273 = sbr.rel (%p1439_p0) target bundleno = 71 (0x47), region = 58  ;;  %s277_s24 = sadd.s32 (!%p1439_p0), 256, %s1427_s25 }
  0x33   : > { %s279_s27 = ssub.s32 (!%p1439_p0), 1, %s2229_s11 }
  0x34   : > { %s1624_s22 = smul.u32 (!%p1439_p0), 48, %s279_s27  ;;  %s289_s17 = scalar_lea.sflag (!%p1439_p0), [#allocation3], %s279_s27 }
  0x36   : > { %s288_s9 = scalar_lea.vmem (!%p1439_p0), [#allocation2], %s1624_s22 }
  0x37   : > { %s2231_s13 = smov (!%p274_p1, %s275_s13), %s1762_s18  ;;  %s2233_s24 = smov (%p274_p1, %s277_s24), 0 }
  0x38   : > { %s282_s28 = smul.u32 20, %s2231_s13  ;;  %s280_s20 = sshra.s32 %s2233_s24, 7 }
  0x3a   : > { %s283_s29 = sadd.s32 %s282_s28, %s280_s20 }
  0x3b   : > { %s1440_s23 = sshll.u32 %s283_s29, 2 }
  0x3c   : > { %s285_s5 = scalar_lea.vmem %s2203_s0, %s1440_s23 }
  0x3d   : > { %v302_v8 = vld [vmem:[%s285_s5] sm:$0xff]  ;;  %v304_v9 = vld [vmem:[%s285_s5 + $0x14] sm:$0xff]  ;;  %v306_v10 = vld [vmem:[%s285_s5 + $0x28] sm:$0xff] }
  0x3e   : > { %303 = vst [vmem:[%s288_s9] sm:$0xff] %v302_v8  ;;  %v308_v11 = vld [vmem:[%s285_s5 + $0x3c] sm:$0xff]  ;;  %v1442_v12 = vld [vmem:[%s285_s5 + $0x8] sm:$0xf]  ;;  %v1446_v14 = vld [vmem:[%s285_s5 + $0x30] sm:$0xf] }
  0x3f   : > { %305 = vst [vmem:[%s288_s9 + $0xc] sm:$0xff] %v304_v9  ;;  %v1444_v13 = vld [vmem:[%s285_s5 + $0x1c] sm:$0xf]  ;;  %v1448_v15 = vld [vmem:[%s285_s5 + $0x44] sm:$0xf] }
  0x40   : > { %307 = vst [vmem:[%s288_s9 + $0x18] sm:$0xff] %v306_v10 }
  0x41   : > { %309 = vst [vmem:[%s288_s9 + $0x24] sm:$0xff] %v308_v11 }
  0x42   : > { %1443 = vst [vmem:[%s288_s9 + $0x8] sm:$0xf] %v1442_v12 }
  0x43   : > { %1445 = vst [vmem:[%s288_s9 + $0x14] sm:$0xf] %v1444_v13 }
  0x44   : > { %1447 = vst [vmem:[%s288_s9 + $0x20] sm:$0xf] %v1446_v14 }
  0x45   : > { %1449 = vst [vmem:[%s288_s9 + $0x2c] sm:$0xf] %v1448_v15 }
  0x46   : > { %331 = vsyncadd %s289_s17, 768 }
  0x47 PF: > { %s1625_s25 = smul.u32 48, %s2229_s11  ;;  %s335_s24 = scalar_lea.sflag [#allocation3], %s2229_s11 }
  0x49   : > { %s334_s13 = scalar_lea.vmem [#allocation2], %s1625_s25 }
  0x4a   : > { %1746 = dma.done.wait %s335_s24, 768 }
  0x4b   : > { %1747 = vsyncadd %s335_s24, 4294966528  ;;  %s1776_s28 = smov 127   ;;  %s1777_s11 = smov 126   ;;  %vm405_vm0 = vcmask 1039360   ;;  %v1635_v46 = vld [vmem:[%s2204_s1 + $0x18] sm:$0xff]  ;;  %vm544_vm1 = vcmask 1031168  }
  0x4c   : > { %v1485_v16 = vld [vmem:[%s334_s13 + $0x20] sm:$0xf]  ;;  %v1633_v17 = vld [vmem:[%s334_s13 + $0x28] sm:$0xf0]  ;;  %v1477_v18 = vld [vmem:[%s334_s13 + $0x18] sm:$0xf] }
  0x4d   : > { %v1922_v19 = vor.u32 %v1633_v17, %v1485_v16  ;;  %v1629_v20 = vld [vmem:[%s334_s13 + $0x20] sm:$0xf0]  ;;  %v1467_v23 = vld [vmem:[%s334_s13 + $0xc] sm:$0xf0]  ;;  %v1465_v24 = vld [vmem:[%s334_s13] sm:$0xf] }
  0x4e   : > { %v1924_v21 = vor.u32 %v1629_v20, %v1477_v18  ;;  %v1626_v22 = vld [vmem:[%s334_s13 + $0x4] sm:$0xf]  ;;  %v1627_v25 = vld [vmem:[%s334_s13 + $0x8] sm:$0xf0]  ;;  %v1628_v27 = vld [vmem:[%s334_s13 + $0x1c] sm:$0xf] }
  0x4f   : > { %403 = vrot.lane.b32.xlu1 %v1922_v19, %s1776_s28  ;;  %v1928_v26 = vor.u32 %v1626_v22, %v1467_v23  ;;  %v1479_v28 = vld [vmem:[%s334_s13 + $0x24] sm:$0xf0]  ;;  %v1931_v29 = vor.u32 %v1627_v25, %v1465_v24  ;;  %v1632_v31 = vld [vmem:[%s334_s13 + $0x10] sm:$0xf0]  ;;  %s1778_s27 = smov 110   ;;  %s1779_s20 = smov 109  }
  0x50   : > { %399 = vrot.lane.b32.xlu0 %v1924_v21, %s1776_s28  ;;  %v1473_v30 = vld [vmem:[%s334_s13 + $0x8] sm:$0xf]  ;;  %v1933_v32 = vor.u32 %v1628_v27, %v1479_v28  ;;  %s1780_s22 = smov 108   ;;  %s1781_s29 = smov 92   ;;  %vm414_vm2 = vcmask 261120   ;;  %v1634_v49 = vld [vmem:[%s2204_s1 + $0x10] sm:$0xff] }
  0x51   : > { %395 = vrot.lane.b32.xlu2 %v1928_v26, %s1776_s28  ;;  %v1474_v33 = vor.u32 %v1632_v31, %v1473_v30  ;;  %s1782_s23 = smov 91   ;;  %s1783_s15 = smov 90   ;;  %vm632_vm3 = vcmask 900096   ;;  %v1630_v59 = vld [vmem:[%s2204_s1] sm:$0xff]  ;;  %vm720_vm4 = vcmask 891904   ;;  %v1631_v6 = vld [vmem:[%s2204_s1 + $0x8] sm:$0xff] }
  0x52   : > { %v1636_v61 = vld [vmem:[%s2204_s1 + $0x20] sm:$0xff]  ;;  %v1637_v8 = vld [vmem:[%s2204_s1 + $0x28] sm:$0xff]  ;;  %vm808_vm5 = vcmask 883712   ;;  %v1638_v18 = vld [vmem:[%s2204_s1 + $0x30] sm:$0xff]  ;;  %vm896_vm6 = vcmask 752640   ;;  %vm984_vm7 = vcmask 744448  }
  0x53   : > { %v1640_v20 = vld [vmem:[%s2204_s1 + $0x40] sm:$0xff]  ;;  %vm1072_vm8 = vcmask 736256   ;;  %vm1167_vm9 = vcmask 7168   ;;  %vm1192_vm10 = vcmask 15368   ;;  %s1617_s8 = sshll.u32 (%p1855_p5), %s1762_s18, 4 }
  0x57   : > { %393 = vrot.lane.b32.xlu1 %v1931_v29, %s1776_s28 }
  0x58   : > { %401 = vrot.lane.b32.xlu0 %v1933_v32, %s1776_s28 }
  0x59   : > { %397 = vrot.lane.b32.xlu2 %v1474_v33, %s1776_s28 }
  0x5f   : > { %540 = vrot.lane.b32.xlu1 %v1933_v32, %s1777_s11 }
  0x60   : > { %538 = vrot.lane.b32.xlu0 %v1924_v21, %s1777_s11 }
  0x61   : > { %542 = vrot.lane.b32.xlu2 %v1922_v19, %s1777_s11 }
  0x67   : > { %534 = vrot.lane.b32.xlu1 %v1928_v26, %s1777_s11 }
  0x68   : > { %532 = vrot.lane.b32.xlu0 %v1931_v29, %s1777_s11 }
  0x69   : > { %536 = vrot.lane.b32.xlu2 %v1474_v33, %s1777_s11 }
  0x6f   : > { %628 = vrot.lane.b32.xlu1 %v1933_v32, %s1778_s27 }
  0x70   : > { %626 = vrot.lane.b32.xlu0 %v1924_v21, %s1778_s27 }
  0x71   : > { %630 = vrot.lane.b32.xlu2 %v1922_v19, %s1778_s27 }
  0x77   : > { %622 = vrot.lane.b32.xlu1 %v1928_v26, %s1778_s27 }
  0x78   : > { %620 = vrot.lane.b32.xlu0 %v1931_v29, %s1778_s27 }
  0x79   : > { %624 = vrot.lane.b32.xlu2 %v1474_v33, %s1778_s27 }
  0x7f   : > { %716 = vrot.lane.b32.xlu1 %v1933_v32, %s1779_s20 }
  0x80   : > { %714 = vrot.lane.b32.xlu0 %v1924_v21, %s1779_s20 }
  0x81   : > { %718 = vrot.lane.b32.xlu2 %v1922_v19, %s1779_s20 }
  0x87   : > { %710 = vrot.lane.b32.xlu1 %v1928_v26, %s1779_s20 }
  0x88   : > { %708 = vrot.lane.b32.xlu0 %v1931_v29, %s1779_s20 }
  0x89   : > { %712 = vrot.lane.b32.xlu2 %v1474_v33, %s1779_s20 }
  0x8f   : > { %804 = vrot.lane.b32.xlu1 %v1933_v32, %s1780_s22 }
  0x90   : > { %802 = vrot.lane.b32.xlu0 %v1924_v21, %s1780_s22 }
  0x91   : > { %806 = vrot.lane.b32.xlu2 %v1922_v19, %s1780_s22 }
  0x97   : > { %798 = vrot.lane.b32.xlu1 %v1928_v26, %s1780_s22 }
  0x98   : > { %796 = vrot.lane.b32.xlu0 %v1931_v29, %s1780_s22 }
  0x99   : > { %800 = vrot.lane.b32.xlu2 %v1474_v33, %s1780_s22 }
  0x9f   : > { %892 = vrot.lane.b32.xlu1 %v1933_v32, %s1781_s29 }
  0xa0   : > { %890 = vrot.lane.b32.xlu0 %v1924_v21, %s1781_s29 }
  0xa1   : > { %894 = vrot.lane.b32.xlu2 %v1922_v19, %s1781_s29 }
  0xa7   : > { %886 = vrot.lane.b32.xlu1 %v1928_v26, %s1781_s29 }
  0xa8   : > { %884 = vrot.lane.b32.xlu0 %v1931_v29, %s1781_s29 }
  0xa9   : > { %888 = vrot.lane.b32.xlu2 %v1474_v33, %s1781_s29 }
  0xab   : > { %v396_v34 = vpop.permute.xlu2 %395 }
  0xaf   : > { %980 = vrot.lane.b32.xlu1 %v1933_v32, %s1782_s23 }
  0xb0   : > { %978 = vrot.lane.b32.xlu0 %v1924_v21, %s1782_s23 }
  0xb1   : > { %982 = vrot.lane.b32.xlu2 %v1922_v19, %s1782_s23 }
  0xb3   : > { %v398_v35 = vpop.permute.xlu2 %397 }
  0xb4   : > { %v407_v47 = vsel %vm405_vm0, %v396_v34, %v398_v35 }
  0xb7   : > { %974 = vrot.lane.b32.xlu1 %v1928_v26, %s1782_s23 }
  0xb8   : > { %972 = vrot.lane.b32.xlu0 %v1931_v29, %s1782_s23 }
  0xb9   : > { %976 = vrot.lane.b32.xlu2 %v1474_v33, %s1782_s23 }
  0xbb   : > { %v543_v36 = vpop.permute.xlu2 %542 }
  0xbf   : > { %1068 = vrot.lane.b32.xlu1 %v1933_v32, %s1783_s15 }
  0xc0   : > { %1066 = vrot.lane.b32.xlu0 %v1924_v21, %s1783_s15 }
  0xc1   : > { %v404_v37 = vpop.permute.xlu1 %403  ;;  %1070 = vrot.lane.b32.xlu2 %v1922_v19, %s1783_s15 }
  0xc2   : > { %v400_v38 = vpop.permute.xlu0 %399 }
  0xc3   : > { %v537_v39 = vpop.permute.xlu2 %536 }
  0xc7   : > { %1062 = vrot.lane.b32.xlu1 %v1928_v26, %s1783_s15 }
  0xc8   : > { %1060 = vrot.lane.b32.xlu0 %v1931_v29, %s1783_s15 }
  0xc9   : > { %v394_v40 = vpop.permute.xlu1 %393  ;;  %1064 = vrot.lane.b32.xlu2 %v1474_v33, %s1783_s15 }
  0xca   : > { %v402_v41 = vpop.permute.xlu0 %401  ;;  %v406_v45 = vsel %vm405_vm0, %v394_v40, %v396_v34 }
  0xcb   : > { %v408_v42 = vsel %vm405_vm0, %v400_v38, %v402_v41  ;;  %v409_v43 = vsel %vm405_vm0, %v402_v41, %v404_v37  ;;  %v631_v44 = vpop.permute.xlu2 %630  ;;  %v1642_v41 = vld [vmem:[%s2204_s1 + $0x50] sm:$0xff] }
  0xcc   : > { %427 = vmatpush.bf16.msra.mxu0 %v408_v42  ;;  %1650 = vmatpush.bf16.msra.mxu2 %v408_v42 }
  0xcd   : > { %446 = vmatpush.bf16.msra.mxu1 %v409_v43  ;;  %1652 = vmatpush.bf16.msra.mxu3 %v409_v43  ;;  %v1644_v43 = vld [vmem:[%s2204_s1 + $0x60] sm:$0xff] }
  0xd0   : > { %428 = vmatpush.bf16.msra.mxu0 %v406_v45  ;;  %1651 = vmatpush.bf16.msra.mxu2 %v406_v45 }
  0xd1   : > { %447 = vmatpush.bf16.msra.mxu1 %v407_v47  ;;  %1653 = vmatpush.bf16.msra.mxu3 %v407_v47  ;;  %v541_v48 = vpop.permute.xlu1 %540 }
  0xd2   : > { %v539_v50 = vpop.permute.xlu0 %538  ;;  %v548_v51 = vsel %vm544_vm1, %v541_v48, %v543_v36 }
  0xd3   : > { %1488 = vmatmul.msk.bf16.vlgmr.msra.gmra.mxu2 %vm414_vm2, %v1635_v46  ;;  %v547_v52 = vsel %vm544_vm1, %v539_v50, %v541_v48  ;;  %v625_v53 = vpop.permute.xlu2 %624  ;;  %1487 = vmatmul.msk.bf16.vlgmr.msra.gmra.mxu0 %vm414_vm2, %v1634_v49 }
  0xd4   : > { %485 = vmatpush.bf16.msrb.mxu2 %v1924_v21  ;;  %1490 = vmatmul.msk.bf16.vlgmr.msra.gmra.mxu3 %vm414_vm2, %v1635_v46 }
  0xd5   : > { %504 = vmatpush.bf16.msrb.mxu3 %v1933_v32  ;;  %584 = vmatpush.bf16.msrb.mxu1 %v548_v51  ;;  %v1641_v32 = vld [vmem:[%s2204_s1 + $0x48] sm:$0xff] }
  0xd6   : > { %565 = vmatpush.bf16.msrb.mxu0 %v547_v52  ;;  %1489 = vmatmul.msk.bf16.vlgmr.msra.gmra.mxu1 %vm414_vm2, %v1634_v49 }
  0xd8   : > { %486 = vmatpush.bf16.msrb.mxu2 %v1931_v29  ;;  %v1639_v29 = vld [vmem:[%s2204_s1 + $0x38] sm:$0xff] }
  0xd9   : > { %505 = vmatpush.bf16.msrb.mxu3 %v1928_v26  ;;  %v535_v54 = vpop.permute.xlu1 %534 }
  0xda   : > { %v533_v55 = vpop.permute.xlu0 %532  ;;  %v546_v56 = vsel %vm544_vm1, %v535_v54, %v537_v39 }
  0xdb   : > { %v545_v57 = vsel %vm544_vm1, %v533_v55, %v535_v54  ;;  %585 = vmatpush.bf16.msrb.mxu1 %v546_v56  ;;  %v719_v58 = vpop.permute.xlu2 %718  ;;  %v1645_v55 = vld [vmem:[%s2204_s1 + $0x68] sm:$0xff] }
  0xdc   : > { %566 = vmatpush.bf16.msrb.mxu0 %v545_v57 }
  0xe1   : > { %v629_v60 = vpop.permute.xlu1 %628 }
  0xe2   : > { %v627_v62 = vpop.permute.xlu0 %626  ;;  %v636_v63 = vsel %vm632_vm3, %v629_v60, %v631_v44 }
  0xe3   : > { %v635_v0 = vsel %vm632_vm3, %v627_v62, %v629_v60  ;;  %1499 = vmatmul.msk.bf16.vlgmr.msrb.gmra.mxu2 %vm414_vm2, %v1630_v59  ;;  %672 = vmatpush.bf16.msra.mxu3 %v636_v63  ;;  %v713_v1 = vpop.permute.xlu2 %712 }
  0xe4   : > { %1501 = vmatmul.msk.bf16.vlgmr.msrb.gmra.mxu3 %vm414_vm2, %v1630_v59  ;;  %653 = vmatpush.bf16.msra.mxu2 %v635_v0  ;;  %v1646_v0 = vld [vmem:[%s2204_s1 + $0x70] sm:$0xff] }
  0xe5   : > { %1515 = vmatmul.msk.bf16.vlgmr.msrb.gmra.mxu0 %vm414_vm2, %v1636_v61 }
  0xe6   : > { %1517 = vmatmul.msk.bf16.vlgmr.msrb.gmra.mxu1 %vm414_vm2, %v1636_v61 }
  0xe9   : > { %v623_v2 = vpop.permute.xlu1 %622 }
  0xea   : > { %v621_v3 = vpop.permute.xlu0 %620  ;;  %v634_v4 = vsel %vm632_vm3, %v623_v2, %v625_v53  ;;  %v1643_v53 = vld [vmem:[%s2204_s1 + $0x58] sm:$0xff] }
  0xeb   : > { %v633_v5 = vsel %vm632_vm3, %v621_v3, %v623_v2  ;;  %673 = vmatpush.bf16.msra.mxu3 %v634_v4  ;;  %v807_v9 = vpop.permute.xlu2 %806  ;;  %v1647_v2 = vld [vmem:[%s2204_s1 + $0x78] sm:$0xff]  ;;  %v1649_v3 = vld [vmem:[%s2204_s1 + $0x88] sm:$0xff] }
  0xec   : > { %654 = vmatpush.bf16.msra.mxu2 %v633_v5 }
  0xf1   : > { %v717_v7 = vpop.permute.xlu1 %716 }
  0xf2   : > { %v715_v10 = vpop.permute.xlu0 %714  ;;  %v724_v11 = vsel %vm720_vm4, %v717_v7, %v719_v58 }
  0xf3   : > { %v723_v12 = vsel %vm720_vm4, %v715_v10, %v717_v7  ;;  %1500 = vmatmul.msk.bf16.gmra.mxu2 %vm414_vm2, %v1631_v6  ;;  %760 = vmatpush.bf16.msra.mxu1 %v724_v11  ;;  %v801_v17 = vpop.permute.xlu2 %800 }
  0xf4   : > { %1502 = vmatmul.msk.bf16.gmra.mxu3 %vm414_vm2, %v1631_v6  ;;  %741 = vmatpush.bf16.msra.mxu0 %v723_v12 }
  0xf5   : > { %1516 = vmatmul.msk.bf16.gmra.mxu0 %vm414_vm2, %v1637_v8 }
  0xf6   : > { %1518 = vmatmul.msk.bf16.gmra.mxu1 %vm414_vm2, %v1637_v8 }
  0xf9   : > { %v711_v13 = vpop.permute.xlu1 %710 }
  0xfa   : > { %v709_v14 = vpop.permute.xlu0 %708  ;;  %v722_v15 = vsel %vm720_vm4, %v711_v13, %v713_v1  ;;  %v1648_v1 = vld [vmem:[%s2204_s1 + $0x80] sm:$0xff] }
  0xfb   : > { %v721_v16 = vsel %vm720_vm4, %v709_v14, %v711_v13  ;;  %761 = vmatpush.bf16.msra.mxu1 %v722_v15  ;;  %v895_v24 = vpop.permute.xlu2 %894 }
  0xfc   : > { %742 = vmatpush.bf16.msra.mxu0 %v721_v16 }
 0x101   : > { %v805_v19 = vpop.permute.xlu1 %804 }
 0x102   : > { %v803_v21 = vpop.permute.xlu0 %802  ;;  %v812_v22 = vsel %vm808_vm5, %v805_v19, %v807_v9 }
 0x103   : > { %v811_v23 = vsel %vm808_vm5, %v803_v21, %v805_v19  ;;  %1531 = vmatmul.msk.bf16.vlgmr.msra.gmra.mxu2 %vm414_vm2, %v1638_v18  ;;  %848 = vmatpush.bf16.msrb.mxu3 %v812_v22  ;;  %v889_v30 = vpop.permute.xlu2 %888 }
 0x104   : > { %1533 = vmatmul.msk.bf16.vlgmr.msra.gmra.mxu3 %vm414_vm2, %v1638_v18  ;;  %829 = vmatpush.bf16.msrb.mxu2 %v811_v23 }
 0x105   : > { %1547 = vmatmul.msk.bf16.vlgmr.msra.gmra.mxu0 %vm414_vm2, %v1640_v20 }
 0x106   : > { %1549 = vmatmul.msk.bf16.vlgmr.msra.gmra.mxu1 %vm414_vm2, %v1640_v20 }
 0x109   : > { %v799_v25 = vpop.permute.xlu1 %798 }
 0x10a   : > { %v797_v26 = vpop.permute.xlu0 %796  ;;  %v810_v27 = vsel %vm808_vm5, %v799_v25, %v801_v17 }
 0x10b   : > { %v809_v28 = vsel %vm808_vm5, %v797_v26, %v799_v25  ;;  %849 = vmatpush.bf16.msrb.mxu3 %v810_v27  ;;  %v983_v37 = vpop.permute.xlu2 %982 }
 0x10c   : > { %830 = vmatpush.bf16.msrb.mxu2 %v809_v28 }
 0x111   : > { %v893_v31 = vpop.permute.xlu1 %892 }
 0x112   : > { %v891_v33 = vpop.permute.xlu0 %890  ;;  %v900_v34 = vsel %vm896_vm6, %v893_v31, %v895_v24 }
 0x113   : > { %v899_v35 = vsel %vm896_vm6, %v891_v33, %v893_v31  ;;  %1532 = vmatmul.msk.bf16.gmra.mxu2 %vm414_vm2, %v1639_v29  ;;  %936 = vmatpush.bf16.msrb.mxu1 %v900_v34  ;;  %v977_v47 = vpop.permute.xlu2 %976 }
 0x114   : > { %1534 = vmatmul.msk.bf16.gmra.mxu3 %vm414_vm2, %v1639_v29  ;;  %917 = vmatpush.bf16.msrb.mxu0 %v899_v35 }
 0x115   : > { %1548 = vmatmul.msk.bf16.gmra.mxu0 %vm414_vm2, %v1641_v32 }
 0x116   : > { %1550 = vmatmul.msk.bf16.gmra.mxu1 %vm414_vm2, %v1641_v32 }
 0x119   : > { %v887_v36 = vpop.permute.xlu1 %886 }
 0x11a   : > { %v885_v38 = vpop.permute.xlu0 %884  ;;  %v898_v39 = vsel %vm896_vm6, %v887_v36, %v889_v30 }
 0x11b   : > { %v897_v40 = vsel %vm896_vm6, %v885_v38, %v887_v36  ;;  %937 = vmatpush.bf16.msrb.mxu1 %v898_v39  ;;  %v1071_v52 = vpop.permute.xlu2 %1070 }
 0x11c   : > { %918 = vmatpush.bf16.msrb.mxu0 %v897_v40 }
 0x121   : > { %v981_v42 = vpop.permute.xlu1 %980 }
 0x122   : > { %v979_v44 = vpop.permute.xlu0 %978  ;;  %v988_v45 = vsel %vm984_vm7, %v981_v42, %v983_v37 }
 0x123   : > { %v987_v46 = vsel %vm984_vm7, %v979_v44, %v981_v42  ;;  %1563 = vmatmul.msk.bf16.vlgmr.msrb.gmra.mxu2 %vm414_vm2, %v1642_v41  ;;  %1024 = vmatpush.bf16.msra.mxu3 %v988_v45  ;;  %v1065_v59 = vpop.permute.xlu2 %1064 }
 0x124   : > { %1565 = vmatmul.msk.bf16.vlgmr.msrb.gmra.mxu3 %vm414_vm2, %v1642_v41  ;;  %1005 = vmatpush.bf16.msra.mxu2 %v987_v46 }
 0x125   : > { %1579 = vmatmul.msk.bf16.vlgmr.msrb.gmra.mxu0 %vm414_vm2, %v1644_v43 }
 0x126   : > { %1581 = vmatmul.msk.bf16.vlgmr.msrb.gmra.mxu1 %vm414_vm2, %v1644_v43 }
 0x129   : > { %v975_v48 = vpop.permute.xlu1 %974 }
 0x12a   : > { %v973_v49 = vpop.permute.xlu0 %972  ;;  %v986_v50 = vsel %vm984_vm7, %v975_v48, %v977_v47 }
 0x12b   : > { %v985_v51 = vsel %vm984_vm7, %v973_v49, %v975_v48  ;;  %1025 = vmatpush.bf16.msra.mxu3 %v986_v50 }
 0x12c   : > { %1006 = vmatpush.bf16.msra.mxu2 %v985_v51 }
 0x131   : > { %v1069_v54 = vpop.permute.xlu1 %1068 }
 0x132   : > { %v1067_v56 = vpop.permute.xlu0 %1066  ;;  %v1076_v57 = vsel %vm1072_vm8, %v1069_v54, %v1071_v52 }
 0x133   : > { %v1075_v58 = vsel %vm1072_vm8, %v1067_v56, %v1069_v54  ;;  %1564 = vmatmul.msk.bf16.gmra.mxu2 %vm414_vm2, %v1643_v53  ;;  %1112 = vmatpush.bf16.msra.mxu1 %v1076_v57 }
 0x134   : > { %1566 = vmatmul.msk.bf16.gmra.mxu3 %vm414_vm2, %v1643_v53  ;;  %1093 = vmatpush.bf16.msra.mxu0 %v1075_v58 }
 0x135   : > { %1580 = vmatmul.msk.bf16.gmra.mxu0 %vm414_vm2, %v1645_v55 }
 0x136   : > { %1582 = vmatmul.msk.bf16.gmra.mxu1 %vm414_vm2, %v1645_v55 }
 0x139   : > { %v1063_v60 = vpop.permute.xlu1 %1062 }
 0x13a   : > { %v1061_v61 = vpop.permute.xlu0 %1060  ;;  %v1074_v62 = vsel %vm1072_vm8, %v1063_v60, %v1065_v59 }
 0x13b   : > { %v1073_v63 = vsel %vm1072_vm8, %v1061_v61, %v1063_v60  ;;  %1113 = vmatpush.bf16.msra.mxu1 %v1074_v62 }
 0x13c   : > { %1094 = vmatpush.bf16.msra.mxu0 %v1073_v63 }
 0x143   : > { %1595 = vmatmul.msk.bf16.vlgmr.msra.gmra.mxu2 %vm414_vm2, %v1646_v0 }
 0x144   : > { %1597 = vmatmul.msk.bf16.vlgmr.msra.gmra.mxu3 %vm414_vm2, %v1646_v0 }
 0x145   : > { %1611 = vmatmul.msk.bf16.vlgmr.msra.gmra.mxu0 %vm414_vm2, %v1648_v1 }
 0x146   : > { %1613 = vmatmul.msk.bf16.vlgmr.msra.gmra.mxu1 %vm414_vm2, %v1648_v1 }
 0x150   : > { %v430_v4 = vpop.f32.mrf.mxu0 }
 0x153   : > { %v449_v5 = vpop.f32.mrf.mxu1  ;;  %1596 = vmatmul.msk.bf16.gmra.mxu2 %vm414_vm2, %v1647_v2 }
 0x154   : > { %1598 = vmatmul.msk.bf16.gmra.mxu3 %vm414_vm2, %v1647_v2 }
 0x155   : > { %1612 = vmatmul.msk.bf16.gmra.mxu0 %vm414_vm2, %v1649_v3 }
 0x156   : > { %1614 = vmatmul.msk.bf16.gmra.mxu1 %vm414_vm2, %v1649_v3  ;;  %v435_v6 = vpop.f32.mrf.mxu2 }
 0x157   : > { %v454_v7 = vpop.f32.mrf.mxu3 }
 0x158   : > { %v432_v8 = vpop.f32.mrf.mxu0 }
 0x15b   : > { %v451_v9 = vpop.f32.mrf.mxu1 }
 0x15e   : > { %v437_v10 = vpop.f32.mrf.mxu2 }
 0x15f   : > { %v456_v11 = vpop.f32.mrf.mxu3 }
 0x162   : > { %v568_v12 = vpop.f32.mrf.mxu0 }
 0x163   : > { %v587_v13 = vpop.f32.mrf.mxu1 }
 0x166   : > { %v488_v14 = vpop.f32.mrf.mxu2 }
 0x167   : > { %v489_v15 = vadd.f32 %v488_v14, %v430_v4  ;;  %v507_v16 = vpop.f32.mrf.mxu3 }
 0x168   : > { %v508_v17 = vadd.f32 %v507_v16, %v449_v5 }
 0x169   : > { %v597_v18 = vadd.f32 %v568_v12, %v489_v15 }
 0x16a   : > { %v598_v19 = vadd.f32 %v587_v13, %v508_v17  ;;  %v570_v20 = vpop.f32.mrf.mxu0 }
 0x16b   : > { %v589_v21 = vpop.f32.mrf.mxu1 }
 0x16e   : > { %v490_v22 = vpop.f32.mrf.mxu2 }
 0x16f   : > { %v491_v23 = vadd.f32 %v490_v22, %v432_v8  ;;  %v509_v24 = vpop.f32.mrf.mxu3 }
 0x170   : > { %v510_v25 = vadd.f32 %v509_v24, %v451_v9  ;;  %v1141_v24 = vld [vmem:[%s191_s12] sm:$0x3]  ;;  %s1215_s12 = sadd.s32 (%p1855_p5), %s1617_s8, %s1870_s6 }
 0x171   : > { %v599_v26 = vadd.f32 %v570_v20, %v491_v23  ;;  %s1618_s11 = sshll.u32 (%p1855_p5), %s1215_s12, 2 }
 0x172   : > { %v600_v27 = vadd.f32 %v589_v21, %v510_v25  ;;  %v573_v28 = vpop.f32.mrf.mxu0  ;;  %s1217_s22 = scalar_lea.vmem (%p1855_p5), %s2206_s3, %s1618_s11 }
 0x173   : > { %v592_v29 = vpop.f32.mrf.mxu1 }
 0x176   : > { %v493_v30 = vpop.f32.mrf.mxu2 }
 0x177   : > { %v494_v31 = vadd.f32 %v493_v30, %v435_v6  ;;  %v512_v32 = vpop.f32.mrf.mxu3 }
 0x178   : > { %v513_v33 = vadd.f32 %v512_v32, %v454_v7 }
 0x179   : > { %v2094_v34 = vadd.f32 %v573_v28, %v494_v31  ;;  %v2131_v31 = vperm.slane %v1141_v24, 0 }
 0x17a   : > { %v2096_v35 = vadd.f32 %v592_v29, %v513_v33  ;;  %v575_v36 = vpop.f32.mrf.mxu0 }
 0x17b   : > { %v594_v37 = vpop.f32.mrf.mxu1 }
 0x17e   : > { %v495_v38 = vpop.f32.mrf.mxu2 }
 0x17f   : > { %v496_v39 = vadd.f32 %v495_v38, %v437_v10  ;;  %v514_v40 = vpop.f32.mrf.mxu3 }
 0x180   : > { %v515_v41 = vadd.f32 %v514_v40, %v456_v11 }
 0x181   : > { %v2098_v42 = vadd.f32 %v575_v36, %v496_v39  ;;  %v2133_v36 = vperm.slane %v1141_v24, 1 }
 0x182   : > { %v2100_v43 = vadd.f32 %v594_v37, %v515_v41  ;;  %v744_v44 = vpop.f32.mrf.mxu0 }
 0x183   : > { %v763_v45 = vpop.f32.mrf.mxu1 }
 0x186   : > { %v656_v46 = vpop.f32.mrf.mxu2 }
 0x187   : > { %v675_v47 = vpop.f32.mrf.mxu3  ;;  %v685_v10 = vadd.f32 %v656_v46, %v597_v18 }
 0x188   : > { %v686_v11 = vadd.f32 %v675_v47, %v598_v19 }
 0x189   : > { %v773_v13 = vadd.f32 %v744_v44, %v685_v10 }
 0x18a   : > { %v746_v48 = vpop.f32.mrf.mxu0  ;;  %v774_v15 = vadd.f32 %v763_v45, %v686_v11 }
 0x18b   : > { %v765_v49 = vpop.f32.mrf.mxu1 }
 0x18e   : > { %v658_v50 = vpop.f32.mrf.mxu2 }
 0x18f   : > { %v677_v51 = vpop.f32.mrf.mxu3  ;;  %v687_v21 = vadd.f32 %v658_v50, %v599_v26 }
 0x190   : > { %v688_v23 = vadd.f32 %v677_v51, %v600_v27 }
 0x191   : > { %v775_v28 = vadd.f32 %v746_v48, %v687_v21 }
 0x192   : > { %v2102_v52 = vpop.f32.mrf.mxu0  ;;  %v776_v32 = vadd.f32 %v765_v49, %v688_v23 }
 0x193   : > { %v2104_v53 = vpop.f32.mrf.mxu1 }
 0x196   : > { %v661_v54 = vpop.f32.mrf.mxu2 }
 0x197   : > { %v680_v55 = vpop.f32.mrf.mxu3  ;;  %v689_v39 = vadd.f32 %v661_v54, %v2094_v34 }
 0x198   : > { %v690_v41 = vadd.f32 %v680_v55, %v2096_v35 }
 0x19a   : > { %v2106_v56 = vpop.f32.mrf.mxu0  ;;  %v778_v54 = vadd.f32 %v2104_v53, %v690_v41 }
 0x19b   : > { %v2108_v57 = vpop.f32.mrf.mxu1 }
 0x19e   : > { %v2110_v58 = vpop.f32.mrf.mxu2 }
 0x19f   : > { %v2112_v59 = vpop.f32.mrf.mxu3 }
 0x1a2   : > { %v920_v60 = vpop.f32.mrf.mxu0 }
 0x1a3   : > { %v939_v61 = vpop.f32.mrf.mxu1 }
 0x1a6   : > { %v832_v62 = vpop.f32.mrf.mxu2 }
 0x1a7   : > { %v851_v63 = vpop.f32.mrf.mxu3  ;;  %v861_v16 = vadd.f32 %v832_v62, %v773_v13  ;;  %v777_v62 = vadd.f32 %v2102_v52, %v689_v39  ;;  %v692_v52 = vadd.f32 %v2112_v59, %v2100_v43 }
 0x1a8   : > { %v862_v17 = vadd.f32 %v851_v63, %v774_v15 }
 0x1a9   : > { %v949_v25 = vadd.f32 %v920_v60, %v861_v16  ;;  %v780_v43 = vadd.f32 %v2108_v57, %v692_v52 }
 0x1aa   : > { %v922_v0 = vpop.f32.mrf.mxu0  ;;  %v950_v18 = vadd.f32 %v939_v61, %v862_v17 }
 0x1ab   : > { %v941_v1 = vpop.f32.mrf.mxu1 }
 0x1ae   : > { %v834_v2 = vpop.f32.mrf.mxu2 }
 0x1af   : > { %v853_v3 = vpop.f32.mrf.mxu3  ;;  %v863_v26 = vadd.f32 %v834_v2, %v775_v28 }
 0x1b0   : > { %v864_v37 = vadd.f32 %v853_v3, %v776_v32 }
 0x1b1   : > { %v951_v47 = vadd.f32 %v922_v0, %v863_v26 }
 0x1b2   : > { %v2114_v4 = vpop.f32.mrf.mxu0  ;;  %v952_v50 = vadd.f32 %v941_v1, %v864_v37  ;;  %v691_v1 = vadd.f32 %v2110_v58, %v2098_v42 }
 0x1b3   : > { %v2116_v5 = vpop.f32.mrf.mxu1 }
 0x1b4   : > { %v779_v42 = vadd.f32 %v2106_v56, %v691_v1 }
 0x1b6   : > { %v837_v6 = vpop.f32.mrf.mxu2 }
 0x1b7   : > { %v856_v7 = vpop.f32.mrf.mxu3  ;;  %v865_v2 = vadd.f32 %v837_v6, %v777_v62 }
 0x1b8   : > { %v866_v0 = vadd.f32 %v856_v7, %v778_v54 }
 0x1b9   : > { %v953_v53 = vadd.f32 %v2114_v4, %v865_v2 }
 0x1ba   : > { %v2118_v8 = vpop.f32.mrf.mxu0  ;;  %v954_v17 = vadd.f32 %v2116_v5, %v866_v0 }
 0x1bb   : > { %v2120_v9 = vpop.f32.mrf.mxu1 }
 0x1be   : > { %v2122_v12 = vpop.f32.mrf.mxu2 }
 0x1bf   : > { %v2124_v14 = vpop.f32.mrf.mxu3  ;;  %v867_v24 = vadd.f32 %v2122_v12, %v779_v42 }
 0x1c2   : > { %v1096_v20 = vpop.f32.mrf.mxu0 }
 0x1c3   : > { %v1115_v22 = vpop.f32.mrf.mxu1 }
 0x1c6   : > { %v1008_v19 = vpop.f32.mrf.mxu2 }
 0x1c7   : > { %v1037_v29 = vadd.f32 %v1008_v19, %v949_v25  ;;  %v1027_v30 = vpop.f32.mrf.mxu3  ;;  %v868_v25 = vadd.f32 %v2124_v14, %v780_v43 }
 0x1c8   : > { %v1038_v33 = vadd.f32 %v1027_v30, %v950_v18 }
 0x1c9   : > { %v1125_v27 = vadd.f32 %v1096_v20, %v1037_v29  ;;  %v955_v29 = vadd.f32 %v2118_v8, %v867_v24  ;;  %v956_v57 = vadd.f32 %v2120_v9, %v868_v25 }
 0x1ca   : > { %v1126_v38 = vadd.f32 %v1115_v22, %v1038_v33  ;;  %v1098_v46 = vpop.f32.mrf.mxu0 }
 0x1cb   : > { %v1147_v40 = vmul.f32 %v2131_v31, %v1125_v27  ;;  %v1117_v48 = vpop.f32.mrf.mxu1 }
 0x1cc   : > { %v1133_v44 = vpack.c.bf16 %v1126_v38, %v1125_v27  ;;  %v1148_v45 = vmul.f32 %v2133_v36, %v1126_v38 }
 0x1cd   : > { %v1172_v49 = vmul.f32 %v1147_v40, %v1125_v27 }
 0x1ce   : > { %1137 = vst [vmem:[%s1899_s14] sm:$0xff] %v1133_v44  ;;  %v1010_v51 = vpop.f32.mrf.mxu2  ;;  %v1155_v60 = vadd.f32 %v1148_v45, %v1147_v40  ;;  %v1173_v61 = vmul.f32 %v1148_v45, %v1126_v38 }
 0x1cf   : > { %v1039_v63 = vadd.f32 %v1010_v51, %v951_v47  ;;  %v1029_v34 = vpop.f32.mrf.mxu3 }
 0x1d0   : > { %v1040_v35 = vadd.f32 %v1029_v34, %v952_v50  ;;  %1156 = vadd.xlane.f32.xlu0 %v1155_v60  ;;  %v1180_v55 = vadd.f32 %v1173_v61, %v1172_v49 }
 0x1d1   : > { %v1127_v3 = vadd.f32 %v1098_v46, %v1039_v63 }
 0x1d2   : > { %v1128_v10 = vadd.f32 %v1117_v48, %v1040_v35  ;;  %v1101_v20 = vpop.f32.mrf.mxu0 }
 0x1d3   : > { %v1149_v11 = vmul.f32 %v2131_v31, %v1127_v3  ;;  %v1120_v23 = vpop.f32.mrf.mxu1 }
 0x1d4   : > { %v1134_v13 = vpack.c.bf16 %v1128_v10, %v1127_v3  ;;  %v1150_v15 = vmul.f32 %v2133_v36, %v1128_v10 }
 0x1d5   : > { %v1174_v16 = vmul.f32 %v1149_v11, %v1127_v3  ;;  %v1252_v63 = vld [vmem:[%s1899_s14] sm:$0xff] (%p1855_p5) }
 0x1d6   : > { %1138 = vst [vmem:[%s1899_s14 + $0x8] sm:$0xff] %v1134_v13  ;;  %v1013_v6 = vpop.f32.mrf.mxu2  ;;  %v1158_v7 = vadd.f32 %v1150_v15, %v1149_v11  ;;  %v1175_v21 = vmul.f32 %v1150_v15, %v1128_v10 }
 0x1d7   : > { %v1041_v58 = vadd.f32 %v1013_v6, %v953_v53  ;;  %v1032_v22 = vpop.f32.mrf.mxu3  ;;  %1253 = vst [vmem:[%s1217_s22] sm:$0xff] (%p1855_p5), %v1252_v63 }
 0x1d8   : > { %v1042_v59 = vadd.f32 %v1032_v22, %v954_v17  ;;  %1181 = vadd.xlane.f32.xlu0 %v1180_v55  ;;  %1159 = vadd.xlane.f32.xlu1 %v1158_v7  ;;  %v1183_v4 = vadd.f32 %v1175_v21, %v1174_v16 }
 0x1d9   : > { %v1129_v5 = vadd.f32 %v1101_v20, %v1041_v58 }
 0x1da   : > { %v1130_v18 = vadd.f32 %v1120_v23, %v1042_v59  ;;  %v1103_v14 = vpop.f32.mrf.mxu0 }
 0x1db   : > { %v1151_v19 = vmul.f32 %v2131_v31, %v1129_v5  ;;  %v1122_v40 = vpop.f32.mrf.mxu1 }
 0x1dc   : > { %v1135_v28 = vpack.c.bf16 %v1130_v18, %v1129_v5  ;;  %v1152_v56 = vmul.f32 %v2133_v36, %v1130_v18 }
 0x1dd   : > { %v1176_v30 = vmul.f32 %v1151_v19, %v1129_v5  ;;  %v1254_v34 = vld [vmem:[%s1899_s14 + $0x8] sm:$0xff] (%p1855_p5) }
 0x1de   : > { %1139 = vst [vmem:[%s1899_s14 + $0x10] sm:$0xff] %v1135_v28  ;;  %v1015_v32 = vpop.f32.mrf.mxu2  ;;  %v1161_v33 = vadd.f32 %v1152_v56, %v1151_v19  ;;  %v1177_v26 = vmul.f32 %v1152_v56, %v1130_v18 }
 0x1df   : > { %v1043_v12 = vadd.f32 %v1015_v32, %v955_v29  ;;  %v1034_v27 = vpop.f32.mrf.mxu3  ;;  %1255 = vst [vmem:[%s1217_s22 + $0x10] sm:$0xff] (%p1855_p5), %v1254_v34 }
 0x1e0   : > { %v1044_v37 = vadd.f32 %v1034_v27, %v956_v57  ;;  %1184 = vadd.xlane.f32.xlu1 %v1183_v4  ;;  %1162 = vadd.xlane.f32.xlu2 %v1161_v33  ;;  %v1186_v38 = vadd.f32 %v1177_v26, %v1176_v30 }
 0x1e1   : > { %v1131_v39 = vadd.f32 %v1103_v14, %v1043_v12 }
 0x1e2   : > { %v1132_v41 = vadd.f32 %v1122_v40, %v1044_v37 }
 0x1e3   : > { %v1153_v8 = vmul.f32 %v2131_v31, %v1131_v39 }
 0x1e4   : > { %v1136_v44 = vpack.c.bf16 %v1132_v41, %v1131_v39  ;;  %v1154_v9 = vmul.f32 %v2133_v36, %v1132_v41 }
 0x1e5   : > { %v1178_v45 = vmul.f32 %v1153_v8, %v1131_v39  ;;  %v1256_v54 = vld [vmem:[%s1899_s14 + $0x10] sm:$0xff] (%p1855_p5) }
 0x1e6   : > { %1140 = vst [vmem:[%s1899_s14 + $0x18] sm:$0xff] %v1136_v44  ;;  %v1164_v46 = vadd.f32 %v1154_v9, %v1153_v8  ;;  %v1179_v47 = vmul.f32 %v1154_v9, %v1132_v41 }
 0x1e7   : > { %1257 = vst [vmem:[%s1217_s22 + $0x20] sm:$0xff] (%p1855_p5), %v1256_v54 }
 0x1e8   : > { %1165 = vadd.xlane.f32.xlu2 %v1164_v46  ;;  %v1189_v48 = vadd.f32 %v1179_v47, %v1178_v45 }
 0x1ea   : > { %1190 = vadd.xlane.f32.xlu0 %v1189_v48 }
 0x1ed   : > { %v1258_v35 = vld [vmem:[%s1899_s14 + $0x18] sm:$0xff] (%p1855_p5) }
 0x1ee   : > { %1259 = vst [vmem:[%s1217_s22 + $0x30] sm:$0xff] (%p1855_p5), %v1258_v35 }
 0x1f0   : > { %1187 = vadd.xlane.f32.xlu2 %v1186_v38 }
 0x243   : > { %v1157_v49 = vpop.xlane.xlu0 %1156 }
 0x244   : > { %1168 = vst.msk [vmem:[%s1895_s10] sm:$0xff] %vm1167_vm9, %v1157_v49 }
 0x24b   : > { %v1182_v31 = vpop.xlane.xlu0 %1181  ;;  %v1160_v36 = vpop.xlane.xlu1 %1159 }
 0x24c   : > { %1193 = vst.msk [vmem:[%s1895_s10] sm:$0xff] %vm1192_vm10, %v1182_v31 }
 0x24d   : > { %1169 = vst.msk [vmem:[%s1895_s10 + $0x8] sm:$0xff] %vm1167_vm9, %v1160_v36 }
 0x253   : > { %v1185_v50 = vpop.xlane.xlu1 %1184  ;;  %v1163_v51 = vpop.xlane.xlu2 %1162 }
 0x254   : > { %1194 = vst.msk [vmem:[%s1895_s10 + $0x8] sm:$0xff] %vm1192_vm10, %v1185_v50 }
 0x255   : > { %1170 = vst.msk [vmem:[%s1895_s10 + $0x10] sm:$0xff] %vm1167_vm9, %v1163_v51 }
 0x25b   : > { %v1166_v60 = vpop.xlane.xlu2 %1165 }
 0x25c   : > { %1171 = vst.msk [vmem:[%s1895_s10 + $0x18] sm:$0xff] %vm1167_vm9, %v1166_v60 }
 0x25d   : > { %v1191_v61 = vpop.xlane.xlu0 %1190 }
 0x25e   : > { %1196 = vst.msk [vmem:[%s1895_s10 + $0x18] sm:$0xff] %vm1192_vm10, %v1191_v61 }
 0x260   : > { %1212 = sbr.rel (!%p1855_p5) target bundleno = 613 (0x265), region = 84 }
 0x263   : > { %v1188_v62 = vpop.xlane.xlu2 %1187 }
 0x264   : > { %1195 = vst.msk [vmem:[%s1895_s10 + $0x10] sm:$0xff] %vm1192_vm10, %v1188_v62 }
 0x265 PF: > { %s15_s21 = sadd.s32 1, %s1774_s21   ;;  %s2215_s18 = sld [smem:[#allocation8_spill]] }
 0x266   : > { %p12_p2 = scmp.ge.s32.totalorder %s15_s21, 6   ;;  %s2216_s26 = sld [smem:[#allocation9_spill]] }
 0x267   : > { %s2217_s20 = sld [smem:[#allocation10_spill]]  ;;  %s2218_s15 = smov %s1754_s16 }
 0x268   : > { %s2219_s16 = smov %s1866_s30  ;;  %s2220_s17 = smov %s1766_s19 }
 0x269   :  { %14 = sbr.rel (!%p12_p2) target bundleno = 4 (0x4), region = 197 }
 0x26c   : > { %s2221_s19 = smov %s2216_s26 }
 0x26e   :  { %1290 = vsyncmov [#allocation3] }
 0x271   :  { %s1291_s6 = vpop.sfrf %1290 }
 0x272   :  { %p1621_p3 = scmp.ne.s32.totalorder %s1291_s6, 0 }
 0x274   :  { %1295 = shalt.err (%p1621_p3)  }
 0x275   :  { %1297 = vsyncmov [#allocation3 + $0x1] }
 0x278   :  { %s1298_s10 = vpop.sfrf %1297 }
 0x279   :  { %p1622_p4 = scmp.ne.s32.totalorder %s1298_s10, 0 }
 0x27b   :  { %1302 = shalt.err (%p1622_p4)  }

// kernel: generator_forward.12
= control target key start
LH: loop header
LB: loop body
LE: loop exit
PB: predicated region body
PF: predicated region fallthrough
CT: control target
= control target key end

     0   :  { %s610_s12 = smov 0   ;;  %s612_s13 = smov 0   ;;  %s740_s0 = inlined_call_operand.vmem [shape: bf16[2,32,512], index: 0, kind: input, shape index: {}]   ;;  %s741_s1 = inlined_call_operand.vmem [shape: f32[32,1], index: 1, kind: input, shape index: {}]   ;;  %s742_s2 = inlined_call_operand.vmem [shape: f32[32,1], index: 2, kind: input, shape index: {}]   ;;  %s743_s3 = inlined_call_operand.vmem [shape: bf16[2,32,512], index: 3, kind: output, shape index: {}]  }
   0x1   :  { %s614_s14 = smov 0   ;;  %s616_s15 = smov 0  }
   0x2   :  { %s618_s16 = smov 0   ;;  %s620_s17 = smov 0  }
   0x3   :  { %s622_s18 = smov 0  }
   0x4 LB: > { %s22_s19 = sadd.s32 1, %s579_s16  ;;  %s25_s20 = sadd.s32 1, %s583_s17  ;;  %s587_s18 = sphi %s622_s18, %s13_s18   ;;  %s583_s17 = sphi %s620_s17, %s750_s17   ;;  %s579_s16 = sphi %s618_s16, %s749_s16   ;;  %s575_s15 = sphi %s616_s15, %s748_s15   ;;  %s571_s14 = sphi %s614_s14, %s747_s14   ;;  %s567_s13 = sphi %s612_s13, %s746_s13   ;;  %s563_s12 = sphi %s610_s12, %s745_s12  }
   0x5   : > { %p23_p0 = scmp.ge.s32.totalorder %s22_s19, 2  ;;  %s456_s21 = sadd.s32 4294967295, %s587_s18  }
   0x6   : > { %p41_p1 = scmp.ne.s32.totalorder %s567_s13, %s563_s12  ;;  %p42_p2 = scmp.eq.s32.totalorder %s587_s18, 0 }
   0x7   : > { %s752_s19 = smov (%p23_p0, %s22_s19), 0  ;;  %s754_s20 = smov (!%p23_p0, %s25_s20), %s583_s17 }
   0x8   : > { %p27_p3 = scmp.ge.s32.totalorder %s754_s20, 2  ;;  %p115_p4 = scmp.eq.s32.totalorder %s456_s21, 3 }
   0x9   : > { %s30_s22 = ssub.s32 %s579_s16, %s752_s19  ;;  %p43_p5 = por %p42_p2, %p41_p1 }
   0xa   : > { %s756_s20 = smov (%p27_p3, %s754_s20), 0  ;;  %p658_p6 = por %p115_p4, %p41_p1 }
   0xb   : > { %s29_s24 = ssub.s32 %s583_s17, %s756_s20  ;;  %s34_s26 = sadd.s32 1, %s567_s13 }
   0xc   : > { %s31_s25 = sor.u32 %s30_s22, %s29_s24  ;;  %p459_p8 = scmp.ge.s32.totalorder %s587_s18, 4 }
   0xd   : > { %p32_p7 = scmp.eq.s32.totalorder %s31_s25, 0 }
   0xe   : > { %143 = sbr.rel (%p459_p8) target bundleno = 30 (0x1e), region = 24 }
   0xf   : > { %s666_s27 = scalar_select %p32_p7, %s567_s13, %s34_s26  }
  0x13   : > { %146 = sbr.rel (!%p43_p5) target bundleno = 30 (0x1e), region = 28  ;;  %s148_s28 = sand.u32 (%p43_p5), 1, %s567_s13  }
  0x14   : > { %s461_s29 = sshll.u32 (%p43_p5), %s579_s16, 1  ;;  %s460_s30 = sshll.u32 (%p43_p5), %s148_s28, 5 }
  0x15   : > { %s462_s4 = sshll.u32 (%p43_p5), %s583_s17, 4  ;;  %s150_s10 = scalar_lea.vmem (%p43_p5), [#allocation2], %s460_s30 }
  0x16   : > { %s153_s5 = sadd.s32 (%p43_p5), %s462_s4, %s461_s29 }
  0x17   : > { %s463_s6 = sshll.u32 (%p43_p5), %s153_s5, 2 }
  0x18   : > { %s155_s9 = scalar_lea.vmem %s740_s0, %s463_s6 }
  0x19   : > { %v190_v0 = vld [vmem:[%s155_s9] sm:$0xff]  ;;  %v192_v1 = vld [vmem:[%s155_s9 + $0x10] sm:$0xff] }
  0x1a   : > { %v194_v2 = vld [vmem:[%s155_s9 + $0x20] sm:$0xff]  ;;  %191 = vst [vmem:[%s150_s10] sm:$0xff] %v190_v0  ;;  %v196_v3 = vld [vmem:[%s155_s9 + $0x30] sm:$0xff] }
  0x1b   : > { %193 = vst [vmem:[%s150_s10 + $0x8] sm:$0xff] %v192_v1 }
  0x1c   : > { %195 = vst [vmem:[%s150_s10 + $0x10] sm:$0xff] %v194_v2 }
  0x1d   : > { %197 = vst [vmem:[%s150_s10 + $0x18] sm:$0xff] %v196_v3 }
  0x1e PF: > { %p464_p9 = scmp.ge.s32.totalorder %s587_s18, 1  ;;  %p202_p10 = scmp.lt.s32.totalorder %s587_s18, 5 }
  0x20   : > { %p203_p11 = pnand %p464_p9, %p202_p10 }
  0x21   : > { %s209_s11 = sand.u32 (!%p203_p11), 1, %s563_s12  }
  0x22   : > { %206 = sbr.rel (%p203_p11) target bundleno = 188 (0xbc), region = 66  ;;  %s465_s21 = sshll.u32 (!%p203_p11), %s209_s11, 5 }
  0x23   : > { %s211_s22 = scalar_lea.vmem (!%p203_p11), [#allocation2], %s465_s21  ;;  %s702_s12 = scalar_lea.vmem (!%p203_p11), [#allocation3], %s465_s21 }
  0x27   : > { %v247_v4 = vld [vmem:[%s741_s1 + $0x10] sm:$0xff]  ;;  %v245_v5 = vld [vmem:[%s741_s1] sm:$0xff]  ;;  %v589_v6 = vmov 0   ;;  %v248_v8 = vld [vmem:[%s741_s1 + $0x18] sm:$0xff]  ;;  %s468_s24 = sshll.u32 (%p658_p6), %s571_s14, 1  ;;  %s469_s25 = sshll.u32 (%p658_p6), %s575_s15, 4 }
  0x28   : > { %531 = vset.pattern.permute.xlu1 %v589_v6  ;;  %530 = vset.pattern.permute.xlu0 %v589_v6  ;;  %v277_v7 = vld [vmem:[%s742_s2] sm:$0xff]  ;;  %v246_v9 = vld [vmem:[%s741_s1 + $0x8] sm:$0xff]  ;;  %v280_v11 = vld [vmem:[%s742_s2 + $0x18] sm:$0xff]  ;;  %s334_s26 = sadd.s32 (%p658_p6), %s469_s25, %s468_s24 }
  0x29   : > { %261 = vperm.xlu1 %531, %v247_v4   ;;  %251 = vperm.xlu0 %530, %v245_v5   ;;  %v278_v10 = vld [vmem:[%s742_s2 + $0x8] sm:$0xff]  ;;  %v279_v12 = vld [vmem:[%s742_s2 + $0x10] sm:$0xff]  ;;  %v233_v13 = vld [vmem:[%s211_s22] sm:$0xff]  ;;  %s470_s28 = sshll.u32 (%p658_p6), %s334_s26, 2 }
  0x2a   : > { %532 = vset.pattern.permute.xlu2 %v589_v6  ;;  %v237_v14 = vunpack.c.l.bf16 %v233_v13  ;;  %v238_v15 = vunpack.c.h.bf16 %v233_v13  ;;  %v234_v21 = vld [vmem:[%s211_s22 + $0x8] sm:$0xff]  ;;  %v235_v28 = vld [vmem:[%s211_s22 + $0x10] sm:$0xff]  ;;  %v236_v31 = vld [vmem:[%s211_s22 + $0x18] sm:$0xff]  ;;  %s336_s4 = scalar_lea.vmem (%p658_p6), %s743_s3, %s470_s28 }
  0x2b   : > { %283 = vperm.xlu2 %532, %v277_v7   ;;  %v239_v26 = vunpack.c.l.bf16 %v234_v21  ;;  %v240_v27 = vunpack.c.h.bf16 %v234_v21  ;;  %v241_v35 = vunpack.c.l.bf16 %v235_v28  ;;  %v242_v36 = vunpack.c.h.bf16 %v235_v28 }
  0x2c   : > { %v243_v38 = vunpack.c.l.bf16 %v236_v31  ;;  %v244_v39 = vunpack.c.h.bf16 %v236_v31 }
  0x31   : > { %266 = vperm.xlu1 %531, %v248_v8   ;;  %256 = vperm.xlu0 %530, %v246_v9  }
  0x33   : > { %288 = vperm.xlu2 %532, %v278_v10  }
  0x39   : > { %298 = vperm.xlu1 %531, %v280_v11   ;;  %293 = vperm.xlu0 %530, %v279_v12  }
  0x85   : > { %v284_v16 = vpop.permute.xlu2 %283 }
  0x8d   : > { %v289_v37 = vpop.permute.xlu2 %288 }
  0x9b   : > { %v262_v17 = vpop.permute.xlu1 %261  ;;  %v252_v18 = vpop.permute.xlu0 %251 }
  0x9c   : > { %v269_v19 = vmul.f32 %v252_v18, %v237_v14  ;;  %v270_v20 = vmul.f32 %v252_v18, %v238_v15  ;;  %v273_v44 = vmul.f32 %v262_v17, %v241_v35  ;;  %v274_v45 = vmul.f32 %v262_v17, %v242_v36 }
  0x9e   : > { %v301_v22 = vadd.f32 %v284_v16, %v269_v19  ;;  %v302_v23 = vadd.f32 %v284_v16, %v270_v20 }
  0xa0   : > { %v309_v24 = vmax.f32 %v301_v22, 0.0  ;;  %v310_v25 = vmax.f32 %v302_v23, 0.0 }
  0xa2   : > { %v317_v29 = vpack.c.bf16 %v310_v25, %v309_v24 }
  0xa3   : > { %v267_v30 = vpop.permute.xlu1 %266  ;;  %v257_v32 = vpop.permute.xlu0 %256 }
  0xa4   : > { %321 = vst [vmem:[%s702_s12] sm:$0xff] %v317_v29  ;;  %v271_v33 = vmul.f32 %v257_v32, %v239_v26  ;;  %v272_v34 = vmul.f32 %v257_v32, %v240_v27  ;;  %v275_v46 = vmul.f32 %v267_v30, %v243_v38  ;;  %v276_v47 = vmul.f32 %v267_v30, %v244_v39 }
  0xa6   : > { %v303_v40 = vadd.f32 %v289_v37, %v271_v33  ;;  %v304_v41 = vadd.f32 %v289_v37, %v272_v34 }
  0xa8   : > { %v311_v42 = vmax.f32 %v303_v40, 0.0  ;;  %v312_v43 = vmax.f32 %v304_v41, 0.0 }
  0xaa   : > { %v318_v48 = vpack.c.bf16 %v312_v43, %v311_v42 }
  0xab   : > { %v299_v49 = vpop.permute.xlu1 %298  ;;  %v294_v50 = vpop.permute.xlu0 %293  ;;  %v371_v61 = vld [vmem:[%s702_s12] sm:$0xff] (%p658_p6) }
  0xac   : > { %322 = vst [vmem:[%s702_s12 + $0x8] sm:$0xff] %v318_v48  ;;  %v307_v51 = vadd.f32 %v299_v49, %v275_v46  ;;  %v308_v52 = vadd.f32 %v299_v49, %v276_v47  ;;  %v305_v53 = vadd.f32 %v294_v50, %v273_v44  ;;  %v306_v54 = vadd.f32 %v294_v50, %v274_v45 }
  0xad   : > { %372 = vst [vmem:[%s336_s4] sm:$0xff] (%p658_p6), %v371_v61 }
  0xae   : > { %v315_v55 = vmax.f32 %v307_v51, 0.0  ;;  %v316_v56 = vmax.f32 %v308_v52, 0.0  ;;  %v313_v57 = vmax.f32 %v305_v53, 0.0  ;;  %v314_v58 = vmax.f32 %v306_v54, 0.0 }
  0xaf   : > { %331 = sbr.rel (!%p658_p6) target bundleno = 188 (0xbc), region = 74 }
  0xb0   : > { %v320_v59 = vpack.c.bf16 %v316_v56, %v315_v55  ;;  %v319_v60 = vpack.c.bf16 %v314_v58, %v313_v57 }
  0xb2   : > { %324 = vst [vmem:[%s702_s12 + $0x18] sm:$0xff] %v320_v59 }
  0xb3   : > { %323 = vst [vmem:[%s702_s12 + $0x10] sm:$0xff] %v319_v60  ;;  %v373_v62 = vld [vmem:[%s702_s12 + $0x8] sm:$0xff] (%p658_p6) }
  0xb4   : > { %374 = vst [vmem:[%s336_s4 + $0x10] sm:$0xff] %v373_v62 }
  0xb9   : > { %v377_v0 = vld [vmem:[%s702_s12 + $0x18] sm:$0xff] }
  0xba   : > { %v375_v63 = vld [vmem:[%s702_s12 + $0x10] sm:$0xff]  ;;  %378 = vst [vmem:[%s336_s4 + $0x30] sm:$0xff] %v377_v0 }
  0xbb   : > { %376 = vst [vmem:[%s336_s4 + $0x20] sm:$0xff] %v375_v63 }
  0xbc PF: > { %s13_s18 = sadd.s32 1, %s587_s18   ;;  %s745_s12 = smov %s567_s13 }
  0xbd   : > { %p10_p12 = scmp.ge.s32.totalorder %s13_s18, 6   ;;  %s746_s13 = smov %s666_s27 }
  0xbe   : > { %s747_s14 = smov %s579_s16  ;;  %s748_s15 = smov %s583_s17 }
  0xbf   : > { %s749_s16 = smov %s752_s19  ;;  %s750_s17 = smov %s756_s20 }
  0xc0   :  { %12 = sbr.rel (!%p10_p12) target bundleno = 4 (0x4), region = 143 }

// kernel: generator_forward.14
= control target key start
LH: loop header
LB: loop body
LE: loop exit
PB: predicated region body
PF: predicated region fallthrough
CT: control target
= control target key end

     0   :  { %s761_s15 = smov 0   ;;  %s763_s16 = smov 0   ;;  %s916_s0 = inlined_call_operand.vmem [shape: bf16[2,32,512], index: 0, kind: input, shape index: {}]   ;;  %s917_s1 = inlined_call_operand.vmem [shape: f32[32,1], index: 1, kind: input, shape index: {}]   ;;  %s918_s2 = inlined_call_operand.vmem [shape: f32[32,1], index: 2, kind: input, shape index: {}]   ;;  %s919_s3 = inlined_call_operand.vmem [shape: bf16[2,32,512], index: 3, kind: input, shape index: {}]   ;;  %s920_s4 = inlined_call_operand.vmem [shape: bf16[2,32,512], index: 4, kind: output, shape index: {}]  }
   0x1   :  { %s765_s17 = smov 0   ;;  %s767_s18 = smov 0  }
   0x2   :  { %s769_s19 = smov 0   ;;  %s771_s20 = smov 0  }
   0x3   :  { %s773_s21 = smov 0  }
   0x4 LB: > { %s23_s22 = sadd.s32 1, %s725_s19  ;;  %s26_s23 = sadd.s32 1, %s729_s20  ;;  %s733_s21 = sphi %s773_s21, %s14_s21   ;;  %s729_s20 = sphi %s771_s20, %s928_s20   ;;  %s725_s19 = sphi %s769_s19, %s927_s19   ;;  %s721_s18 = sphi %s767_s18, %s926_s18   ;;  %s717_s17 = sphi %s765_s17, %s925_s17   ;;  %s713_s16 = sphi %s763_s16, %s924_s16   ;;  %s709_s15 = sphi %s761_s15, %s923_s15  }
   0x5   : > { %p24_p0 = scmp.ge.s32.totalorder %s23_s22, 2  ;;  %s597_s24 = sadd.s32 4294967295, %s733_s21  }
   0x6   : > { %p42_p1 = scmp.ne.s32.totalorder %s713_s16, %s709_s15  ;;  %p43_p2 = scmp.eq.s32.totalorder %s733_s21, 0 }
   0x7   : > { %s930_s22 = smov (%p24_p0, %s23_s22), 0  ;;  %s932_s23 = smov (!%p24_p0, %s26_s23), %s729_s20 }
   0x8   : > { %p28_p3 = scmp.ge.s32.totalorder %s932_s23, 2  ;;  %p144_p4 = scmp.eq.s32.totalorder %s597_s24, 3 }
   0x9   : > { %s31_s25 = ssub.s32 %s725_s19, %s930_s22  ;;  %p807_p5 = por %p43_p2, %p42_p1 }
   0xa   : > { %s934_s23 = smov (%p28_p3, %s932_s23), 0  ;;  %p813_p6 = por %p144_p4, %p42_p1 }
   0xb   : > { %s30_s28 = ssub.s32 %s729_s20, %s934_s23  ;;  %s35_s30 = sadd.s32 1, %s713_s16 }
   0xc   : > { %s32_s29 = sor.u32 %s31_s25, %s30_s28  ;;  %p600_p8 = scmp.ge.s32.totalorder %s733_s21, 4 }
   0xd   : > { %p33_p7 = scmp.eq.s32.totalorder %s32_s29, 0 }
   0xe   : > { %172 = sbr.rel (%p600_p8) target bundleno = 41 (0x29), region = 24 }
   0xf   : > { %s821_s5 = scalar_select %p33_p7, %s713_s16, %s35_s30  }
  0x13   : > { %175 = sbr.rel (!%p807_p5) target bundleno = 30 (0x1e), region = 28  ;;  %s177_s6 = sand.u32 (%p807_p5), 1, %s713_s16  }
  0x14   : > { %s602_s7 = sshll.u32 (%p807_p5), %s725_s19, 1  ;;  %s601_s8 = sshll.u32 (%p807_p5), %s177_s6, 5 }
  0x15   : > { %s603_s9 = sshll.u32 (%p807_p5), %s729_s20, 4  ;;  %s179_s24 = scalar_lea.vmem (%p807_p5), [#allocation2], %s601_s8 }
  0x16   : > { %s182_s10 = sadd.s32 (%p807_p5), %s603_s9, %s602_s7 }
  0x17   : > { %s604_s11 = sshll.u32 (%p807_p5), %s182_s10, 2 }
  0x18   : > { %s184_s14 = scalar_lea.vmem %s916_s0, %s604_s11 }
  0x19   : > { %v219_v0 = vld [vmem:[%s184_s14] sm:$0xff]  ;;  %v221_v1 = vld [vmem:[%s184_s14 + $0x10] sm:$0xff] }
  0x1a   : > { %v223_v2 = vld [vmem:[%s184_s14 + $0x20] sm:$0xff]  ;;  %220 = vst [vmem:[%s179_s24] sm:$0xff] %v219_v0  ;;  %v225_v3 = vld [vmem:[%s184_s14 + $0x30] sm:$0xff] }
  0x1b   : > { %222 = vst [vmem:[%s179_s24 + $0x8] sm:$0xff] %v221_v1 }
  0x1c   : > { %224 = vst [vmem:[%s179_s24 + $0x10] sm:$0xff] %v223_v2 }
  0x1d   : > { %226 = vst [vmem:[%s179_s24 + $0x18] sm:$0xff] %v225_v3 }
  0x1e PF: > { %232 = sbr.rel (!%p807_p5) target bundleno = 41 (0x29), region = 66  ;;  %s234_s25 = sand.u32 (%p807_p5), 1, %s713_s16  }
  0x1f   : > { %s606_s28 = sshll.u32 (%p807_p5), %s725_s19, 1  ;;  %s605_s29 = sshll.u32 (%p807_p5), %s234_s25, 5 }
  0x20   : > { %s607_s30 = sshll.u32 (%p807_p5), %s729_s20, 4  ;;  %s236_s11 = scalar_lea.vmem (%p807_p5), [#allocation3], %s605_s29 }
  0x21   : > { %s239_s6 = sadd.s32 (%p807_p5), %s607_s30, %s606_s28 }
  0x22   : > { %s608_s7 = sshll.u32 (%p807_p5), %s239_s6, 2 }
  0x23   : > { %s241_s10 = scalar_lea.vmem %s919_s3, %s608_s7 }
  0x24   : > { %v276_v4 = vld [vmem:[%s241_s10] sm:$0xff]  ;;  %v278_v5 = vld [vmem:[%s241_s10 + $0x10] sm:$0xff] }
  0x25   : > { %v280_v6 = vld [vmem:[%s241_s10 + $0x20] sm:$0xff]  ;;  %277 = vst [vmem:[%s236_s11] sm:$0xff] %v276_v4  ;;  %v282_v7 = vld [vmem:[%s241_s10 + $0x30] sm:$0xff] }
  0x26   : > { %279 = vst [vmem:[%s236_s11 + $0x8] sm:$0xff] %v278_v5 }
  0x27   : > { %281 = vst [vmem:[%s236_s11 + $0x10] sm:$0xff] %v280_v6 }
  0x28   : > { %283 = vst [vmem:[%s236_s11 + $0x18] sm:$0xff] %v282_v7 }
  0x29 PF: > { %p609_p9 = scmp.ge.s32.totalorder %s733_s21, 1  ;;  %p288_p10 = scmp.lt.s32.totalorder %s733_s21, 5 }
  0x2b   : > { %p289_p11 = pnand %p609_p9, %p288_p10 }
  0x2c   : > { %s295_s12 = sand.u32 (!%p289_p11), 1, %s709_s15  }
  0x2d   : > { %292 = sbr.rel (%p289_p11) target bundleno = 201 (0xc9), region = 104  ;;  %s867_s13 = sshll.u32 (!%p289_p11), %s295_s12, 5 }
  0x2e   : > { %s297_s14 = scalar_lea.vmem (!%p289_p11), [#allocation2], %s867_s13  ;;  %s871_s24 = scalar_lea.vmem (!%p289_p11), [#allocation3], %s867_s13 }
  0x2f   : > { %s877_s15 = scalar_lea.vmem (!%p289_p11), [#allocation4], %s867_s13 }
  0x32   : > { %v347_v8 = vld [vmem:[%s917_s1 + $0x10] sm:$0xff]  ;;  %v345_v9 = vld [vmem:[%s917_s1] sm:$0xff]  ;;  %v735_v10 = vmov 0   ;;  %v348_v12 = vld [vmem:[%s917_s1 + $0x18] sm:$0xff]  ;;  %s614_s25 = sshll.u32 (%p813_p6), %s717_s17, 1  ;;  %s615_s28 = sshll.u32 (%p813_p6), %s721_s18, 4 }
  0x33   : > { %677 = vset.pattern.permute.xlu1 %v735_v10  ;;  %676 = vset.pattern.permute.xlu0 %v735_v10  ;;  %v377_v11 = vld [vmem:[%s918_s2] sm:$0xff]  ;;  %v346_v13 = vld [vmem:[%s917_s1 + $0x8] sm:$0xff]  ;;  %v380_v15 = vld [vmem:[%s918_s2 + $0x18] sm:$0xff]  ;;  %s454_s29 = sadd.s32 (%p813_p6), %s615_s28, %s614_s25 }
  0x34   : > { %361 = vperm.xlu1 %677, %v347_v8   ;;  %351 = vperm.xlu0 %676, %v345_v9   ;;  %v378_v14 = vld [vmem:[%s918_s2 + $0x8] sm:$0xff]  ;;  %v379_v16 = vld [vmem:[%s918_s2 + $0x10] sm:$0xff]  ;;  %v333_v17 = vld [vmem:[%s297_s14] sm:$0xff]  ;;  %s616_s30 = sshll.u32 (%p813_p6), %s454_s29, 2 }
  0x35   : > { %678 = vset.pattern.permute.xlu2 %v735_v10  ;;  %v337_v18 = vunpack.c.l.bf16 %v333_v17  ;;  %v338_v19 = vunpack.c.h.bf16 %v333_v17  ;;  %v409_v20 = vld [vmem:[%s871_s24] sm:$0xff]  ;;  %v334_v28 = vld [vmem:[%s297_s14 + $0x8] sm:$0xff]  ;;  %v335_v36 = vld [vmem:[%s297_s14 + $0x10] sm:$0xff]  ;;  %s456_s9 = scalar_lea.vmem (%p813_p6), %s920_s4, %s616_s30 }
  0x36   : > { %383 = vperm.xlu2 %678, %v377_v11   ;;  %v413_v26 = vunpack.c.l.bf16 %v409_v20  ;;  %v414_v27 = vunpack.c.h.bf16 %v409_v20  ;;  %v339_v33 = vunpack.c.l.bf16 %v334_v28  ;;  %v340_v34 = vunpack.c.h.bf16 %v334_v28  ;;  %v410_v35 = vld [vmem:[%s871_s24 + $0x8] sm:$0xff]  ;;  %v336_v40 = vld [vmem:[%s297_s14 + $0x18] sm:$0xff]  ;;  %v411_v54 = vld [vmem:[%s871_s24 + $0x10] sm:$0xff] }
  0x37   : > { %v415_v44 = vunpack.c.l.bf16 %v410_v35  ;;  %v341_v45 = vunpack.c.l.bf16 %v335_v36  ;;  %v416_v48 = vunpack.c.h.bf16 %v410_v35  ;;  %v412_v49 = vld [vmem:[%s871_s24 + $0x18] sm:$0xff]  ;;  %v342_v50 = vunpack.c.h.bf16 %v335_v36 }
  0x38   : > { %v343_v51 = vunpack.c.l.bf16 %v336_v40  ;;  %v344_v52 = vunpack.c.h.bf16 %v336_v40  ;;  %v419_v57 = vunpack.c.l.bf16 %v412_v49  ;;  %v420_v58 = vunpack.c.h.bf16 %v412_v49 }
  0x39   : > { %v417_v61 = vunpack.c.l.bf16 %v411_v54  ;;  %v418_v62 = vunpack.c.h.bf16 %v411_v54 }
  0x3c   : > { %366 = vperm.xlu1 %677, %v348_v12   ;;  %356 = vperm.xlu0 %676, %v346_v13  }
  0x3e   : > { %388 = vperm.xlu2 %678, %v378_v14  }
  0x44   : > { %398 = vperm.xlu1 %677, %v380_v15   ;;  %393 = vperm.xlu0 %676, %v379_v16  }
  0x90   : > { %v384_v21 = vpop.permute.xlu2 %383 }
  0x98   : > { %v389_v46 = vpop.permute.xlu2 %388 }
  0xa6   : > { %v362_v22 = vpop.permute.xlu1 %361  ;;  %v352_v23 = vpop.permute.xlu0 %351 }
  0xa7   : > { %v369_v24 = vmul.f32 %v352_v23, %v337_v18  ;;  %v370_v25 = vmul.f32 %v352_v23, %v338_v19  ;;  %v373_v59 = vmul.f32 %v362_v22, %v341_v45  ;;  %v374_v63 = vmul.f32 %v362_v22, %v342_v50 }
  0xa9   : > { %v401_v29 = vadd.f32 %v384_v21, %v369_v24  ;;  %v402_v30 = vadd.f32 %v384_v21, %v370_v25 }
  0xab   : > { %v421_v31 = vadd.f32 %v413_v26, %v401_v29  ;;  %v422_v32 = vadd.f32 %v414_v27, %v402_v30 }
  0xad   : > { %v429_v37 = vmax.f32 %v421_v31, 0.0  ;;  %v430_v38 = vmax.f32 %v422_v32, 0.0 }
  0xae   : > { %v367_v39 = vpop.permute.xlu1 %366  ;;  %v357_v41 = vpop.permute.xlu0 %356 }
  0xaf   : > { %v437_v42 = vpack.c.bf16 %v430_v38, %v429_v37  ;;  %v371_v43 = vmul.f32 %v357_v41, %v339_v33  ;;  %v372_v47 = vmul.f32 %v357_v41, %v340_v34  ;;  %v375_v0 = vmul.f32 %v367_v39, %v343_v51 }
  0xb0   : > { %v376_v1 = vmul.f32 %v367_v39, %v344_v52 }
  0xb1   : > { %441 = vst [vmem:[%s877_s15] sm:$0xff] %v437_v42  ;;  %v403_v53 = vadd.f32 %v389_v46, %v371_v43  ;;  %v404_v55 = vadd.f32 %v389_v46, %v372_v47 }
  0xb3   : > { %v423_v56 = vadd.f32 %v415_v44, %v403_v53  ;;  %v424_v60 = vadd.f32 %v416_v48, %v404_v55 }
  0xb5   : > { %v431_v2 = vmax.f32 %v423_v56, 0.0  ;;  %v432_v3 = vmax.f32 %v424_v60, 0.0 }
  0xb6   : > { %v399_v4 = vpop.permute.xlu1 %398  ;;  %v394_v5 = vpop.permute.xlu0 %393 }
  0xb7   : > { %v407_v6 = vadd.f32 %v399_v4, %v375_v0  ;;  %v408_v7 = vadd.f32 %v399_v4, %v376_v1  ;;  %v405_v8 = vadd.f32 %v394_v5, %v373_v59  ;;  %v406_v9 = vadd.f32 %v394_v5, %v374_v63 }
  0xb8   : > { %v438_v10 = vpack.c.bf16 %v432_v3, %v431_v2  ;;  %v491_v21 = vld [vmem:[%s877_s15] sm:$0xff] (%p813_p6) }
  0xb9   : > { %v427_v11 = vadd.f32 %v419_v57, %v407_v6  ;;  %v428_v12 = vadd.f32 %v420_v58, %v408_v7  ;;  %v425_v13 = vadd.f32 %v417_v61, %v405_v8  ;;  %v426_v14 = vadd.f32 %v418_v62, %v406_v9  ;;  %492 = vst [vmem:[%s456_s9] sm:$0xff] (%p813_p6), %v491_v21 }
  0xba   : > { %442 = vst [vmem:[%s877_s15 + $0x8] sm:$0xff] %v438_v10 }
  0xbb   : > { %v435_v15 = vmax.f32 %v427_v11, 0.0  ;;  %v436_v16 = vmax.f32 %v428_v12, 0.0  ;;  %v433_v17 = vmax.f32 %v425_v13, 0.0  ;;  %v434_v18 = vmax.f32 %v426_v14, 0.0 }
  0xbc   : > { %451 = sbr.rel (!%p813_p6) target bundleno = 201 (0xc9), region = 116 }
  0xbd   : > { %v440_v19 = vpack.c.bf16 %v436_v16, %v435_v15  ;;  %v439_v20 = vpack.c.bf16 %v434_v18, %v433_v17 }
  0xbf   : > { %444 = vst [vmem:[%s877_s15 + $0x18] sm:$0xff] %v440_v19 }
  0xc0   : > { %443 = vst [vmem:[%s877_s15 + $0x10] sm:$0xff] %v439_v20 }
  0xc1   : > { %v493_v22 = vld [vmem:[%s877_s15 + $0x8] sm:$0xff] }
  0xc2   : > { %494 = vst [vmem:[%s456_s9 + $0x10] sm:$0xff] %v493_v22 }
  0xc6   : > { %v497_v24 = vld [vmem:[%s877_s15 + $0x18] sm:$0xff] }
  0xc7   : > { %v495_v23 = vld [vmem:[%s877_s15 + $0x10] sm:$0xff]  ;;  %498 = vst [vmem:[%s456_s9 + $0x30] sm:$0xff] %v497_v24 }
  0xc8   : > { %496 = vst [vmem:[%s456_s9 + $0x20] sm:$0xff] %v495_v23 }
  0xc9 PF: > { %s14_s21 = sadd.s32 1, %s733_s21   ;;  %s923_s15 = smov %s713_s16 }
  0xca   : > { %p11_p12 = scmp.ge.s32.totalorder %s14_s21, 6   ;;  %s924_s16 = smov %s821_s5 }
  0xcb   : > { %s925_s17 = smov %s725_s19  ;;  %s926_s18 = smov %s729_s20 }
  0xcc   : > { %s927_s19 = smov %s930_s22  ;;  %s928_s20 = smov %s934_s23 }
  0xcd   :  { %13 = sbr.rel (!%p11_p12) target bundleno = 4 (0x4), region = 193 }

// kernel: generator_forward.19
= control target key start
LH: loop header
LB: loop body
LE: loop exit
PB: predicated region body
PF: predicated region fallthrough
CT: control target
= control target key end

     0   :  { %s1327_s12 = smov 0   ;;  %s1329_s13 = smov 0   ;;  %s1579_s0 = inlined_call_operand.vmem [shape: bf16[2,32,640], index: 0, kind: input, shape index: {}]   ;;  %s1580_s1 = inlined_call_operand.vmem [shape: bf16[9,16,32], index: 1, kind: input, shape index: {}]   ;;  %s1581_s2 = inlined_call_operand.vmem [shape: f32[16,1], index: 2, kind: input, shape index: {}]   ;;  %s1582_s3 = inlined_call_operand.vmem [shape: f32[2,16,512], index: 3, kind: output, shape index: {}]  }
   0x1   :  { %s1331_s14 = smov 0   ;;  %s1333_s15 = smov 0  }
   0x2   :  { %s1335_s16 = smov 0   ;;  %s1337_s17 = smov 0  }
   0x3   :  { %s1339_s18 = smov 0  }
   0x4 LB: > { %s22_s19 = sadd.s32 1, %s1288_s16  ;;  %s25_s20 = sadd.s32 1, %s1292_s17  ;;  %s1296_s18 = sphi %s1339_s18, %s13_s18   ;;  %s1292_s17 = sphi %s1337_s17, %s1589_s17   ;;  %s1288_s16 = sphi %s1335_s16, %s1588_s16   ;;  %s1284_s15 = sphi %s1333_s15, %s1587_s15   ;;  %s1280_s14 = sphi %s1331_s14, %s1586_s14   ;;  %s1276_s13 = sphi %s1329_s13, %s1585_s13   ;;  %s1272_s12 = sphi %s1327_s12, %s1584_s12  }
   0x5   : > { %p23_p0 = scmp.ge.s32.totalorder %s22_s19, 2  ;;  %s1014_s21 = sadd.s32 4294967295, %s1296_s18  }
   0x6   : > { %p86_p1 = scmp.ne.s32.totalorder %s1276_s13, %s1272_s12  ;;  %p87_p2 = scmp.eq.s32.totalorder %s1014_s21, 3 }
   0x7   : > { %s1591_s19 = smov (%p23_p0, %s22_s19), 0  ;;  %s1593_s20 = smov (!%p23_p0, %s25_s20), %s1292_s17 }
   0x8   : > { %s72_s22 = ssub.s32 %s1288_s16, %s1591_s19  ;;  %p27_p3 = scmp.ge.s32.totalorder %s1593_s20, 2 }
   0x9   : > { %p1017_p4 = scmp.ge.s32.totalorder %s1296_s18, 1  ;;  %p1373_p5 = por %p87_p2, %p86_p1 }
   0xa   : > { %p117_p6 = scmp.lt.s32.totalorder %s1296_s18, 5  ;;  %s1595_s20 = smov (%p27_p3, %s1593_s20), 0 }
   0xb   : > { %s71_s24 = ssub.s32 %s1292_s17, %s1595_s20  ;;  %s76_s26 = sadd.s32 1, %s1276_s13 }
   0xc   : > { %p118_p7 = pnand %p1017_p4, %p117_p6  ;;  %s73_s25 = sor.u32 %s72_s22, %s71_s24 }
   0xd   : > { %p74_p8 = scmp.eq.s32.totalorder %s73_s25, 0  ;;  %s130_s28 = sand.u32 (!%p118_p7), 1, %s1272_s12  }
   0xe   : > { %121 = sbr.rel (%p118_p7) target bundleno = 464 (0x1d0), region = 28  ;;  %s1019_s29 = sshll.u32 (!%p118_p7), %s1284_s15, 1 }
   0xf   : > { %s1384_s27 = scalar_select %p74_p8, %s1276_s13, %s76_s26  }
  0x10   : > { %s1018_s30 = sshll.u32 (!%p118_p7), %s130_s28, 5  ;;  %s1389_s4 = sadd.s32 (!%p118_p7), %s1280_s14, %s1019_s29 }
  0x11   : > { %p137_p9 = scmp.lt.s32.totalorder (!%p118_p7), %s1389_s4, 0  ;;  %s138_s5 = ssub.s32 (!%p118_p7), 0, %s1389_s4 }
  0x12   : > { %s1021_s6 = sshll.u32 (!%p118_p7), %s1280_s14, 8  ;;  %s1020_s7 = smin.u32 (!%p118_p7), %s138_s5, %s1389_s4 }
  0x13   : > { %s140_s8 = sand.u32 1, %s1020_s7   ;;  %s1397_s10 = scalar_lea.vmem [#allocation4], %s1018_s30 }
  0x14   : > { %s141_s9 = ssub.s32 0, %s140_s8  ;;  %p1022_p10 = scmp.ne.s32.totalorder %s1389_s4, 0 }
  0x15   : > { %s1597_s9 = smov (!%p137_p9, %s141_s9), %s140_s8  ;;  %s148_s11 = sshra.s32 (!%p1022_p10), %s1021_s6, 7 }
  0x16   : > { %147 = sbr.rel (%p1022_p10) target bundleno = 38 (0x26), region = 32  ;;  %s157_s30 = scalar_lea.sflag (!%p1022_p10), [#allocation3], %s1597_s9 }
  0x17   : > { %s150_s12 = smul.u32 (!%p1022_p10), 20, %s1284_s15 }
  0x18   : > { %s1147_s21 = smul.u32 (!%p1022_p10), 48, %s1597_s9 }
  0x19   : > { %s151_s22 = sadd.s32 (!%p1022_p10), %s150_s12, %s148_s11 }
  0x1a   : > { %s1023_s24 = sshll.u32 (!%p1022_p10), %s151_s22, 2  ;;  %s156_s29 = scalar_lea.vmem (!%p1022_p10), [#allocation2], %s1147_s21 }
  0x1b   : > { %s153_s28 = scalar_lea.vmem %s1579_s0, %s1023_s24 }
  0x1c   : > { %v170_v0 = vld [vmem:[%s153_s28] sm:$0xff]  ;;  %v172_v1 = vld [vmem:[%s153_s28 + $0x14] sm:$0xff]  ;;  %v174_v2 = vld [vmem:[%s153_s28 + $0x28] sm:$0xff] }
  0x1d   : > { %171 = vst [vmem:[%s156_s29] sm:$0xff] %v170_v0  ;;  %v176_v3 = vld [vmem:[%s153_s28 + $0x3c] sm:$0xff]  ;;  %v1025_v4 = vld [vmem:[%s153_s28 + $0x8] sm:$0xf]  ;;  %v1029_v6 = vld [vmem:[%s153_s28 + $0x30] sm:$0xf] }
  0x1e   : > { %173 = vst [vmem:[%s156_s29 + $0xc] sm:$0xff] %v172_v1  ;;  %v1027_v5 = vld [vmem:[%s153_s28 + $0x1c] sm:$0xf]  ;;  %v1031_v7 = vld [vmem:[%s153_s28 + $0x44] sm:$0xf] }
  0x1f   : > { %175 = vst [vmem:[%s156_s29 + $0x18] sm:$0xff] %v174_v2 }
  0x20   : > { %177 = vst [vmem:[%s156_s29 + $0x24] sm:$0xff] %v176_v3 }
  0x21   : > { %1026 = vst [vmem:[%s156_s29 + $0x8] sm:$0xf] %v1025_v4 }
  0x22   : > { %1028 = vst [vmem:[%s156_s29 + $0x14] sm:$0xf] %v1027_v5 }
  0x23   : > { %1030 = vst [vmem:[%s156_s29 + $0x20] sm:$0xf] %v1029_v6 }
  0x24   : > { %1032 = vst [vmem:[%s156_s29 + $0x2c] sm:$0xf] %v1031_v7 }
  0x25   : > { %199 = vsyncadd %s157_s30, 768 }
  0x26 PF: > { %s200_s5 = sadd.s32 1, %s1389_s4 }
  0x27   : > { %p1033_p11 = scmp.ge.s32.totalorder %s200_s5, 4 }
  0x28   : > { %p205_p12 = scmp.eq.s32.totalorder (!%p1033_p11), %s1280_s14, 1  ;;  %s206_s7 = sadd.s32 (!%p1033_p11), 1, %s1284_s15 }
  0x29   : > { %204 = sbr.rel (%p1033_p11) target bundleno = 62 (0x3e), region = 58  ;;  %s208_s8 = sadd.s32 (!%p1033_p11), 256, %s1021_s6 }
  0x2a   : > { %s210_s11 = ssub.s32 (!%p1033_p11), 1, %s1597_s9 }
  0x2b   : > { %s1148_s22 = smul.u32 (!%p1033_p11), 48, %s210_s11  ;;  %s220_s6 = scalar_lea.sflag (!%p1033_p11), [#allocation3], %s210_s11 }
  0x2d   : > { %s219_s29 = scalar_lea.vmem (!%p1033_p11), [#allocation2], %s1148_s22 }
  0x2e   : > { %s1599_s7 = smov (!%p205_p12, %s206_s7), %s1284_s15  ;;  %s1601_s8 = smov (%p205_p12, %s208_s8), 0 }
  0x2f   : > { %s213_s12 = smul.u32 20, %s1599_s7  ;;  %s211_s21 = sshra.s32 %s1601_s8, 7 }
  0x31   : > { %s214_s24 = sadd.s32 %s213_s12, %s211_s21 }
  0x32   : > { %s1034_s25 = sshll.u32 %s214_s24, 2 }
  0x33   : > { %s216_s28 = scalar_lea.vmem %s1579_s0, %s1034_s25 }
  0x34   : > { %v233_v8 = vld [vmem:[%s216_s28] sm:$0xff]  ;;  %v235_v9 = vld [vmem:[%s216_s28 + $0x14] sm:$0xff]  ;;  %v237_v10 = vld [vmem:[%s216_s28 + $0x28] sm:$0xff] }
  0x35   : > { %234 = vst [vmem:[%s219_s29] sm:$0xff] %v233_v8  ;;  %v239_v11 = vld [vmem:[%s216_s28 + $0x3c] sm:$0xff]  ;;  %v1036_v12 = vld [vmem:[%s216_s28 + $0x8] sm:$0xf]  ;;  %v1040_v14 = vld [vmem:[%s216_s28 + $0x30] sm:$0xf] }
  0x36   : > { %236 = vst [vmem:[%s219_s29 + $0xc] sm:$0xff] %v235_v9  ;;  %v1038_v13 = vld [vmem:[%s216_s28 + $0x1c] sm:$0xf]  ;;  %v1042_v15 = vld [vmem:[%s216_s28 + $0x44] sm:$0xf] }
  0x37   : > { %238 = vst [vmem:[%s219_s29 + $0x18] sm:$0xff] %v237_v10 }
  0x38   : > { %240 = vst [vmem:[%s219_s29 + $0x24] sm:$0xff] %v239_v11 }
  0x39   : > { %1037 = vst [vmem:[%s219_s29 + $0x8] sm:$0xf] %v1036_v12 }
  0x3a   : > { %1039 = vst [vmem:[%s219_s29 + $0x14] sm:$0xf] %v1038_v13 }
  0x3b   : > { %1041 = vst [vmem:[%s219_s29 + $0x20] sm:$0xf] %v1040_v14 }
  0x3c   : > { %1043 = vst [vmem:[%s219_s29 + $0x2c] sm:$0xf] %v1042_v15 }
  0x3d   : > { %262 = vsyncadd %s220_s6, 768 }
  0x3e PF: > { %s1149_s30 = smul.u32 48, %s1597_s9  ;;  %s266_s7 = scalar_lea.sflag [#allocation3], %s1597_s9 }
  0x40   : > { %s265_s5 = scalar_lea.vmem [#allocation2], %s1149_s30 }
  0x41   : > { %1268 = dma.done.wait %s266_s7, 768 }
  0x42   : > { %1269 = vsyncadd %s266_s7, 4294966528  ;;  %s1298_s8 = smov 127   ;;  %s1299_s9 = smov 126   ;;  %v1154_v39 = vld [vmem:[%s1580_s1] sm:$0xff]  ;;  %vm336_vm0 = vcmask 261120   ;;  %vm327_vm1 = vcmask 1039360  }
  0x43   : > { %v1073_v16 = vld [vmem:[%s265_s5 + $0x20] sm:$0xf]  ;;  %v1156_v17 = vld [vmem:[%s265_s5 + $0x28] sm:$0xf0]  ;;  %v1065_v18 = vld [vmem:[%s265_s5 + $0x18] sm:$0xf] }
  0x44   : > { %v1420_v19 = vor.u32 %v1156_v17, %v1073_v16  ;;  %v1153_v20 = vld [vmem:[%s265_s5 + $0x20] sm:$0xf0]  ;;  %v1152_v21 = vld [vmem:[%s265_s5 + $0x1c] sm:$0xf]  ;;  %v1067_v22 = vld [vmem:[%s265_s5 + $0x24] sm:$0xf0] }
  0x45   : > { %v1422_v23 = vor.u32 %v1153_v20, %v1065_v18  ;;  %v1150_v24 = vld [vmem:[%s265_s5 + $0x4] sm:$0xf]  ;;  %v1425_v25 = vor.u32 %v1152_v21, %v1067_v22  ;;  %v1053_v26 = vld [vmem:[%s265_s5] sm:$0xf]  ;;  %v1151_v27 = vld [vmem:[%s265_s5 + $0x8] sm:$0xf0] }
  0x46   : > { %325 = vrot.lane.b32.xlu1 %v1420_v19, %s1298_s8  ;;  %v1055_v28 = vld [vmem:[%s265_s5 + $0xc] sm:$0xf0]  ;;  %v1432_v30 = vor.u32 %v1151_v27, %v1053_v26  ;;  %v1061_v31 = vld [vmem:[%s265_s5 + $0x8] sm:$0xf]  ;;  %v1155_v32 = vld [vmem:[%s265_s5 + $0x10] sm:$0xf0] }
  0x47   : > { %321 = vrot.lane.b32.xlu0 %v1422_v23, %s1298_s8  ;;  %v1428_v29 = vor.u32 %v1150_v24, %v1055_v28  ;;  %386 = vmatpush.bf16.msra.mxu2 %v1422_v23  ;;  %v1437_v33 = vor.u32 %v1155_v32, %v1061_v31  ;;  %s1300_s11 = smov 110   ;;  %s1301_s12 = smov 109   ;;  %vm428_vm2 = vcmask 1031168   ;;  %v1157_v48 = vld [vmem:[%s1580_s1 + $0x8] sm:$0xff]  ;;  %vm492_vm3 = vcmask 900096   ;;  %v1158_v59 = vld [vmem:[%s1580_s1 + $0x10] sm:$0xff] }
  0x48   : > { %400 = vmatpush.bf16.msra.mxu3 %v1425_v25  ;;  %s1302_s21 = smov 108   ;;  %s1303_s22 = smov 92   ;;  %v1159_v4 = vld [vmem:[%s1580_s1 + $0x18] sm:$0xff]  ;;  %vm556_vm4 = vcmask 891904   ;;  %v1160_v14 = vld [vmem:[%s1580_s1 + $0x20] sm:$0xff]  ;;  %vm620_vm5 = vcmask 883712  }
  0x49   : > { %317 = vrot.lane.b32.xlu2 %v1428_v29, %s1298_s8  ;;  %s1304_s24 = smov 91   ;;  %s1305_s25 = smov 90   ;;  %vm684_vm6 = vcmask 752640   ;;  %vm748_vm7 = vcmask 744448   ;;  %vm812_vm8 = vcmask 736256  }
  0x4a   : > { %s1140_s5 = sshll.u32 (%p1373_p5), %s1280_s14, 1  ;;  %s1141_s7 = sshll.u32 (%p1373_p5), %s1284_s15, 3 }
  0x4b   : > { %387 = vmatpush.bf16.msra.mxu2 %v1432_v30 }
  0x4c   : > { %401 = vmatpush.bf16.msra.mxu3 %v1428_v29 }
  0x4e   : > { %315 = vrot.lane.b32.xlu1 %v1432_v30, %s1298_s8  ;;  %1081 = vmatmul.msk.bf16.vlgmr.msra.gmra.mxu2 %vm336_vm0, %v1154_v39 }
  0x4f   : > { %323 = vrot.lane.b32.xlu0 %v1425_v25, %s1298_s8  ;;  %1082 = vmatmul.msk.bf16.vlgmr.msra.gmra.mxu3 %vm336_vm0, %v1154_v39  ;;  %v857_v39 = vld [vmem:[%s1581_s2 + $0x8] sm:$0xff] }
  0x51   : > { %319 = vrot.lane.b32.xlu2 %v1437_v33, %s1298_s8  ;;  %s889_s8 = sadd.s32 (%p1373_p5), %s1141_s7, %s1140_s5 }
  0x56   : > { %424 = vrot.lane.b32.xlu1 %v1425_v25, %s1299_s9 }
  0x57   : > { %422 = vrot.lane.b32.xlu0 %v1422_v23, %s1299_s9 }
  0x59   : > { %426 = vrot.lane.b32.xlu2 %v1420_v19, %s1299_s9 }
  0x5e   : > { %418 = vrot.lane.b32.xlu1 %v1428_v29, %s1299_s9 }
  0x5f   : > { %416 = vrot.lane.b32.xlu0 %v1432_v30, %s1299_s9 }
  0x61   : > { %420 = vrot.lane.b32.xlu2 %v1437_v33, %s1299_s9  ;;  %s1142_s9 = sshll.u32 (%p1373_p5), %s889_s8, 3 }
  0x66   : > { %488 = vrot.lane.b32.xlu1 %v1425_v25, %s1300_s11 }
  0x67   : > { %486 = vrot.lane.b32.xlu0 %v1422_v23, %s1300_s11 }
  0x69   : > { %490 = vrot.lane.b32.xlu2 %v1420_v19, %s1300_s11 }
  0x6e   : > { %482 = vrot.lane.b32.xlu1 %v1428_v29, %s1300_s11 }
  0x6f   : > { %480 = vrot.lane.b32.xlu0 %v1432_v30, %s1300_s11 }
  0x71   : > { %484 = vrot.lane.b32.xlu2 %v1437_v33, %s1300_s11 }
  0x76   : > { %552 = vrot.lane.b32.xlu1 %v1425_v25, %s1301_s12 }
  0x77   : > { %550 = vrot.lane.b32.xlu0 %v1422_v23, %s1301_s12 }
  0x79   : > { %554 = vrot.lane.b32.xlu2 %v1420_v19, %s1301_s12 }
  0x7e   : > { %546 = vrot.lane.b32.xlu1 %v1428_v29, %s1301_s12 }
  0x7f   : > { %544 = vrot.lane.b32.xlu0 %v1432_v30, %s1301_s12 }
  0x81   : > { %548 = vrot.lane.b32.xlu2 %v1437_v33, %s1301_s12 }
  0x86   : > { %616 = vrot.lane.b32.xlu1 %v1425_v25, %s1302_s21 }
  0x87   : > { %614 = vrot.lane.b32.xlu0 %v1422_v23, %s1302_s21 }
  0x89   : > { %618 = vrot.lane.b32.xlu2 %v1420_v19, %s1302_s21 }
  0x8e   : > { %610 = vrot.lane.b32.xlu1 %v1428_v29, %s1302_s21 }
  0x8f   : > { %608 = vrot.lane.b32.xlu0 %v1432_v30, %s1302_s21 }
  0x91   : > { %612 = vrot.lane.b32.xlu2 %v1437_v33, %s1302_s21  ;;  %s891_s21 = scalar_lea.vmem (%p1373_p5), %s1582_s3, %s1142_s9 }
  0x96   : > { %680 = vrot.lane.b32.xlu1 %v1425_v25, %s1303_s22 }
  0x97   : > { %678 = vrot.lane.b32.xlu0 %v1422_v23, %s1303_s22 }
  0x99   : > { %682 = vrot.lane.b32.xlu2 %v1420_v19, %s1303_s22 }
  0x9e   : > { %674 = vrot.lane.b32.xlu1 %v1428_v29, %s1303_s22 }
  0x9f   : > { %672 = vrot.lane.b32.xlu0 %v1432_v30, %s1303_s22 }
  0xa1   : > { %676 = vrot.lane.b32.xlu2 %v1437_v33, %s1303_s22 }
  0xa3   : > { %v318_v34 = vpop.permute.xlu2 %317 }
  0xa6   : > { %744 = vrot.lane.b32.xlu1 %v1425_v25, %s1304_s24 }
  0xa7   : > { %742 = vrot.lane.b32.xlu0 %v1422_v23, %s1304_s24 }
  0xa9   : > { %746 = vrot.lane.b32.xlu2 %v1420_v19, %s1304_s24 }
  0xab   : > { %v320_v35 = vpop.permute.xlu2 %319 }
  0xac   : > { %v329_v47 = vsel %vm327_vm1, %v318_v34, %v320_v35 }
  0xae   : > { %738 = vrot.lane.b32.xlu1 %v1428_v29, %s1304_s24 }
  0xaf   : > { %736 = vrot.lane.b32.xlu0 %v1432_v30, %s1304_s24 }
  0xb1   : > { %740 = vrot.lane.b32.xlu2 %v1437_v33, %s1304_s24 }
  0xb3   : > { %v427_v36 = vpop.permute.xlu2 %426 }
  0xb6   : > { %808 = vrot.lane.b32.xlu1 %v1425_v25, %s1305_s25  ;;  %v1161_v25 = vld [vmem:[%s1580_s1 + $0x28] sm:$0xff] }
  0xb7   : > { %806 = vrot.lane.b32.xlu0 %v1422_v23, %s1305_s25 }
  0xb8   : > { %v326_v37 = vpop.permute.xlu1 %325 }
  0xb9   : > { %v322_v38 = vpop.permute.xlu0 %321  ;;  %810 = vrot.lane.b32.xlu2 %v1420_v19, %s1305_s25 }
  0xbb   : > { %v421_v40 = vpop.permute.xlu2 %420 }
  0xbe   : > { %802 = vrot.lane.b32.xlu1 %v1428_v29, %s1305_s25 }
  0xbf   : > { %800 = vrot.lane.b32.xlu0 %v1432_v30, %s1305_s25 }
  0xc0   : > { %v316_v41 = vpop.permute.xlu1 %315 }
  0xc1   : > { %v324_v42 = vpop.permute.xlu0 %323  ;;  %804 = vrot.lane.b32.xlu2 %v1437_v33, %s1305_s25  ;;  %v328_v46 = vsel %vm327_vm1, %v316_v41, %v318_v34 }
  0xc2   : > { %v330_v43 = vsel %vm327_vm1, %v322_v38, %v324_v42  ;;  %v331_v44 = vsel %vm327_vm1, %v324_v42, %v326_v37  ;;  %v856_v38 = vld [vmem:[%s1581_s2] sm:$0xff] }
  0xc3   : > { %346 = vmatpush.bf16.msra.mxu0 %v330_v43  ;;  %360 = vmatpush.bf16.msra.mxu1 %v331_v44  ;;  %v491_v45 = vpop.permute.xlu2 %490 }
  0xc7   : > { %347 = vmatpush.bf16.msra.mxu0 %v328_v46  ;;  %361 = vmatpush.bf16.msra.mxu1 %v329_v47 }
  0xc8   : > { %v425_v49 = vpop.permute.xlu1 %424 }
  0xc9   : > { %v423_v50 = vpop.permute.xlu0 %422  ;;  %v432_v51 = vsel %vm428_vm2, %v425_v49, %v427_v36  ;;  %v1162_v36 = vld [vmem:[%s1580_s1 + $0x30] sm:$0xff] }
  0xca   : > { %v431_v52 = vsel %vm428_vm2, %v423_v50, %v425_v49  ;;  %1075 = vmatmul.msk.bf16.vlgmr.msra.gmra.mxu0 %vm336_vm0, %v1157_v48  ;;  %1076 = vmatmul.msk.bf16.vlgmr.msra.gmra.mxu1 %vm336_vm0, %v1157_v48  ;;  %v1163_v49 = vld [vmem:[%s1580_s1 + $0x38] sm:$0xff] }
  0xcb   : > { %460 = vmatpush.bf16.msrb.mxu1 %v432_v51  ;;  %446 = vmatpush.bf16.msrb.mxu0 %v431_v52  ;;  %v485_v53 = vpop.permute.xlu2 %484 }
  0xd0   : > { %v419_v54 = vpop.permute.xlu1 %418 }
  0xd1   : > { %v417_v55 = vpop.permute.xlu0 %416  ;;  %v430_v56 = vsel %vm428_vm2, %v419_v54, %v421_v40  ;;  %v1306_v40 = vmov 0  }
  0xd2   : > { %v429_v57 = vsel %vm428_vm2, %v417_v55, %v419_v54  ;;  %461 = vmatpush.bf16.msrb.mxu1 %v430_v56  ;;  %1230 = vset.pattern.permute.xlu0 %v1306_v40 }
  0xd3   : > { %447 = vmatpush.bf16.msrb.mxu0 %v429_v57  ;;  %v555_v58 = vpop.permute.xlu2 %554  ;;  %1231 = vset.pattern.permute.xlu1 %v1306_v40 }
  0xd4   : > { %860 = vperm.xlu0 %1230, %v856_v38   ;;  %865 = vperm.xlu1 %1231, %v857_v39  }
  0xd8   : > { %v489_v60 = vpop.permute.xlu1 %488 }
  0xd9   : > { %v487_v61 = vpop.permute.xlu0 %486  ;;  %v496_v62 = vsel %vm492_vm3, %v489_v60, %v491_v45 }
  0xda   : > { %v495_v63 = vsel %vm492_vm3, %v487_v61, %v489_v60  ;;  %524 = vmatpush.bf16.msrb.mxu3 %v496_v62  ;;  %1089 = vmatmul.msk.bf16.vlgmr.msrb.gmra.mxu0 %vm336_vm0, %v1158_v59  ;;  %v1164_v60 = vld [vmem:[%s1580_s1 + $0x40] sm:$0xff] }
  0xdb   : > { %510 = vmatpush.bf16.msrb.mxu2 %v495_v63  ;;  %1090 = vmatmul.msk.bf16.vlgmr.msrb.gmra.mxu1 %vm336_vm0, %v1158_v59  ;;  %v549_v0 = vpop.permute.xlu2 %548 }
  0xe0   : > { %v483_v1 = vpop.permute.xlu1 %482 }
  0xe1   : > { %v481_v2 = vpop.permute.xlu0 %480  ;;  %v494_v3 = vsel %vm492_vm3, %v483_v1, %v485_v53 }
  0xe2   : > { %v493_v5 = vsel %vm492_vm3, %v481_v2, %v483_v1  ;;  %525 = vmatpush.bf16.msrb.mxu3 %v494_v3  ;;  %v403_v2 = vpop.f32.mrf.mxu3  ;;  %v389_v3 = vpop.f32.mrf.mxu2 }
  0xe3   : > { %511 = vmatpush.bf16.msrb.mxu2 %v493_v5  ;;  %v619_v7 = vpop.permute.xlu2 %618 }
  0xe5   : > { %1098 = vmatmul.msk.bf16.vlgmr.msrb.gmra.mxu3 %vm336_vm0, %v1159_v4 }
  0xe6   : > { %1097 = vmatmul.msk.bf16.vlgmr.msrb.gmra.mxu2 %vm336_vm0, %v1159_v4 }
  0xe8   : > { %v553_v6 = vpop.permute.xlu1 %552 }
  0xe9   : > { %v551_v8 = vpop.permute.xlu0 %550  ;;  %v560_v9 = vsel %vm556_vm4, %v553_v6, %v555_v58 }
  0xea   : > { %v559_v10 = vsel %vm556_vm4, %v551_v8, %v553_v6  ;;  %588 = vmatpush.bf16.msra.mxu1 %v560_v9  ;;  %v405_v6 = vpop.f32.mrf.mxu3 }
  0xeb   : > { %574 = vmatpush.bf16.msra.mxu0 %v559_v10  ;;  %v613_v16 = vpop.permute.xlu2 %612 }
  0xf0   : > { %v547_v11 = vpop.permute.xlu1 %546 }
  0xf1   : > { %v545_v12 = vpop.permute.xlu0 %544  ;;  %v558_v13 = vsel %vm556_vm4, %v547_v11, %v549_v0 }
  0xf2   : > { %v557_v15 = vsel %vm556_vm4, %v545_v12, %v547_v11  ;;  %589 = vmatpush.bf16.msra.mxu1 %v558_v13 }
  0xf3   : > { %575 = vmatpush.bf16.msra.mxu0 %v557_v15  ;;  %v683_v21 = vpop.permute.xlu2 %682 }
  0xf5   : > { %1106 = vmatmul.msk.bf16.vlgmr.msra.gmra.mxu1 %vm336_vm0, %v1160_v14 }
  0xf6   : > { %1105 = vmatmul.msk.bf16.vlgmr.msra.gmra.mxu0 %vm336_vm0, %v1160_v14 }
  0xf8   : > { %v617_v17 = vpop.permute.xlu1 %616 }
  0xf9   : > { %v615_v18 = vpop.permute.xlu0 %614  ;;  %v624_v19 = vsel %vm620_vm5, %v617_v17, %v619_v7  ;;  %v391_v7 = vpop.f32.mrf.mxu2 }
  0xfa   : > { %v623_v20 = vsel %vm620_vm5, %v615_v18, %v617_v17  ;;  %652 = vmatpush.bf16.msra.mxu3 %v624_v19 }
  0xfb   : > { %638 = vmatpush.bf16.msra.mxu2 %v623_v20  ;;  %v677_v27 = vpop.permute.xlu2 %676 }
 0x100   : > { %v611_v22 = vpop.permute.xlu1 %610 }
 0x101   : > { %v609_v23 = vpop.permute.xlu0 %608  ;;  %v622_v24 = vsel %vm620_vm5, %v611_v22, %v613_v16 }
 0x102   : > { %v621_v26 = vsel %vm620_vm5, %v609_v23, %v611_v22  ;;  %653 = vmatpush.bf16.msra.mxu3 %v622_v24 }
 0x103   : > { %639 = vmatpush.bf16.msra.mxu2 %v621_v26  ;;  %v747_v33 = vpop.permute.xlu2 %746 }
 0x105   : > { %1114 = vmatmul.msk.bf16.vlgmr.msra.gmra.mxu3 %vm336_vm0, %v1161_v25 }
 0x106   : > { %1113 = vmatmul.msk.bf16.vlgmr.msra.gmra.mxu2 %vm336_vm0, %v1161_v25 }
 0x108   : > { %v681_v28 = vpop.permute.xlu1 %680 }
 0x109   : > { %v679_v29 = vpop.permute.xlu0 %678  ;;  %v688_v30 = vsel %vm684_vm6, %v681_v28, %v683_v21 }
 0x10a   : > { %v687_v31 = vsel %vm684_vm6, %v679_v29, %v681_v28  ;;  %716 = vmatpush.bf16.msrb.mxu1 %v688_v30 }
 0x10b   : > { %702 = vmatpush.bf16.msrb.mxu0 %v687_v31  ;;  %v741_v45 = vpop.permute.xlu2 %740 }
 0x110   : > { %v675_v32 = vpop.permute.xlu1 %674 }
 0x111   : > { %v673_v34 = vpop.permute.xlu0 %672  ;;  %v686_v35 = vsel %vm684_vm6, %v675_v32, %v677_v27 }
 0x112   : > { %v685_v37 = vsel %vm684_vm6, %v673_v34, %v675_v32  ;;  %717 = vmatpush.bf16.msrb.mxu1 %v686_v35 }
 0x113   : > { %703 = vmatpush.bf16.msrb.mxu0 %v685_v37  ;;  %v811_v51 = vpop.permute.xlu2 %810 }
 0x115   : > { %1122 = vmatmul.msk.bf16.vlgmr.msrb.gmra.mxu1 %vm336_vm0, %v1162_v36 }
 0x116   : > { %1121 = vmatmul.msk.bf16.vlgmr.msrb.gmra.mxu0 %vm336_vm0, %v1162_v36 }
 0x118   : > { %v745_v41 = vpop.permute.xlu1 %744 }
 0x119   : > { %v743_v42 = vpop.permute.xlu0 %742  ;;  %v752_v43 = vsel %vm748_vm7, %v745_v41, %v747_v33 }
 0x11a   : > { %v751_v44 = vsel %vm748_vm7, %v743_v42, %v745_v41  ;;  %780 = vmatpush.bf16.msrb.mxu3 %v752_v43 }
 0x11b   : > { %766 = vmatpush.bf16.msrb.mxu2 %v751_v44  ;;  %v805_v56 = vpop.permute.xlu2 %804 }
 0x120   : > { %v739_v46 = vpop.permute.xlu1 %738 }
 0x121   : > { %v737_v47 = vpop.permute.xlu0 %736  ;;  %v750_v48 = vsel %vm748_vm7, %v739_v46, %v741_v45 }
 0x122   : > { %v749_v50 = vsel %vm748_vm7, %v737_v47, %v739_v46  ;;  %781 = vmatpush.bf16.msrb.mxu3 %v750_v48 }
 0x123   : > { %767 = vmatpush.bf16.msrb.mxu2 %v749_v50 }
 0x125   : > { %1130 = vmatmul.msk.bf16.vlgmr.msrb.gmra.mxu3 %vm336_vm0, %v1163_v49 }
 0x126   : > { %1129 = vmatmul.msk.bf16.vlgmr.msrb.gmra.mxu2 %vm336_vm0, %v1163_v49 }
 0x128   : > { %v809_v52 = vpop.permute.xlu1 %808 }
 0x129   : > { %v807_v53 = vpop.permute.xlu0 %806  ;;  %v816_v54 = vsel %vm812_vm8, %v809_v52, %v811_v51 }
 0x12a   : > { %v815_v55 = vsel %vm812_vm8, %v807_v53, %v809_v52  ;;  %844 = vmatpush.bf16.msra.mxu1 %v816_v54 }
 0x12b   : > { %830 = vmatpush.bf16.msra.mxu0 %v815_v55 }
 0x130   : > { %v803_v57 = vpop.permute.xlu1 %802 }
 0x131   : > { %v801_v58 = vpop.permute.xlu0 %800  ;;  %v814_v59 = vsel %vm812_vm8, %v803_v57, %v805_v56 }
 0x132   : > { %v813_v61 = vsel %vm812_vm8, %v801_v58, %v803_v57  ;;  %845 = vmatpush.bf16.msra.mxu1 %v814_v59 }
 0x133   : > { %831 = vmatpush.bf16.msra.mxu0 %v813_v61 }
 0x135   : > { %1138 = vmatmul.msk.bf16.vlgmr.msra.gmra.mxu1 %vm336_vm0, %v1164_v60 }
 0x136   : > { %1137 = vmatmul.msk.bf16.vlgmr.msra.gmra.mxu0 %vm336_vm0, %v1164_v60 }
 0x146   : > { %v861_v49 = vpop.permute.xlu0 %860 }
 0x147   : > { %v363_v62 = vpop.f32.mrf.mxu1  ;;  %v349_v63 = vpop.f32.mrf.mxu0 }
 0x148   : > { %v404_v20 = vadd.f32 %v403_v2, %v363_v62  ;;  %v390_v21 = vadd.f32 %v389_v3, %v349_v63  ;;  %v866_v2 = vpop.permute.xlu1 %865 }
 0x14f   : > { %v365_v0 = vpop.f32.mrf.mxu1  ;;  %v351_v1 = vpop.f32.mrf.mxu0 }
 0x150   : > { %v406_v30 = vadd.f32 %v405_v6, %v365_v0  ;;  %v392_v31 = vadd.f32 %v391_v7, %v351_v1 }
 0x157   : > { %v449_v5 = vpop.f32.mrf.mxu0 }
 0x158   : > { %v463_v4 = vpop.f32.mrf.mxu1  ;;  %v468_v25 = vadd.f32 %v449_v5, %v390_v21 }
 0x159   : > { %v469_v24 = vadd.f32 %v463_v4, %v404_v20 }
 0x15f   : > { %v451_v9 = vpop.f32.mrf.mxu0 }
 0x160   : > { %v465_v8 = vpop.f32.mrf.mxu1  ;;  %v470_v40 = vadd.f32 %v451_v9, %v392_v31 }
 0x161   : > { %v471_v37 = vadd.f32 %v465_v8, %v406_v30 }
 0x168   : > { %v527_v10 = vpop.f32.mrf.mxu3 }
 0x169   : > { %v513_v11 = vpop.f32.mrf.mxu2  ;;  %v533_v28 = vadd.f32 %v527_v10, %v469_v24 }
 0x16a   : > { %v532_v29 = vadd.f32 %v513_v11, %v468_v25 }
 0x170   : > { %v529_v14 = vpop.f32.mrf.mxu3 }
 0x171   : > { %v515_v15 = vpop.f32.mrf.mxu2  ;;  %v535_v44 = vadd.f32 %v529_v14, %v471_v37 }
 0x172   : > { %v591_v12 = vpop.f32.mrf.mxu1  ;;  %v534_v46 = vadd.f32 %v515_v15, %v470_v40 }
 0x173   : > { %v577_v13 = vpop.f32.mrf.mxu0  ;;  %v597_v33 = vadd.f32 %v591_v12, %v533_v28 }
 0x174   : > { %v596_v35 = vadd.f32 %v577_v13, %v532_v29 }
 0x17a   : > { %v593_v16 = vpop.f32.mrf.mxu1 }
 0x17b   : > { %v579_v17 = vpop.f32.mrf.mxu0  ;;  %v599_v50 = vadd.f32 %v593_v16, %v535_v44 }
 0x17c   : > { %v598_v53 = vadd.f32 %v579_v17, %v534_v46 }
 0x188   : > { %v655_v18 = vpop.f32.mrf.mxu3 }
 0x189   : > { %v641_v19 = vpop.f32.mrf.mxu2  ;;  %v661_v38 = vadd.f32 %v655_v18, %v597_v33 }
 0x18a   : > { %v660_v41 = vadd.f32 %v641_v19, %v596_v35 }
 0x190   : > { %v657_v26 = vpop.f32.mrf.mxu3 }
 0x191   : > { %v643_v27 = vpop.f32.mrf.mxu2  ;;  %v663_v55 = vadd.f32 %v657_v26, %v599_v50 }
 0x192   : > { %v719_v22 = vpop.f32.mrf.mxu1  ;;  %v662_v57 = vadd.f32 %v643_v27, %v598_v53 }
 0x193   : > { %v705_v23 = vpop.f32.mrf.mxu0  ;;  %v725_v42 = vadd.f32 %v719_v22, %v661_v38 }
 0x194   : > { %v724_v43 = vadd.f32 %v705_v23, %v660_v41 }
 0x19a   : > { %v721_v32 = vpop.f32.mrf.mxu1 }
 0x19b   : > { %v707_v34 = vpop.f32.mrf.mxu0  ;;  %v727_v60 = vadd.f32 %v721_v32, %v663_v55 }
 0x19c   : > { %v726_v62 = vadd.f32 %v707_v34, %v662_v57 }
 0x1a8   : > { %v783_v36 = vpop.f32.mrf.mxu3 }
 0x1a9   : > { %v769_v39 = vpop.f32.mrf.mxu2  ;;  %v789_v45 = vadd.f32 %v783_v36, %v725_v42 }
 0x1aa   : > { %v788_v47 = vadd.f32 %v769_v39, %v724_v43 }
 0x1b0   : > { %v785_v58 = vpop.f32.mrf.mxu3 }
 0x1b1   : > { %v771_v61 = vpop.f32.mrf.mxu2  ;;  %v791_v63 = vadd.f32 %v785_v58, %v727_v60 }
 0x1b2   : > { %v847_v48 = vpop.f32.mrf.mxu1  ;;  %v790_v0 = vadd.f32 %v771_v61, %v726_v62 }
 0x1b3   : > { %v833_v51 = vpop.f32.mrf.mxu0  ;;  %v853_v52 = vadd.f32 %v847_v48, %v789_v45 }
 0x1b4   : > { %v852_v54 = vadd.f32 %v833_v51, %v788_v47 }
 0x1b5   : > { %v869_v56 = vadd.f32 %v861_v49, %v853_v52 }
 0x1b6   : > { %v868_v59 = vadd.f32 %v861_v49, %v852_v54 }
 0x1b7   : > { %1232 = vtanh.f32 %v869_v56 }
 0x1b8   : > { %1234 = vtanh.f32 %v868_v59 }
 0x1ba   : > { %v849_v1 = vpop.f32.mrf.mxu1 }
 0x1bb   : > { %v835_v3 = vpop.f32.mrf.mxu0  ;;  %v855_v4 = vadd.f32 %v849_v1, %v791_v63 }
 0x1bc   : > { %v854_v5 = vadd.f32 %v835_v3, %v790_v0 }
 0x1bd   : > { %v1233_v6 = vpop.eup %1232  ;;  %v871_v7 = vadd.f32 %v866_v2, %v855_v4 }
 0x1be   : > { %v1235_v8 = vpop.eup %1234  ;;  %877 = vst [vmem:[%s1397_s10 + $0x8] sm:$0xff] %v1233_v6  ;;  %v870_v9 = vadd.f32 %v866_v2, %v854_v5 }
 0x1bf   : > { %876 = vst [vmem:[%s1397_s10] sm:$0xff] %v1235_v8  ;;  %1236 = vtanh.f32 %v871_v7 }
 0x1c0   : > { %1238 = vtanh.f32 %v870_v9 }
 0x1c3   : > { %886 = sbr.rel (!%p1373_p5) target bundleno = 464 (0x1d0), region = 84 }
 0x1c5   : > { %v1237_v10 = vpop.eup %1236  ;;  %v906_v13 = vld [vmem:[%s1397_s10 + $0x8] sm:$0xff] (%p1373_p5) }
 0x1c6   : > { %v1239_v11 = vpop.eup %1238  ;;  %879 = vst [vmem:[%s1397_s10 + $0x18] sm:$0xff] %v1237_v10  ;;  %v904_v12 = vld [vmem:[%s1397_s10] sm:$0xff] (%p1373_p5) }
 0x1c7   : > { %878 = vst [vmem:[%s1397_s10 + $0x10] sm:$0xff] %v1239_v11 }
 0x1c8   : > { %905 = vst [vmem:[%s891_s21] sm:$0xff] %v904_v12 }
 0x1c9   : > { %907 = vst [vmem:[%s891_s21 + $0x8] sm:$0xff] %v906_v13 }
 0x1cd   : > { %v910_v15 = vld [vmem:[%s1397_s10 + $0x18] sm:$0xff] }
 0x1ce   : > { %v908_v14 = vld [vmem:[%s1397_s10 + $0x10] sm:$0xff]  ;;  %911 = vst [vmem:[%s891_s21 + $0x28] sm:$0xff] %v910_v15 }
 0x1cf   : > { %909 = vst [vmem:[%s891_s21 + $0x20] sm:$0xff] %v908_v14 }
 0x1d0 PF: > { %s13_s18 = sadd.s32 1, %s1296_s18   ;;  %s1584_s12 = smov %s1276_s13 }
 0x1d1   : > { %p10_p13 = scmp.ge.s32.totalorder %s13_s18, 6   ;;  %s1585_s13 = smov %s1384_s27 }
 0x1d2   : > { %s1586_s14 = smov %s1288_s16  ;;  %s1587_s15 = smov %s1292_s17 }
 0x1d3   : > { %s1588_s16 = smov %s1591_s19  ;;  %s1589_s17 = smov %s1595_s20 }
 0x1d4   :  { %12 = sbr.rel (!%p10_p13) target bundleno = 4 (0x4), region = 167 }
 0x1d9   :  { %927 = vsyncmov [#allocation3] }
 0x1dc   :  { %s928_s23 = vpop.sfrf %927 }
 0x1dd   :  { %p1145_p0 = scmp.ne.s32.totalorder %s928_s23, 0 }
 0x1df   :  { %932 = shalt.err (%p1145_p0)  }
 0x1e0   :  { %934 = vsyncmov [#allocation3 + $0x1] }
 0x1e3   :  { %s935_s10 = vpop.sfrf %934 }
 0x1e4   :  { %p1146_p1 = scmp.ne.s32.totalorder %s935_s10, 0 }
 0x1e6   :  { %939 = shalt.err (%p1146_p1)  }

</bundles_post_ra>
